<compile_context>
chip_gen: v7x
topology: tpu7x:2x2x1
jax: 0.10.0
libtpu: 0.0.40
codegen_flags: <defaults>
</compile_context>

<pallas_src>
import functools

import jax
import jax.numpy as jnp
from jax import lax
from jax.experimental import pallas as pl
from jax.experimental.pallas import tpu as pltpu

EPS = 1e-5


# --------------------------------------------------------------------------
# K1: 1x1 conv  (rows, Cin) @ (Cin, P)  + per-tile (sum, sumsq) partials.
# --------------------------------------------------------------------------
def _conv1_kernel(x_ref, w_ref, y_ref, st_ref):
    y = jnp.dot(x_ref[...].astype(jnp.bfloat16), w_ref[...],
                preferred_element_type=jnp.float32)
    y_ref[...] = y.astype(jnp.bfloat16)
    s = jnp.sum(y, axis=0, keepdims=True)          # (1, P)
    ss = jnp.sum(y * y, axis=0, keepdims=True)     # (1, P)
    st_ref[0] = jnp.concatenate([s, ss], axis=0)   # (2, P)


# --------------------------------------------------------------------------
# K2: BN1(affine)+ReLU -> 3x3 conv (pad=1), one image per grid step.
# --------------------------------------------------------------------------
def _conv3x3_kernel(y1_ref, aff_ref, w_ref, y2_ref, st_ref, pad_ref):
    _, H, W, P = y1_ref.shape

    # BN1 folded affine + ReLU, in f32.
    y = jnp.maximum(y1_ref[0].astype(jnp.float32) * aff_ref[0] + aff_ref[1], 0.0)

    # H-zero-padded copy in VMEM: H shifts become contiguous major-axis slices.
    pad_ref[0, :, :] = jnp.zeros((W, P), jnp.float32)
    pad_ref[H + 1, :, :] = jnp.zeros((W, P), jnp.float32)
    pad_ref[1:H + 1, :, :] = y

    col = lax.broadcasted_iota(jnp.int32, (H, W, P), 1)
    acc = None
    for dy in range(3):
        ydy = pad_ref[dy:dy + H, :, :]                      # (H, W, P) halo slice
        for dx in range(3):
            d = dx - 1
            if d == 0:
                tap = ydy
            else:
                # W shift via XLU sublane roll + boundary mask (no copies).
                tap = pltpu.roll(ydy, shift=(-d) % W, axis=1)
                bad = W - 1 if d > 0 else 0
                tap = jnp.where(col == bad, 0.0, tap)
            contrib = jnp.dot(tap.reshape(H * W, P).astype(jnp.bfloat16),
                              w_ref[dy * 3 + dx],
                              preferred_element_type=jnp.float32)
            acc = contrib if acc is None else acc + contrib

    y2_ref[0] = acc.reshape(H, W, P).astype(jnp.bfloat16)
    s = jnp.sum(acc, axis=0, keepdims=True)
    ss = jnp.sum(acc * acc, axis=0, keepdims=True)
    st_ref[0] = jnp.concatenate([s, ss], axis=0)


# --------------------------------------------------------------------------
# K3: BN2(affine)+ReLU -> 1x1 expansion conv, rows-tiled.
# --------------------------------------------------------------------------
def _bn_relu_conv_kernel(yin_ref, aff_ref, w_ref, yout_ref, st_ref):
    y = jnp.maximum(yin_ref[...].astype(jnp.float32) * aff_ref[0] + aff_ref[1], 0.0)
    z = jnp.dot(y.astype(jnp.bfloat16), w_ref[...],
                preferred_element_type=jnp.float32)
    yout_ref[...] = z.astype(jnp.bfloat16)
    s = jnp.sum(z, axis=0, keepdims=True)
    ss = jnp.sum(z * z, axis=0, keepdims=True)
    st_ref[0] = jnp.concatenate([s, ss], axis=0)


# --------------------------------------------------------------------------
# K4: BN3(affine) + residual + ReLU, rows-tiled.
# --------------------------------------------------------------------------
def _bn_add_relu_kernel(y3_ref, aff_ref, res_ref, o_ref):
    z = y3_ref[...].astype(jnp.float32) * aff_ref[0] + aff_ref[1]
    o_ref[...] = jnp.maximum(z + res_ref[...], 0.0)


# --------------------------------------------------------------------------
# Wrapper
# --------------------------------------------------------------------------
def _row_tile(n_rows, target):
    for t in (target, 2048, 1024, 512, 256, 128, 64, 32, 16, 8):
        if t <= n_rows and n_rows % t == 0:
            return t
    return n_rows


def _bn_fold(partial_stats, gamma, beta, count):
    """(per-tile sum, sumsq) partials -> per-channel (scale, shift) so BN(y) = y*scale+shift."""
    tot = jnp.sum(partial_stats, axis=0)             # (2, C)
    mean = tot[0] / count
    var = tot[1] / count - mean * mean               # biased var (PyTorch train mode)
    scale = gamma * lax.rsqrt(var + EPS)
    shift = beta - mean * scale
    return jnp.stack([scale, shift], axis=0)         # (2, C) f32


def bottleneck_pallas(x_nchw, params, *, row_block=1024):
    """x_nchw: (N, 4*planes, H, W) f32.  Returns (N, 4*planes, H, W) f32."""
    w1, g1, b1, w2, g2, b2, w3, g3, b3 = params
    x = jnp.transpose(x_nchw, (0, 2, 3, 1))          # NCHW -> NHWC
    N, H, W, Cin = x.shape
    P = w1.shape[1]
    Cout = w3.shape[1]
    assert Cin == Cout, "stride=1 / downsample=None requires inplanes == 4*planes"

    R = N * H * W
    TR = _row_tile(R, row_block)
    nt = R // TR

    w1b = w1.astype(jnp.bfloat16)                    # (Cin, P)
    w2b = w2.reshape(9, P, P).astype(jnp.bfloat16)   # (ky,kx,ci,co) -> (9, P, P)
    w3b = w3.astype(jnp.bfloat16)                    # (P, Cout)
    x2d = x.reshape(R, Cin)

    parallel = pltpu.CompilerParams(dimension_semantics=("parallel",))

    # ---- K1: conv1 (1x1) + stats ------------------------------------------
    y1, st1 = pl.pallas_call(
        _conv1_kernel,
        grid_spec=pltpu.PrefetchScalarGridSpec(
            num_scalar_prefetch=0,
            grid=(nt,),
            in_specs=[pl.BlockSpec((TR, Cin), lambda i: (i, 0)),
                      pl.BlockSpec((Cin, P), lambda i: (0, 0))],
            out_specs=[pl.BlockSpec((TR, P), lambda i: (i, 0)),
                       pl.BlockSpec((1, 2, P), lambda i: (i, 0, 0))]),
        out_shape=(jax.ShapeDtypeStruct((R, P), jnp.bfloat16),
                   jax.ShapeDtypeStruct((nt, 2, P), jnp.float32)),
        compiler_params=parallel,
    )(x2d, w1b)
    aff1 = _bn_fold(st1, g1, b1, R)

    # ---- K2: BN1+ReLU -> conv2 (3x3, pad 1), one image per step ------------
    y2, st2 = pl.pallas_call(
        _conv3x3_kernel,
        grid_spec=pltpu.PrefetchScalarGridSpec(
            num_scalar_prefetch=0,
            grid=(N,),
            in_specs=[pl.BlockSpec((1, H, W, P), lambda n: (n, 0, 0, 0)),
                      pl.BlockSpec((2, P), lambda n: (0, 0)),
                      pl.BlockSpec((9, P, P), lambda n: (0, 0, 0))],
            out_specs=[pl.BlockSpec((1, H, W, P), lambda n: (n, 0, 0, 0)),
                       pl.BlockSpec((1, 2, P), lambda n: (n, 0, 0))],
            scratch_shapes=[pltpu.VMEM((H + 2, W, P), jnp.float32)]),
        out_shape=(jax.ShapeDtypeStruct((N, H, W, P), jnp.bfloat16),
                   jax.ShapeDtypeStruct((N, 2, P), jnp.float32)),
        compiler_params=parallel,
    )(y1.reshape(N, H, W, P), aff1, w2b)
    aff2 = _bn_fold(st2, g2, b2, R)

    # ---- K3: BN2+ReLU -> conv3 (1x1 expansion) + stats ----------------------
    y3, st3 = pl.pallas_call(
        _bn_relu_conv_kernel,
        grid_spec=pltpu.PrefetchScalarGridSpec(
            num_scalar_prefetch=0,
            grid=(nt,),
            in_specs=[pl.BlockSpec((TR, P), lambda i: (i, 0)),
                      pl.BlockSpec((2, P), lambda i: (0, 0)),
                      pl.BlockSpec((P, Cout), lambda i: (0, 0))],
            out_specs=[pl.BlockSpec((TR, Cout), lambda i: (i, 0)),
                       pl.BlockSpec((1, 2, Cout), lambda i: (i, 0, 0))]),
        out_shape=(jax.ShapeDtypeStruct((R, Cout), jnp.bfloat16),
                   jax.ShapeDtypeStruct((nt, 2, Cout), jnp.float32)),
        compiler_params=parallel,
    )(y2.reshape(R, P), aff2, w3b)
    aff3 = _bn_fold(st3, g3, b3, R)

    # ---- K4: BN3 + residual + ReLU ------------------------------------------
    out2d = pl.pallas_call(
        _bn_add_relu_kernel,
        grid_spec=pltpu.PrefetchScalarGridSpec(
            num_scalar_prefetch=0,
            grid=(nt,),
            in_specs=[pl.BlockSpec((TR, Cout), lambda i: (i, 0)),
                      pl.BlockSpec((2, Cout), lambda i: (0, 0)),
                      pl.BlockSpec((TR, Cout), lambda i: (i, 0))],
            out_specs=pl.BlockSpec((TR, Cout), lambda i: (i, 0))),
        out_shape=jax.ShapeDtypeStruct((R, Cout), jnp.float32),
        compiler_params=parallel,
    )(y3, aff3, x2d)

    return jnp.transpose(out2d.reshape(N, H, W, Cout), (0, 3, 1, 2))


# ---------------- pure-JAX f32 reference (for validation) ----------------
def bottleneck_ref(x_nchw, params):
    w1, g1, b1, w2, g2, b2, w3, g3, b3 = params
    x = jnp.transpose(x_nchw, (0, 2, 3, 1))
    dn = ('NHWC', 'HWIO', 'NHWC')

    def bn(y, g, b):
        m = jnp.mean(y, axis=(0, 1, 2), keepdims=True)
        v = jnp.mean((y - m) ** 2, axis=(0, 1, 2), keepdims=True)
        return (y - m) * lax.rsqrt(v + EPS) * g + b

    y = lax.conv_general_dilated(x, w1.reshape(1, 1, *w1.shape), (1, 1), 'VALID',
                                 dimension_numbers=dn)
    y = jnp.maximum(bn(y, g1, b1), 0.0)
    y = lax.conv_general_dilated(y, w2, (1, 1), ((1, 1), (1, 1)),
                                 dimension_numbers=dn)
    y = jnp.maximum(bn(y, g2, b2), 0.0)
    y = lax.conv_general_dilated(y, w3.reshape(1, 1, *w3.shape), (1, 1), 'VALID',
                                 dimension_numbers=dn)
    y = bn(y, g3, b3)
    y = jnp.maximum(y + x, 0.0)
    return jnp.transpose(y, (0, 3, 1, 2))


def init_params(key, inplanes, planes):
    expansion = 4
    k1, k2, k3, kx = jax.random.split(key, 4)
    # conv weights stored channel-last: w1:(Cin,P), w2:(3,3,P,P)=HWIO, w3:(P,4P)
    w1 = 0.1 * jax.random.normal(k1, (inplanes, planes), jnp.float32)
    w2 = 0.1 * jax.random.normal(k2, (3, 3, planes, planes), jnp.float32)
    w3 = 0.1 * jax.random.normal(k3, (planes, planes * expansion), jnp.float32)
    # BatchNorm affine params: PyTorch defaults gamma=1, beta=0
    g1 = jnp.ones((planes,), jnp.float32)
    b1 = jnp.zeros((planes,), jnp.float32)
    g2 = jnp.ones((planes,), jnp.float32)
    b2 = jnp.zeros((planes,), jnp.float32)
    g3 = jnp.ones((planes * expansion,), jnp.float32)
    b3 = jnp.zeros((planes * expansion,), jnp.float32)
    return (w1, g1, b1, w2, g2, b2, w3, g3, b3), kx


if __name__ == "__main__":
    # planes=32 keeps Cin = Cout = 128 lane-dense while staying small;
    # inplanes must equal planes*4 (stride=1, downsample=None in the module).
    N, planes, H, W = 2, 32, 16, 16
    inplanes = planes * 4

    key = jax.random.PRNGKey(0)
    params, key = init_params(key, inplanes, planes)
    x = jax.random.normal(key, (N, inplanes, H, W), jnp.float32)

    fwd = jax.jit(functools.partial(bottleneck_pallas, row_block=128))
    out = jax.block_until_ready(fwd(x, params))
    ref = bottleneck_ref(x, params)

    assert out.shape == (N, inplanes, H, W)
    err = jnp.max(jnp.abs(out - ref))
    # bf16 matmul inputs (f32 accumulation) => looser tolerance than pure f32.
    assert jnp.allclose(out, ref, rtol=5e-2, atol=5e-2), f"max err {err}"

    print("KERNEL_OK")
</pallas_src>

<mosaic_0001>
module attributes {stable_mosaic.version = 11 : i64} {
  func.func @_conv1_kernel(%arg0: i32, %arg1: memref<128x128xf32, #tpu.memory_space<vmem>>, %arg2: memref<128x32xbf16, #tpu.memory_space<vmem>>, %arg3: memref<128x32xbf16, #tpu.memory_space<vmem>>, %arg4: memref<1x2x32xf32, #tpu.memory_space<vmem>>) attributes {dimension_semantics = [#tpu.dimension_semantics<parallel>], iteration_bounds = array<i64: 4>, scalar_prefetch = 0 : i64, scratch_operands = 0 : i64, tpu.core_type = #tpu.core_type<tc>, window_params = [{transform_indices = @transform_0, window_bounds = array<i64: 128, 128>}, {pipeline_mode = #tpu.pipeline_mode<synchronous>, transform_indices = @transform_1, window_bounds = array<i64: 128, 32>}, {transform_indices = @transform_2, window_bounds = array<i64: 128, 32>}, {transform_indices = @transform_3, window_bounds = array<i64: 1, 2, 32>}]} {
    %c0 = arith.constant 0 : index
    %c0_0 = arith.constant 0 : index
    %0 = vector.load %arg1[%c0, %c0_0] : memref<128x128xf32, #tpu.memory_space<vmem>>, vector<128x128xf32>
    %1 = arith.truncf %0 : vector<128x128xf32> to vector<128x128xbf16>
    %c0_1 = arith.constant 0 : index
    %c0_2 = arith.constant 0 : index
    %2 = vector.load %arg2[%c0_1, %c0_2] : memref<128x32xbf16, #tpu.memory_space<vmem>>, vector<128x32xbf16>
    %cst = arith.constant dense<0.000000e+00> : vector<128x32xf32>
    %3 = tpu.matmul %1, %2, %cst {dimension_numbers = #tpu.dot_dimension_numbers<[1], [0], [0], [1], [0, 0, 1, 1], [], []>} : vector<128x128xbf16>, vector<128x32xbf16>, vector<128x32xf32> -> vector<128x32xf32>
    %4 = arith.truncf %3 : vector<128x32xf32> to vector<128x32xbf16>
    %c0_3 = arith.constant 0 : index
    %c0_4 = arith.constant 0 : index
    %5 = vector.load %arg3[%c0_3, %c0_4] : memref<128x32xbf16, #tpu.memory_space<vmem>>, vector<128x32xbf16>
    tpu.vector_store %arg3[%c0_3, %c0_4], %4 {strides = array<i32>} : memref<128x32xbf16, #tpu.memory_space<vmem>>, vector<128x32xbf16>,
    %cst_5 = arith.constant dense<0.000000e+00> : vector<32xf32>
    %6 = vector.multi_reduction <add>, %3, %cst_5 [0] : vector<128x32xf32> to vector<32xf32>
    %7 = vector.shape_cast %6 : vector<32xf32> to vector<1x32xf32>
    %8 = arith.mulf %3, %3 : vector<128x32xf32>
    %cst_6 = arith.constant dense<0.000000e+00> : vector<32xf32>
    %9 = vector.multi_reduction <add>, %8, %cst_6 [0] : vector<128x32xf32> to vector<32xf32>
    %10 = vector.shape_cast %9 : vector<32xf32> to vector<1x32xf32>
    %11 = tpu.concatenate %7, %10 in 0 : vector<1x32xf32>, vector<1x32xf32> -> vector<2x32xf32>
    %c0_7 = arith.constant 0 : index
    %c0_8 = arith.constant 0 : index
    %c0_9 = arith.constant 0 : index
    %12 = vector.load %arg4[%c0_7, %c0_8, %c0_9] : memref<1x2x32xf32, #tpu.memory_space<vmem>>, vector<1x2x32xf32>
    %13 = vector.shape_cast %12 : vector<1x2x32xf32> to vector<2x32xf32>
    %14 = vector.shape_cast %11 : vector<2x32xf32> to vector<1x2x32xf32>
    tpu.vector_store %arg4[%c0_7, %c0_8, %c0_9], %14 {strides = array<i32>} : memref<1x2x32xf32, #tpu.memory_space<vmem>>, vector<1x2x32xf32>,
    return
  }
  func.func @transform_0(%arg0: i32) -> (i32, i32) {
    %c0_i32 = arith.constant 0 : i32
    %c0_i32_0 = arith.constant 0 : i32
    return %arg0, %c0_i32 : i32, i32
  }
  func.func @transform_1(%arg0: i32) -> (i32, i32) {
    %c0_i32 = arith.constant 0 : i32
    %c0_i32_0 = arith.constant 0 : i32
    %c0_i32_1 = arith.constant 0 : i32
    return %c0_i32, %c0_i32_0 : i32, i32
  }
  func.func @transform_2(%arg0: i32) -> (i32, i32) {
    %c0_i32 = arith.constant 0 : i32
    %c0_i32_0 = arith.constant 0 : i32
    return %arg0, %c0_i32 : i32, i32
  }
  func.func @transform_3(%arg0: i32) -> (i32, i32, i32) {
    %c0_i32 = arith.constant 0 : i32
    %c0_i32_0 = arith.constant 0 : i32
    %c0_i32_1 = arith.constant 0 : i32
    return %arg0, %c0_i32, %c0_i32_0 : i32, i32, i32
  }
}

module attributes {stable_mosaic.version = 11 : i64} {
  func.func @_bn_relu_conv_kernel(%arg0: i32, %arg1: memref<128x32xbf16, #tpu.memory_space<vmem>>, %arg2: memref<2x32xf32, #tpu.memory_space<vmem>>, %arg3: memref<32x128xbf16, #tpu.memory_space<vmem>>, %arg4: memref<128x128xbf16, #tpu.memory_space<vmem>>, %arg5: memref<1x2x128xf32, #tpu.memory_space<vmem>>) attributes {dimension_semantics = [#tpu.dimension_semantics<parallel>], iteration_bounds = array<i64: 4>, scalar_prefetch = 0 : i64, scratch_operands = 0 : i64, tpu.core_type = #tpu.core_type<tc>, window_params = [{transform_indices = @transform_0, window_bounds = array<i64: 128, 32>}, {pipeline_mode = #tpu.pipeline_mode<synchronous>, transform_indices = @transform_1, window_bounds = array<i64: 2, 32>}, {pipeline_mode = #tpu.pipeline_mode<synchronous>, transform_indices = @transform_2, window_bounds = array<i64: 32, 128>}, {transform_indices = @transform_3, window_bounds = array<i64: 128, 128>}, {transform_indices = @transform_4, window_bounds = array<i64: 1, 2, 128>}]} {
    %c0 = arith.constant 0 : index
    %c0_0 = arith.constant 0 : index
    %0 = vector.load %arg1[%c0, %c0_0] : memref<128x32xbf16, #tpu.memory_space<vmem>>, vector<128x32xbf16>
    %1 = arith.extf %0 : vector<128x32xbf16> to vector<128x32xf32>
    %c0_1 = arith.constant 0 : index
    %c0_2 = arith.constant 0 : index
    %2 = vector.load %arg2[%c0_1, %c0_2] : memref<2x32xf32, #tpu.memory_space<vmem>>, vector<1x32xf32>
    %3 = vector.shape_cast %2 : vector<1x32xf32> to vector<32xf32>
    %4 = vector.shape_cast %3 : vector<32xf32> to vector<1x32xf32>
    %5 = vector.broadcast %4 : vector<1x32xf32> to vector<128x32xf32>
    %6 = arith.mulf %1, %5 : vector<128x32xf32>
    %c1 = arith.constant 1 : index
    %c0_3 = arith.constant 0 : index
    %7 = vector.load %arg2[%c1, %c0_3] : memref<2x32xf32, #tpu.memory_space<vmem>>, vector<1x32xf32>
    %8 = vector.shape_cast %7 : vector<1x32xf32> to vector<32xf32>
    %9 = vector.shape_cast %8 : vector<32xf32> to vector<1x32xf32>
    %10 = vector.broadcast %9 : vector<1x32xf32> to vector<128x32xf32>
    %11 = arith.addf %6, %10 : vector<128x32xf32>
    %cst = arith.constant 0.000000e+00 : f32
    %12 = vector.broadcast %cst : f32 to vector<128x32xf32>
    %13 = arith.maximumf %11, %12 : vector<128x32xf32>
    %14 = arith.truncf %13 : vector<128x32xf32> to vector<128x32xbf16>
    %c0_4 = arith.constant 0 : index
    %c0_5 = arith.constant 0 : index
    %15 = vector.load %arg3[%c0_4, %c0_5] : memref<32x128xbf16, #tpu.memory_space<vmem>>, vector<32x128xbf16>
    %cst_6 = arith.constant dense<0.000000e+00> : vector<128x128xf32>
    %16 = tpu.matmul %14, %15, %cst_6 {dimension_numbers = #tpu.dot_dimension_numbers<[1], [0], [0], [1], [0, 0, 1, 1], [], []>} : vector<128x32xbf16>, vector<32x128xbf16>, vector<128x128xf32> -> vector<128x128xf32>
    %17 = arith.truncf %16 : vector<128x128xf32> to vector<128x128xbf16>
    %c0_7 = arith.constant 0 : index
    %c0_8 = arith.constant 0 : index
    %18 = vector.load %arg4[%c0_7, %c0_8] : memref<128x128xbf16, #tpu.memory_space<vmem>>, vector<128x128xbf16>
    tpu.vector_store %arg4[%c0_7, %c0_8], %17 {strides = array<i32>} : memref<128x128xbf16, #tpu.memory_space<vmem>>, vector<128x128xbf16>,
    %cst_9 = arith.constant dense<0.000000e+00> : vector<128xf32>
    %19 = vector.multi_reduction <add>, %16, %cst_9 [0] : vector<128x128xf32> to vector<128xf32>
    %20 = vector.shape_cast %19 : vector<128xf32> to vector<1x128xf32>
    %21 = arith.mulf %16, %16 : vector<128x128xf32>
    %cst_10 = arith.constant dense<0.000000e+00> : vector<128xf32>
    %22 = vector.multi_reduction <add>, %21, %cst_10 [0] : vector<128x128xf32> to vector<128xf32>
    %23 = vector.shape_cast %22 : vector<128xf32> to vector<1x128xf32>
    %24 = tpu.concatenate %20, %23 in 0 : vector<1x128xf32>, vector<1x128xf32> -> vector<2x128xf32>
    %c0_11 = arith.constant 0 : index
    %c0_12 = arith.constant 0 : index
    %c0_13 = arith.constant 0 : index
    %25 = vector.load %arg5[%c0_11, %c0_12, %c0_13] : memref<1x2x128xf32, #tpu.memory_space<vmem>>, vector<1x2x128xf32>
    %26 = vector.shape_cast %25 : vector<1x2x128xf32> to vector<2x128xf32>
    %27 = vector.shape_cast %24 : vector<2x128xf32> to vector<1x2x128xf32>
    tpu.vector_store %arg5[%c0_11, %c0_12, %c0_13], %27 {strides = array<i32>} : memref<1x2x128xf32, #tpu.memory_space<vmem>>, vector<1x2x128xf32>,
    return
  }
  func.func @transform_0(%arg0: i32) -> (i32, i32) {
    %c0_i32 = arith.constant 0 : i32
    %c0_i32_0 = arith.constant 0 : i32
    return %arg0, %c0_i32 : i32, i32
  }
  func.func @transform_1(%arg0: i32) -> (i32, i32) {
    %c0_i32 = arith.constant 0 : i32
    %c0_i32_0 = arith.constant 0 : i32
    %c0_i32_1 = arith.constant 0 : i32
    return %c0_i32, %c0_i32_0 : i32, i32
  }
  func.func @transform_2(%arg0: i32) -> (i32, i32) {
    %c0_i32 = arith.constant 0 : i32
    %c0_i32_0 = arith.constant 0 : i32
    %c0_i32_1 = arith.constant 0 : i32
    return %c0_i32, %c0_i32_0 : i32, i32
  }
  func.func @transform_3(%arg0: i32) -> (i32, i32) {
    %c0_i32 = arith.constant 0 : i32
    %c0_i32_0 = arith.constant 0 : i32
    return %arg0, %c0_i32 : i32, i32
  }
  func.func @transform_4(%arg0: i32) -> (i32, i32, i32) {
    %c0_i32 = arith.constant 0 : i32
    %c0_i32_0 = arith.constant 0 : i32
    %c0_i32_1 = arith.constant 0 : i32
    return %arg0, %c0_i32, %c0_i32_0 : i32, i32, i32
  }
}

module attributes {stable_mosaic.version = 11 : i64} {
  func.func @_conv3x3_kernel(%arg0: i32, %arg1: memref<1x16x16x32xbf16, #tpu.memory_space<vmem>>, %arg2: memref<2x32xf32, #tpu.memory_space<vmem>>, %arg3: memref<9x32x32xbf16, #tpu.memory_space<vmem>>, %arg4: memref<1x16x16x32xbf16, #tpu.memory_space<vmem>>, %arg5: memref<1x2x32xf32, #tpu.memory_space<vmem>>, %arg6: memref<18x16x32xf32, #tpu.memory_space<vmem>>) attributes {dimension_semantics = [#tpu.dimension_semantics<parallel>], iteration_bounds = array<i64: 2>, scalar_prefetch = 0 : i64, scratch_operands = 1 : i64, tpu.core_type = #tpu.core_type<tc>, window_params = [{transform_indices = @transform_0, window_bounds = array<i64: 1, 16, 16, 32>}, {pipeline_mode = #tpu.pipeline_mode<synchronous>, transform_indices = @transform_1, window_bounds = array<i64: 2, 32>}, {pipeline_mode = #tpu.pipeline_mode<synchronous>, transform_indices = @transform_2, window_bounds = array<i64: 9, 32, 32>}, {transform_indices = @transform_3, window_bounds = array<i64: 1, 16, 16, 32>}, {transform_indices = @transform_4, window_bounds = array<i64: 1, 2, 32>}]} {
    %c0 = arith.constant 0 : index
    %c0_0 = arith.constant 0 : index
    %c0_1 = arith.constant 0 : index
    %c0_2 = arith.constant 0 : index
    %0 = vector.load %arg1[%c0, %c0_0, %c0_1, %c0_2] : memref<1x16x16x32xbf16, #tpu.memory_space<vmem>>, vector<1x16x16x32xbf16>
    %1 = vector.shape_cast %0 : vector<1x16x16x32xbf16> to vector<16x16x32xbf16>
    %2 = arith.extf %1 : vector<16x16x32xbf16> to vector<16x16x32xf32>
    %c0_3 = arith.constant 0 : index
    %c0_4 = arith.constant 0 : index
    %3 = vector.load %arg2[%c0_3, %c0_4] : memref<2x32xf32, #tpu.memory_space<vmem>>, vector<1x32xf32>
    %4 = vector.shape_cast %3 : vector<1x32xf32> to vector<32xf32>
    %5 = vector.shape_cast %4 : vector<32xf32> to vector<1x1x32xf32>
    %6 = vector.broadcast %5 : vector<1x1x32xf32> to vector<16x16x32xf32>
    %7 = arith.mulf %2, %6 : vector<16x16x32xf32>
    %c1 = arith.constant 1 : index
    %c0_5 = arith.constant 0 : index
    %8 = vector.load %arg2[%c1, %c0_5] : memref<2x32xf32, #tpu.memory_space<vmem>>, vector<1x32xf32>
    %9 = vector.shape_cast %8 : vector<1x32xf32> to vector<32xf32>
    %10 = vector.shape_cast %9 : vector<32xf32> to vector<1x1x32xf32>
    %11 = vector.broadcast %10 : vector<1x1x32xf32> to vector<16x16x32xf32>
    %12 = arith.addf %7, %11 : vector<16x16x32xf32>
    %cst = arith.constant 0.000000e+00 : f32
    %13 = vector.broadcast %cst : f32 to vector<16x16x32xf32>
    %14 = arith.maximumf %12, %13 : vector<16x16x32xf32>
    %cst_6 = arith.constant 0.000000e+00 : f32
    %15 = vector.broadcast %cst_6 : f32 to vector<16x32xf32>
    %c0_7 = arith.constant 0 : index
    %c0_8 = arith.constant 0 : index
    %c0_9 = arith.constant 0 : index
    %16 = vector.load %arg6[%c0_7, %c0_8, %c0_9] : memref<18x16x32xf32, #tpu.memory_space<vmem>>, vector<1x16x32xf32>
    %17 = vector.shape_cast %16 : vector<1x16x32xf32> to vector<16x32xf32>
    %18 = vector.shape_cast %15 : vector<16x32xf32> to vector<1x16x32xf32>
    tpu.vector_store %arg6[%c0_7, %c0_8, %c0_9], %18 {strides = array<i32>} : memref<18x16x32xf32, #tpu.memory_space<vmem>>, vector<1x16x32xf32>,
    %cst_10 = arith.constant 0.000000e+00 : f32
    %19 = vector.broadcast %cst_10 : f32 to vector<16x32xf32>
    %c17 = arith.constant 17 : index
    %c0_11 = arith.constant 0 : index
    %c0_12 = arith.constant 0 : index
    %20 = vector.load %arg6[%c17, %c0_11, %c0_12] : memref<18x16x32xf32, #tpu.memory_space<vmem>>, vector<1x16x32xf32>
    %21 = vector.shape_cast %20 : vector<1x16x32xf32> to vector<16x32xf32>
    %22 = vector.shape_cast %19 : vector<16x32xf32> to vector<1x16x32xf32>
    tpu.vector_store %arg6[%c17, %c0_11, %c0_12], %22 {strides = array<i32>} : memref<18x16x32xf32, #tpu.memory_space<vmem>>, vector<1x16x32xf32>,
    %c1_13 = arith.constant 1 : index
    %c0_14 = arith.constant 0 : index
    %c0_15 = arith.constant 0 : index
    %23 = vector.load %arg6[%c1_13, %c0_14, %c0_15] : memref<18x16x32xf32, #tpu.memory_space<vmem>>, vector<16x16x32xf32>
    tpu.vector_store %arg6[%c1_13, %c0_14, %c0_15], %14 {strides = array<i32>} : memref<18x16x32xf32, #tpu.memory_space<vmem>>, vector<16x16x32xf32>,
    %24 = tpu.iota {dimensions = array<i32: 1>} : vector<16x16x32xi32>
    %c0_16 = arith.constant 0 : index
    %c0_17 = arith.constant 0 : index
    %c0_18 = arith.constant 0 : index
    %25 = vector.load %arg6[%c0_16, %c0_17, %c0_18] : memref<18x16x32xf32, #tpu.memory_space<vmem>>, vector<16x16x32xf32>
    %c1_i32 = arith.constant 1 : i32
    %26 = tpu.dynamic_rotate %25 by %c1_i32 dim 1 : vector<16x16x32xf32>, i32 -> vector<16x16x32xf32>
    %c0_i32 = arith.constant 0 : i32
    %27 = vector.broadcast %c0_i32 : i32 to vector<16x16x32xi32>
    %28 = arith.cmpi eq, %24, %27 : vector<16x16x32xi32>
    %cst_19 = arith.constant 0.000000e+00 : f32
    %29 = vector.broadcast %cst_19 : f32 to vector<16x16x32xf32>
    %30 = arith.select %28, %29, %26 : vector<16x16x32xi1>, vector<16x16x32xf32>
    %31 = vector.shape_cast %30 : vector<16x16x32xf32> to vector<256x32xf32>
    %32 = arith.truncf %31 : vector<256x32xf32> to vector<256x32xbf16>
    %c0_20 = arith.constant 0 : index
    %c0_21 = arith.constant 0 : index
    %c0_22 = arith.constant 0 : index
    %33 = vector.load %arg3[%c0_20, %c0_21, %c0_22] : memref<9x32x32xbf16, #tpu.memory_space<vmem>>, vector<1x32x32xbf16>
    %34 = vector.shape_cast %33 : vector<1x32x32xbf16> to vector<32x32xbf16>
    %cst_23 = arith.constant dense<0.000000e+00> : vector<256x32xf32>
    %35 = tpu.matmul %32, %34, %cst_23 {dimension_numbers = #tpu.dot_dimension_numbers<[1], [0], [0], [1], [0, 0, 1, 1], [], []>} : vector<256x32xbf16>, vector<32x32xbf16>, vector<256x32xf32> -> vector<256x32xf32>
    %36 = vector.shape_cast %25 : vector<16x16x32xf32> to vector<256x32xf32>
    %37 = arith.truncf %36 : vector<256x32xf32> to vector<256x32xbf16>
    %c1_24 = arith.constant 1 : index
    %c0_25 = arith.constant 0 : index
    %c0_26 = arith.constant 0 : index
    %38 = vector.load %arg3[%c1_24, %c0_25, %c0_26] : memref<9x32x32xbf16, #tpu.memory_space<vmem>>, vector<1x32x32xbf16>
    %39 = vector.shape_cast %38 : vector<1x32x32xbf16> to vector<32x32xbf16>
    %cst_27 = arith.constant dense<0.000000e+00> : vector<256x32xf32>
    %40 = tpu.matmul %37, %39, %cst_27 {dimension_numbers = #tpu.dot_dimension_numbers<[1], [0], [0], [1], [0, 0, 1, 1], [], []>} : vector<256x32xbf16>, vector<32x32xbf16>, vector<256x32xf32> -> vector<256x32xf32>
    %41 = arith.addf %35, %40 : vector<256x32xf32>
    %c15_i32 = arith.constant 15 : i32
    %42 = tpu.dynamic_rotate %25 by %c15_i32 dim 1 : vector<16x16x32xf32>, i32 -> vector<16x16x32xf32>
    %c15_i32_28 = arith.constant 15 : i32
    %43 = vector.broadcast %c15_i32_28 : i32 to vector<16x16x32xi32>
    %44 = arith.cmpi eq, %24, %43 : vector<16x16x32xi32>
    %cst_29 = arith.constant 0.000000e+00 : f32
    %45 = vector.broadcast %cst_29 : f32 to vector<16x16x32xf32>
    %46 = arith.select %44, %45, %42 : vector<16x16x32xi1>, vector<16x16x32xf32>
    %47 = vector.shape_cast %46 : vector<16x16x32xf32> to vector<256x32xf32>
    %48 = arith.truncf %47 : vector<256x32xf32> to vector<256x32xbf16>
    %c2 = arith.constant 2 : index
    %c0_30 = arith.constant 0 : index
    %c0_31 = arith.constant 0 : index
    %49 = vector.load %arg3[%c2, %c0_30, %c0_31] : memref<9x32x32xbf16, #tpu.memory_space<vmem>>, vector<1x32x32xbf16>
    %50 = vector.shape_cast %49 : vector<1x32x32xbf16> to vector<32x32xbf16>
    %cst_32 = arith.constant dense<0.000000e+00> : vector<256x32xf32>
    %51 = tpu.matmul %48, %50, %cst_32 {dimension_numbers = #tpu.dot_dimension_numbers<[1], [0], [0], [1], [0, 0, 1, 1], [], []>} : vector<256x32xbf16>, vector<32x32xbf16>, vector<256x32xf32> -> vector<256x32xf32>
    %52 = arith.addf %41, %51 : vector<256x32xf32>
    %c1_33 = arith.constant 1 : index
    %c0_34 = arith.constant 0 : index
    %c0_35 = arith.constant 0 : index
    %53 = vector.load %arg6[%c1_33, %c0_34, %c0_35] : memref<18x16x32xf32, #tpu.memory_space<vmem>>, vector<16x16x32xf32>
    %c1_i32_36 = arith.constant 1 : i32
    %54 = tpu.dynamic_rotate %53 by %c1_i32_36 dim 1 : vector<16x16x32xf32>, i32 -> vector<16x16x32xf32>
    %c0_i32_37 = arith.constant 0 : i32
    %55 = vector.broadcast %c0_i32_37 : i32 to vector<16x16x32xi32>
    %56 = arith.cmpi eq, %24, %55 : vector<16x16x32xi32>
    %cst_38 = arith.constant 0.000000e+00 : f32
    %57 = vector.broadcast %cst_38 : f32 to vector<16x16x32xf32>
    %58 = arith.select %56, %57, %54 : vector<16x16x32xi1>, vector<16x16x32xf32>
    %59 = vector.shape_cast %58 : vector<16x16x32xf32> to vector<256x32xf32>
    %60 = arith.truncf %59 : vector<256x32xf32> to vector<256x32xbf16>
    %c3 = arith.constant 3 : index
    %c0_39 = arith.constant 0 : index
    %c0_40 = arith.constant 0 : index
    %61 = vector.load %arg3[%c3, %c0_39, %c0_40] : memref<9x32x32xbf16, #tpu.memory_space<vmem>>, vector<1x32x32xbf16>
    %62 = vector.shape_cast %61 : vector<1x32x32xbf16> to vector<32x32xbf16>
    %cst_41 = arith.constant dense<0.000000e+00> : vector<256x32xf32>
    %63 = tpu.matmul %60, %62, %cst_41 {dimension_numbers = #tpu.dot_dimension_numbers<[1], [0], [0], [1], [0, 0, 1, 1], [], []>} : vector<256x32xbf16>, vector<32x32xbf16>, vector<256x32xf32> -> vector<256x32xf32>
    %64 = arith.addf %52, %63 : vector<256x32xf32>
    %65 = vector.shape_cast %53 : vector<16x16x32xf32> to vector<256x32xf32>
    %66 = arith.truncf %65 : vector<256x32xf32> to vector<256x32xbf16>
    %c4 = arith.constant 4 : index
    %c0_42 = arith.constant 0 : index
    %c0_43 = arith.constant 0 : index
    %67 = vector.load %arg3[%c4, %c0_42, %c0_43] : memref<9x32x32xbf16, #tpu.memory_space<vmem>>, vector<1x32x32xbf16>
    %68 = vector.shape_cast %67 : vector<1x32x32xbf16> to vector<32x32xbf16>
    %cst_44 = arith.constant dense<0.000000e+00> : vector<256x32xf32>
    %69 = tpu.matmul %66, %68, %cst_44 {dimension_numbers = #tpu.dot_dimension_numbers<[1], [0], [0], [1], [0, 0, 1, 1], [], []>} : vector<256x32xbf16>, vector<32x32xbf16>, vector<256x32xf32> -> vector<256x32xf32>
    %70 = arith.addf %64, %69 : vector<256x32xf32>
    %c15_i32_45 = arith.constant 15 : i32
    %71 = tpu.dynamic_rotate %53 by %c15_i32_45 dim 1 : vector<16x16x32xf32>, i32 -> vector<16x16x32xf32>
    %c15_i32_46 = arith.constant 15 : i32
    %72 = vector.broadcast %c15_i32_46 : i32 to vector<16x16x32xi32>
    %73 = arith.cmpi eq, %24, %72 : vector<16x16x32xi32>
    %cst_47 = arith.constant 0.000000e+00 : f32
    %74 = vector.broadcast %cst_47 : f32 to vector<16x16x32xf32>
    %75 = arith.select %73, %74, %71 : vector<16x16x32xi1>, vector<16x16x32xf32>
    %76 = vector.shape_cast %75 : vector<16x16x32xf32> to vector<256x32xf32>
    %77 = arith.truncf %76 : vector<256x32xf32> to vector<256x32xbf16>
    %c5 = arith.constant 5 : index
    %c0_48 = arith.constant 0 : index
    %c0_49 = arith.constant 0 : index
    %78 = vector.load %arg3[%c5, %c0_48, %c0_49] : memref<9x32x32xbf16, #tpu.memory_space<vmem>>, vector<1x32x32xbf16>
    %79 = vector.shape_cast %78 : vector<1x32x32xbf16> to vector<32x32xbf16>
    %cst_50 = arith.constant dense<0.000000e+00> : vector<256x32xf32>
    %80 = tpu.matmul %77, %79, %cst_50 {dimension_numbers = #tpu.dot_dimension_numbers<[1], [0], [0], [1], [0, 0, 1, 1], [], []>} : vector<256x32xbf16>, vector<32x32xbf16>, vector<256x32xf32> -> vector<256x32xf32>
    %81 = arith.addf %70, %80 : vector<256x32xf32>
    %c2_51 = arith.constant 2 : index
    %c0_52 = arith.constant 0 : index
    %c0_53 = arith.constant 0 : index
    %82 = vector.load %arg6[%c2_51, %c0_52, %c0_53] : memref<18x16x32xf32, #tpu.memory_space<vmem>>, vector<16x16x32xf32>
    %c1_i32_54 = arith.constant 1 : i32
    %83 = tpu.dynamic_rotate %82 by %c1_i32_54 dim 1 : vector<16x16x32xf32>, i32 -> vector<16x16x32xf32>
    %c0_i32_55 = arith.constant 0 : i32
    %84 = vector.broadcast %c0_i32_55 : i32 to vector<16x16x32xi32>
    %85 = arith.cmpi eq, %24, %84 : vector<16x16x32xi32>
    %cst_56 = arith.constant 0.000000e+00 : f32
    %86 = vector.broadcast %cst_56 : f32 to vector<16x16x32xf32>
    %87 = arith.select %85, %86, %83 : vector<16x16x32xi1>, vector<16x16x32xf32>
    %88 = vector.shape_cast %87 : vector<16x16x32xf32> to vector<256x32xf32>
    %89 = arith.truncf %88 : vector<256x32xf32> to vector<256x32xbf16>
    %c6 = arith.constant 6 : index
    %c0_57 = arith.constant 0 : index
    %c0_58 = arith.constant 0 : index
    %90 = vector.load %arg3[%c6, %c0_57, %c0_58] : memref<9x32x32xbf16, #tpu.memory_space<vmem>>, vector<1x32x32xbf16>
    %91 = vector.shape_cast %90 : vector<1x32x32xbf16> to vector<32x32xbf16>
    %cst_59 = arith.constant dense<0.000000e+00> : vector<256x32xf32>
    %92 = tpu.matmul %89, %91, %cst_59 {dimension_numbers = #tpu.dot_dimension_numbers<[1], [0], [0], [1], [0, 0, 1, 1], [], []>} : vector<256x32xbf16>, vector<32x32xbf16>, vector<256x32xf32> -> vector<256x32xf32>
    %93 = arith.addf %81, %92 : vector<256x32xf32>
    %94 = vector.shape_cast %82 : vector<16x16x32xf32> to vector<256x32xf32>
    %95 = arith.truncf %94 : vector<256x32xf32> to vector<256x32xbf16>
    %c7 = arith.constant 7 : index
    %c0_60 = arith.constant 0 : index
    %c0_61 = arith.constant 0 : index
    %96 = vector.load %arg3[%c7, %c0_60, %c0_61] : memref<9x32x32xbf16, #tpu.memory_space<vmem>>, vector<1x32x32xbf16>
    %97 = vector.shape_cast %96 : vector<1x32x32xbf16> to vector<32x32xbf16>
    %cst_62 = arith.constant dense<0.000000e+00> : vector<256x32xf32>
    %98 = tpu.matmul %95, %97, %cst_62 {dimension_numbers = #tpu.dot_dimension_numbers<[1], [0], [0], [1], [0, 0, 1, 1], [], []>} : vector<256x32xbf16>, vector<32x32xbf16>, vector<256x32xf32> -> vector<256x32xf32>
    %99 = arith.addf %93, %98 : vector<256x32xf32>
    %c15_i32_63 = arith.constant 15 : i32
    %100 = tpu.dynamic_rotate %82 by %c15_i32_63 dim 1 : vector<16x16x32xf32>, i32 -> vector<16x16x32xf32>
    %c15_i32_64 = arith.constant 15 : i32
    %101 = vector.broadcast %c15_i32_64 : i32 to vector<16x16x32xi32>
    %102 = arith.cmpi eq, %24, %101 : vector<16x16x32xi32>
    %cst_65 = arith.constant 0.000000e+00 : f32
    %103 = vector.broadcast %cst_65 : f32 to vector<16x16x32xf32>
    %104 = arith.select %102, %103, %100 : vector<16x16x32xi1>, vector<16x16x32xf32>
    %105 = vector.shape_cast %104 : vector<16x16x32xf32> to vector<256x32xf32>
    %106 = arith.truncf %105 : vector<256x32xf32> to vector<256x32xbf16>
    %c8 = arith.constant 8 : index
    %c0_66 = arith.constant 0 : index
    %c0_67 = arith.constant 0 : index
    %107 = vector.load %arg3[%c8, %c0_66, %c0_67] : memref<9x32x32xbf16, #tpu.memory_space<vmem>>, vector<1x32x32xbf16>
    %108 = vector.shape_cast %107 : vector<1x32x32xbf16> to vector<32x32xbf16>
    %cst_68 = arith.constant dense<0.000000e+00> : vector<256x32xf32>
    %109 = tpu.matmul %106, %108, %cst_68 {dimension_numbers = #tpu.dot_dimension_numbers<[1], [0], [0], [1], [0, 0, 1, 1], [], []>} : vector<256x32xbf16>, vector<32x32xbf16>, vector<256x32xf32> -> vector<256x32xf32>
    %110 = arith.addf %99, %109 : vector<256x32xf32>
    %111 = vector.shape_cast %110 : vector<256x32xf32> to vector<16x16x32xf32>
    %112 = arith.truncf %111 : vector<16x16x32xf32> to vector<16x16x32xbf16>
    %c0_69 = arith.constant 0 : index
    %c0_70 = arith.constant 0 : index
    %c0_71 = arith.constant 0 : index
    %c0_72 = arith.constant 0 : index
    %113 = vector.load %arg4[%c0_69, %c0_70, %c0_71, %c0_72] : memref<1x16x16x32xbf16, #tpu.memory_space<vmem>>, vector<1x16x16x32xbf16>
    %114 = vector.shape_cast %113 : vector<1x16x16x32xbf16> to vector<16x16x32xbf16>
    %115 = vector.shape_cast %112 : vector<16x16x32xbf16> to vector<1x16x16x32xbf16>
    tpu.vector_store %arg4[%c0_69, %c0_70, %c0_71, %c0_72], %115 {strides = array<i32>} : memref<1x16x16x32xbf16, #tpu.memory_space<vmem>>, vector<1x16x16x32xbf16>,
    %cst_73 = arith.constant dense<0.000000e+00> : vector<32xf32>
    %116 = vector.multi_reduction <add>, %110, %cst_73 [0] : vector<256x32xf32> to vector<32xf32>
    %117 = vector.shape_cast %116 : vector<32xf32> to vector<1x32xf32>
    %118 = arith.mulf %110, %110 : vector<256x32xf32>
    %cst_74 = arith.constant dense<0.000000e+00> : vector<32xf32>
    %119 = vector.multi_reduction <add>, %118, %cst_74 [0] : vector<256x32xf32> to vector<32xf32>
    %120 = vector.shape_cast %119 : vector<32xf32> to vector<1x32xf32>
    %121 = tpu.concatenate %117, %120 in 0 : vector<1x32xf32>, vector<1x32xf32> -> vector<2x32xf32>
    %c0_75 = arith.constant 0 : index
    %c0_76 = arith.constant 0 : index
    %c0_77 = arith.constant 0 : index
    %122 = vector.load %arg5[%c0_75, %c0_76, %c0_77] : memref<1x2x32xf32, #tpu.memory_space<vmem>>, vector<1x2x32xf32>
    %123 = vector.shape_cast %122 : vector<1x2x32xf32> to vector<2x32xf32>
    %124 = vector.shape_cast %121 : vector<2x32xf32> to vector<1x2x32xf32>
    tpu.vector_store %arg5[%c0_75, %c0_76, %c0_77], %124 {strides = array<i32>} : memref<1x2x32xf32, #tpu.memory_space<vmem>>, vector<1x2x32xf32>,
    return
  }
  func.func @transform_0(%arg0: i32) -> (i32, i32, i32, i32) {
    %c0_i32 = arith.constant 0 : i32
    %c0_i32_0 = arith.constant 0 : i32
    %c0_i32_1 = arith.constant 0 : i32
    %c0_i32_2 = arith.constant 0 : i32
    return %arg0, %c0_i32, %c0_i32_0, %c0_i32_1 : i32, i32, i32, i32
  }
  func.func @transform_1(%arg0: i32) -> (i32, i32) {
    %c0_i32 = arith.constant 0 : i32
    %c0_i32_0 = arith.constant 0 : i32
    %c0_i32_1 = arith.constant 0 : i32
    return %c0_i32, %c0_i32_0 : i32, i32
  }
  func.func @transform_2(%arg0: i32) -> (i32, i32, i32) {
    %c0_i32 = arith.constant 0 : i32
    %c0_i32_0 = arith.constant 0 : i32
    %c0_i32_1 = arith.constant 0 : i32
    %c0_i32_2 = arith.constant 0 : i32
    return %c0_i32, %c0_i32_0, %c0_i32_1 : i32, i32, i32
  }
  func.func @transform_3(%arg0: i32) -> (i32, i32, i32, i32) {
    %c0_i32 = arith.constant 0 : i32
    %c0_i32_0 = arith.constant 0 : i32
    %c0_i32_1 = arith.constant 0 : i32
    %c0_i32_2 = arith.constant 0 : i32
    return %arg0, %c0_i32, %c0_i32_0, %c0_i32_1 : i32, i32, i32, i32
  }
  func.func @transform_4(%arg0: i32) -> (i32, i32, i32) {
    %c0_i32 = arith.constant 0 : i32
    %c0_i32_0 = arith.constant 0 : i32
    %c0_i32_1 = arith.constant 0 : i32
    return %arg0, %c0_i32, %c0_i32_0 : i32, i32, i32
  }
}

module attributes {stable_mosaic.version = 11 : i64} {
  func.func @_bn_add_relu_kernel(%arg0: i32, %arg1: memref<128x128xbf16, #tpu.memory_space<vmem>>, %arg2: memref<2x128xf32, #tpu.memory_space<vmem>>, %arg3: memref<128x128xf32, #tpu.memory_space<vmem>>, %arg4: memref<128x128xf32, #tpu.memory_space<vmem>>) attributes {dimension_semantics = [#tpu.dimension_semantics<parallel>], iteration_bounds = array<i64: 4>, scalar_prefetch = 0 : i64, scratch_operands = 0 : i64, tpu.core_type = #tpu.core_type<tc>, window_params = [{transform_indices = @transform_0, window_bounds = array<i64: 128, 128>}, {pipeline_mode = #tpu.pipeline_mode<synchronous>, transform_indices = @transform_1, window_bounds = array<i64: 2, 128>}, {transform_indices = @transform_2, window_bounds = array<i64: 128, 128>}, {transform_indices = @transform_3, window_bounds = array<i64: 128, 128>}]} {
    %c0 = arith.constant 0 : index
    %c0_0 = arith.constant 0 : index
    %0 = vector.load %arg1[%c0, %c0_0] : memref<128x128xbf16, #tpu.memory_space<vmem>>, vector<128x128xbf16>
    %1 = arith.extf %0 : vector<128x128xbf16> to vector<128x128xf32>
    %c0_1 = arith.constant 0 : index
    %c0_2 = arith.constant 0 : index
    %2 = vector.load %arg2[%c0_1, %c0_2] : memref<2x128xf32, #tpu.memory_space<vmem>>, vector<1x128xf32>
    %3 = vector.shape_cast %2 : vector<1x128xf32> to vector<128xf32>
    %4 = vector.shape_cast %3 : vector<128xf32> to vector<1x128xf32>
    %5 = vector.broadcast %4 : vector<1x128xf32> to vector<128x128xf32>
    %6 = arith.mulf %1, %5 : vector<128x128xf32>
    %c1 = arith.constant 1 : index
    %c0_3 = arith.constant 0 : index
    %7 = vector.load %arg2[%c1, %c0_3] : memref<2x128xf32, #tpu.memory_space<vmem>>, vector<1x128xf32>
    %8 = vector.shape_cast %7 : vector<1x128xf32> to vector<128xf32>
    %9 = vector.shape_cast %8 : vector<128xf32> to vector<1x128xf32>
    %10 = vector.broadcast %9 : vector<1x128xf32> to vector<128x128xf32>
    %11 = arith.addf %6, %10 : vector<128x128xf32>
    %c0_4 = arith.constant 0 : index
    %c0_5 = arith.constant 0 : index
    %12 = vector.load %arg3[%c0_4, %c0_5] : memref<128x128xf32, #tpu.memory_space<vmem>>, vector<128x128xf32>
    %13 = arith.addf %11, %12 : vector<128x128xf32>
    %cst = arith.constant 0.000000e+00 : f32
    %14 = vector.broadcast %cst : f32 to vector<128x128xf32>
    %15 = arith.maximumf %13, %14 : vector<128x128xf32>
    %c0_6 = arith.constant 0 : index
    %c0_7 = arith.constant 0 : index
    %16 = vector.load %arg4[%c0_6, %c0_7] : memref<128x128xf32, #tpu.memory_space<vmem>>, vector<128x128xf32>
    tpu.vector_store %arg4[%c0_6, %c0_7], %15 {strides = array<i32>} : memref<128x128xf32, #tpu.memory_space<vmem>>, vector<128x128xf32>,
    return
  }
  func.func @transform_0(%arg0: i32) -> (i32, i32) {
    %c0_i32 = arith.constant 0 : i32
    %c0_i32_0 = arith.constant 0 : i32
    return %arg0, %c0_i32 : i32, i32
  }
  func.func @transform_1(%arg0: i32) -> (i32, i32) {
    %c0_i32 = arith.constant 0 : i32
    %c0_i32_0 = arith.constant 0 : i32
    %c0_i32_1 = arith.constant 0 : i32
    return %c0_i32, %c0_i32_0 : i32, i32
  }
  func.func @transform_2(%arg0: i32) -> (i32, i32) {
    %c0_i32 = arith.constant 0 : i32
    %c0_i32_0 = arith.constant 0 : i32
    return %arg0, %c0_i32 : i32, i32
  }
  func.func @transform_3(%arg0: i32) -> (i32, i32) {
    %c0_i32 = arith.constant 0 : i32
    %c0_i32_0 = arith.constant 0 : i32
    return %arg0, %c0_i32 : i32, i32
  }
}

</mosaic_0001>

<bundles_post_ra>
// kernel: bottleneck_pallas.7
= control target key start
LH: loop header
LB: loop body
LE: loop exit
PB: predicated region body
PF: predicated region fallthrough
CT: control target
= control target key end

     0   :  { %8 = vsyncpa [#allocation3], 0  ;;  %s805_s0 = inlined_call_operand.vmem [shape: bf16[512,128], index: 0, kind: input, shape index: {}]   ;;  %s806_s1 = inlined_call_operand.vmem [shape: f32[2,128], index: 1, kind: input, shape index: {}]   ;;  %s807_s2 = inlined_call_operand.vmem [shape: f32[512,128], index: 2, kind: input, shape index: {}]   ;;  %s808_s3 = inlined_call_operand.hbm [shape: f32[512,128], index: 3, kind: output, shape index: {}]  }
   0x1   :  { %10 = vsyncpa [#allocation3 + $0x1], 0  ;;  %s604_s12 = smov 0   ;;  %s606_s13 = smov 0  }
   0x2   :  { %s608_s14 = smov 0   ;;  %s610_s15 = smov 0  }
   0x3 LB: > { %s625_s16 = sadd.s32 4294967295, %s579_s15   ;;  %s420_s17 = sadd.s32 4294967294, %s579_s15   ;;  %s579_s15 = sphi %s610_s15, %s814_s15   ;;  %s575_s14 = sphi %s608_s14, %s813_s14   ;;  %s571_s13 = sphi %s606_s13, %s812_s13   ;;  %s567_s12 = sphi %s604_s12, %s811_s12  }
   0x4   : > { %s629_s18 = sadd.s32 1, %s579_s15   ;;  %s96_s19 = sadd.s32 1, %s575_s14 }
   0x5   : > { %s93_s20 = ssub.s32 %s579_s15, %s629_s18  ;;  %p106_p0 = scmp.ne.s32.totalorder %s575_s14, %s571_s13 }
   0x6   : > { %p94_p1 = scmp.eq.s32.totalorder %s93_s20, 0  ;;  %p107_p2 = scmp.eq.s32.totalorder %s625_s16, 3 }
   0x7   : > { %p112_p3 = scmp.ne.s32.totalorder %s571_s13, %s567_s12  ;;  %p113_p4 = scmp.eq.s32.totalorder %s420_s17, 3 }
   0x8   : > { %s640_s21 = scalar_select %p94_p1, %s575_s14, %s96_s19  }
   0x9   : > { %p642_p5 = por %p107_p2, %p106_p0  ;;  %p646_p6 = por %p113_p4, %p112_p3 }
   0xa   : > { %p423_p7 = scmp.ge.s32.totalorder %s579_s15, 1  ;;  %p152_p8 = scmp.lt.s32.totalorder %s579_s15, 5 }
   0xc   : > { %p153_p9 = pnand %p423_p7, %p152_p8 }
   0xd   : > { %s425_s24 = sshll.u32 (!%p153_p9), %s625_s16, 4  ;;  %v662_v1 = vld [vmem:[%s806_s1] ss:$0 sm:$0xff] (!%p153_p9)  ;;  %s178_s8 = sand.u32 (!%p153_p9), 1, %s571_s13   ;;  %v674_v5 = vld [vmem:[%s806_s1 + $0x1] ss:$0 sm:$0xff] (!%p153_p9) }
   0xe   : > { %156 = sbr.rel (%p153_p9) target bundleno = 63 (0x3f), region = 32  ;;  %p182_p10 = scmp.lt.s32.totalorder (!%p153_p9), %s425_s24, 63 }
   0xf   : > { %s686_s11 = sshll.u32 (!%p153_p9), %s178_s8, 7  ;;  %s436_s19 = sshll.u32 (!%p153_p9), %s625_s16, 11 }
  0x10   : > { %s710_s17 = scalar_lea.vmem (!%p153_p9), [#allocation2], %s686_s11  ;;  %s581_s28 = smov (!%p153_p9), [#allocation2]  }
  0x11   : > { %s346_s20 = sshll.u32 (!%p153_p9), %s710_s17, 4  ;;  %s754_s20 = int_to_ptr.vmem [resolvable:$true] %s346_s20 }
  0x12   : > { %s517_s27 = scalar_lea.vmem (!%p153_p9), %s754_s20, 2048 }
  0x13   : > { %p518_p11 = scmp.ne.s32.totalorder (!%p153_p9), %s754_s20, %s517_s27 }
  0x15   : > { %s816_s24 = smov (!%p182_p10, %s425_s24), 63  ;;  %p519_p12 = pnand %p518_p11, %p642_p5 }
  0x16   : > { %s426_s25 = sshll.u32 %s816_s24, 2  ;;  %s428_s26 = sshll.u32 %s816_s24, 3 }
  0x17   : > { %s656_s29 = scalar_lea.vmem %s805_s0, %s426_s25  ;;  %s667_s7 = scalar_lea.vmem %s807_s2, %s428_s26 }
  0x18   : > { %v438_v0 = vld [vmem:[%s656_s29] sm:$0xff]   ;;  %v469_v4 = vld [vmem:[%s656_s29 + $0x8] sm:$0xff]   ;;  %v470_v8 = vld [vmem:[%s656_s29 + $0x10] sm:$0xff]   ;;  %s752_s25 = scalar_lea.hbm %s808_s3, %s436_s19  ;;  %s764_s26 = scalar_lea.sflag [#allocation3], %s178_s8 }
  0x19   : > { %v439_v2 = vunpack.c.l.bf16 %v438_v0  ;;  %v440_v3 = vunpack.c.h.bf16 %v438_v0  ;;  %v443_v6 = vunpack.c.l.bf16 %v469_v4  ;;  %v444_v7 = vunpack.c.h.bf16 %v469_v4  ;;  %v471_v13 = vld [vmem:[%s656_s29 + $0x18] sm:$0xff]   ;;  %v268_v14 = vld [vmem:[%s667_s7] sm:$0xff]  ;;  %v269_v15 = vld [vmem:[%s667_s7 + $0x8] sm:$0xff]  ;;  %p520_p13 = pneg %p519_p12 }
  0x1a   : > { %v447_v11 = vunpack.c.l.bf16 %v470_v8  ;;  %v448_v12 = vunpack.c.h.bf16 %v470_v8  ;;  %v451_v18 = vunpack.c.l.bf16 %v471_v13  ;;  %v452_v19 = vunpack.c.h.bf16 %v471_v13  ;;  %v270_v22 = vld [vmem:[%s667_s7 + $0x10] sm:$0xff]  ;;  %v271_v23 = vld [vmem:[%s667_s7 + $0x18] sm:$0xff]  ;;  %v272_v28 = vld [vmem:[%s667_s7 + $0x20] sm:$0xff] }
  0x1b   : > { %v231_v9 = vmul.f32 %v439_v2, %v662_v1  ;;  %v232_v10 = vmul.f32 %v440_v3, %v662_v1  ;;  %v233_v16 = vmul.f32 %v443_v6, %v662_v1  ;;  %v234_v17 = vmul.f32 %v444_v7, %v662_v1  ;;  %v273_v29 = vld [vmem:[%s667_s7 + $0x28] sm:$0xff]  ;;  %v274_v36 = vld [vmem:[%s667_s7 + $0x30] sm:$0xff]  ;;  %v275_v37 = vld [vmem:[%s667_s7 + $0x38] sm:$0xff] }
  0x1c   : > { %v235_v24 = vmul.f32 %v447_v11, %v662_v1  ;;  %v236_v25 = vmul.f32 %v448_v12, %v662_v1  ;;  %v237_v30 = vmul.f32 %v451_v18, %v662_v1  ;;  %v238_v31 = vmul.f32 %v452_v19, %v662_v1  ;;  %v472_v42 = vld [vmem:[%s656_s29 + $0x20] sm:$0xff]   ;;  %v473_v47 = vld [vmem:[%s656_s29 + $0x28] sm:$0xff]   ;;  %v474_v52 = vld [vmem:[%s656_s29 + $0x30] sm:$0xff]  }
  0x1d   : > { %v252_v20 = vadd.f32 %v674_v5, %v231_v9  ;;  %v253_v21 = vadd.f32 %v674_v5, %v232_v10  ;;  %v254_v26 = vadd.f32 %v674_v5, %v233_v16  ;;  %v255_v27 = vadd.f32 %v674_v5, %v234_v17  ;;  %v475_v57 = vld [vmem:[%s656_s29 + $0x38] sm:$0xff]   ;;  %v276_v3 = vld [vmem:[%s667_s7 + $0x40] sm:$0xff]  ;;  %v277_v4 = vld [vmem:[%s667_s7 + $0x48] sm:$0xff]  ;;  %s521_s29 = sshll.u32 %s581_s28, 4  ;;  %s522_s29 = int_to_ptr.vmem [resolvable:$false] %s521_s29 }
  0x1e   : > { %v256_v34 = vadd.f32 %v674_v5, %v235_v24  ;;  %v257_v35 = vadd.f32 %v674_v5, %v236_v25  ;;  %v258_v40 = vadd.f32 %v674_v5, %v237_v30  ;;  %v259_v41 = vadd.f32 %v674_v5, %v238_v31  ;;  %v278_v12 = vld [vmem:[%s667_s7 + $0x50] sm:$0xff]  ;;  %v279_v13 = vld [vmem:[%s667_s7 + $0x58] sm:$0xff]  ;;  %v280_v18 = vld [vmem:[%s667_s7 + $0x60] sm:$0xff]  ;;  %s523_s30 = scalar_lea.vmem %s522_s29, 4096  ;;  %p524_p0 = scmp.lt.s32.totalorder %s754_s20, %s522_s29 }
  0x1f   : > { %v284_v32 = vadd.f32 %v268_v14, %v252_v20  ;;  %v285_v33 = vadd.f32 %v269_v15, %v253_v21  ;;  %v286_v38 = vadd.f32 %v270_v22, %v254_v26  ;;  %v287_v39 = vadd.f32 %v271_v23, %v255_v27  ;;  %v281_v19 = vld [vmem:[%s667_s7 + $0x68] sm:$0xff]  ;;  %v282_v26 = vld [vmem:[%s667_s7 + $0x70] sm:$0xff]  ;;  %v283_v27 = vld [vmem:[%s667_s7 + $0x78] sm:$0xff]  ;;  %p525_p1 = scmp.lt.s32.totalorder %s523_s30, %s517_s27 }
  0x20   : > { %v288_v45 = vadd.f32 %v272_v28, %v256_v34  ;;  %v289_v46 = vadd.f32 %v273_v29, %v257_v35  ;;  %v290_v50 = vadd.f32 %v274_v36, %v258_v40  ;;  %v291_v51 = vadd.f32 %v275_v37, %v259_v41 }
  0x21   : > { %v300_v43 = vmax.f32 %v284_v32, 0.0  ;;  %v301_v44 = vmax.f32 %v285_v33, 0.0  ;;  %v302_v48 = vmax.f32 %v286_v38, 0.0  ;;  %v303_v49 = vmax.f32 %v287_v39, 0.0  ;;  %p526_p2 = por %p525_p1, %p524_p0 }
  0x22   : > { %v304_v53 = vmax.f32 %v288_v45, 0.0  ;;  %v305_v54 = vmax.f32 %v289_v46, 0.0  ;;  %v455_v55 = vunpack.c.l.bf16 %v472_v42  ;;  %v456_v56 = vunpack.c.h.bf16 %v472_v42 }
  0x23   : > { %316 = vst [vmem:[%s710_s17] sm:$0xff] %v300_v43  ;;  %317 = vst [vmem:[%s710_s17 + $0x8] sm:$0xff] %v301_v44  ;;  %v306_v58 = vmax.f32 %v290_v50, 0.0  ;;  %v307_v59 = vmax.f32 %v291_v51, 0.0  ;;  %v459_v60 = vunpack.c.l.bf16 %v473_v47  ;;  %v460_v61 = vunpack.c.h.bf16 %v473_v47  ;;  %p527_p3 = pnand %p526_p2, %p520_p13 }
  0x24   : > { %318 = vst [vmem:[%s710_s17 + $0x10] sm:$0xff] %v302_v48  ;;  %319 = vst [vmem:[%s710_s17 + $0x18] sm:$0xff] %v303_v49  ;;  %v239_v62 = vmul.f32 %v455_v55, %v662_v1  ;;  %v240_v63 = vmul.f32 %v456_v56, %v662_v1  ;;  %v463_v0 = vunpack.c.l.bf16 %v474_v52  ;;  %v464_v2 = vunpack.c.h.bf16 %v474_v52 }
  0x25   : > { %320 = vst [vmem:[%s710_s17 + $0x20] sm:$0xff] %v304_v53  ;;  %321 = vst [vmem:[%s710_s17 + $0x28] sm:$0xff] %v305_v54  ;;  %v241_v6 = vmul.f32 %v459_v60, %v662_v1  ;;  %v242_v7 = vmul.f32 %v460_v61, %v662_v1  ;;  %v467_v8 = vunpack.c.l.bf16 %v475_v57  ;;  %v468_v9 = vunpack.c.h.bf16 %v475_v57 }
  0x26   : > { %322 = vst [vmem:[%s710_s17 + $0x30] sm:$0xff] %v306_v58  ;;  %323 = vst [vmem:[%s710_s17 + $0x38] sm:$0xff] %v307_v59  ;;  %v260_v10 = vadd.f32 %v674_v5, %v239_v62  ;;  %v261_v11 = vadd.f32 %v674_v5, %v240_v63  ;;  %v243_v14 = vmul.f32 %v463_v0, %v662_v1 }
  0x27   : > { %v244_v15 = vmul.f32 %v464_v2, %v662_v1  ;;  %v262_v16 = vadd.f32 %v674_v5, %v241_v6  ;;  %v263_v17 = vadd.f32 %v674_v5, %v242_v7  ;;  %v245_v20 = vmul.f32 %v467_v8, %v662_v1 }
  0x28   : > { %v246_v21 = vmul.f32 %v468_v9, %v662_v1  ;;  %v292_v22 = vadd.f32 %v276_v3, %v260_v10  ;;  %v293_v23 = vadd.f32 %v277_v4, %v261_v11  ;;  %v264_v24 = vadd.f32 %v674_v5, %v243_v14 }
  0x29   : > { %v265_v25 = vadd.f32 %v674_v5, %v244_v15  ;;  %v294_v28 = vadd.f32 %v278_v12, %v262_v16  ;;  %v295_v29 = vadd.f32 %v279_v13, %v263_v17  ;;  %v266_v30 = vadd.f32 %v674_v5, %v245_v20 }
  0x2a   : > { %v267_v31 = vadd.f32 %v674_v5, %v246_v21  ;;  %v308_v1 = vmax.f32 %v292_v22, 0.0  ;;  %v309_v32 = vmax.f32 %v293_v23, 0.0  ;;  %v296_v33 = vadd.f32 %v280_v18, %v264_v24 }
  0x2b   : > { %v297_v34 = vadd.f32 %v281_v19, %v265_v25  ;;  %v310_v35 = vmax.f32 %v294_v28, 0.0  ;;  %v311_v36 = vmax.f32 %v295_v29, 0.0  ;;  %v298_v37 = vadd.f32 %v282_v26, %v266_v30 }
  0x2c   : > { %v299_v38 = vadd.f32 %v283_v27, %v267_v31  ;;  %324 = vst [vmem:[%s710_s17 + $0x40] sm:$0xff] %v308_v1  ;;  %325 = vst [vmem:[%s710_s17 + $0x48] sm:$0xff] %v309_v32  ;;  %v312_v5 = vmax.f32 %v296_v33, 0.0 }
  0x2d   : > { %v313_v39 = vmax.f32 %v297_v34, 0.0  ;;  %326 = vst [vmem:[%s710_s17 + $0x50] sm:$0xff] %v310_v35  ;;  %327 = vst [vmem:[%s710_s17 + $0x58] sm:$0xff] %v311_v36  ;;  %v314_v40 = vmax.f32 %v298_v37, 0.0 }
  0x2e   : > { %v315_v41 = vmax.f32 %v299_v38, 0.0  ;;  %328 = vst [vmem:[%s710_s17 + $0x60] sm:$0xff] %v312_v5 }
  0x2f   : > { %329 = vst [vmem:[%s710_s17 + $0x68] sm:$0xff] %v313_v39  ;;  %330 = vst [vmem:[%s710_s17 + $0x70] sm:$0xff] %v314_v40 }
  0x30   : > { %331 = vst [vmem:[%s710_s17 + $0x78] sm:$0xff] %v315_v41 }
  0x31   : > { %530 = shalt.err (!%p527_p3)
}
  0x32   : > { %s531_s4 = scalar_lea.hbm %s752_s25, 2048  ;;  %s535_s7 = scalar_lea.hbm %s808_s3, 8192 }
  0x33   : > { %p532_p4 = scmp.ne.s32.totalorder %s752_s25, %s531_s4  ;;  %p536_p9 = scmp.lt.u32.totalorder %s752_s25, %s808_s3 }
  0x34   : > { %p537_p10 = scmp.lt.u32.totalorder %s535_s7, %s531_s4  ;;  %p539_p12 = scmp.lt.u32.totalorder %s531_s4, %s752_s25 }
  0x35   : > { %p533_p7 = pnand %p532_p4, %p642_p5 }
  0x36   : > { %p538_p11 = por %p537_p10, %p536_p9 }
  0x37   : > { %p534_p8 = pneg %p533_p7 }
  0x38   : > { %p540_p13 = por %p539_p12, %p538_p11 }
  0x3a   : > { %p541_p0 = pnand %p540_p13, %p534_p8 }
  0x3c   : > { %544 = shalt.err (!%p541_p0)
}
  0x3d   : > { %s582_s10 = smov 128   ;;  %s583_s11 = smov 8  }
  0x3e   : > { %476 = dma.vmem_to_hbm [thread:$0]  (%p642_p5), %s754_s20, 2048, %s752_s25, %s764_s26, %s582_s10, %s582_s10, %s583_s11  }
  0x3f PF: > { %p482_p1 = scmp.ge.s32.totalorder %s579_s15, 2  ;;  %s361_s17 = sand.u32 1, %s567_s12  }
  0x40   : > { %s362_s19 = scalar_lea.sflag [#allocation3], %s361_s17 }
  0x41   : > { %p479_p2 = pnand %p482_p1, %p646_p6 }
  0x43   : > { %562 = dma.done.wait (!%p479_p2), %s362_s19, 2048  }
  0x44   : > { %564 = vsyncadd (!%p479_p2), %s362_s19, 4294965248  ;;  %p13_p3 = scmp.ge.s32.totalorder %s629_s18, 6   ;;  %s811_s12 = smov %s571_s13 }
  0x45   : > { %s812_s13 = smov %s575_s14  ;;  %s813_s14 = smov %s640_s21 }
  0x46   : > { %s814_s15 = smov %s629_s18  ;;  %15 = sbr.rel (!%p13_p3) target bundleno = 3 (0x3), region = 70 }
  0x4d   :  { %367 = vsyncpa [#allocation3], 1 }
  0x4e   :  { %369 = vsyncpa [#allocation3 + $0x1], 1 }

// kernel: bottleneck_pallas.6
= control target key start
LH: loop header
LB: loop body
LE: loop exit
PB: predicated region body
PF: predicated region fallthrough
CT: control target
= control target key end

     0   :  { %s896_s15 = smov 0   ;;  %s1004_s0 = inlined_call_operand.vmem [shape: bf16[512,32], index: 0, kind: input, shape index: {}]   ;;  %s1005_s1 = inlined_call_operand.vmem [shape: f32[2,32], index: 1, kind: input, shape index: {}]   ;;  %s1006_s2 = inlined_call_operand.vmem [shape: bf16[32,128], index: 2, kind: input, shape index: {}]   ;;  %s1007_s3 = inlined_call_operand.vmem [shape: bf16[512,128], index: 3, kind: output, shape index: {0}]   ;;  %s1008_s4 = inlined_call_operand.vmem [shape: f32[4,2,128], index: 4, kind: output, shape index: {1}]  }
   0x1 LB: > { %s902_s16 = sadd.s32 4294967295, %s869_s15   ;;  %p681_p0 = scmp.ge.s32.totalorder %s869_s15, 1  ;;  %s869_s15 = sphi %s896_s15, %s15_s15  }
   0x2   : > { %p166_p1 = scmp.lt.s32.totalorder %s869_s15, 5 }
   0x4   : > { %p167_p2 = pnand %p681_p0, %p166_p1 }
   0x5   : > { %v861_v0 = vld [vmem:[%s1006_s2] sm:$0xff] (!%p167_p2)   ;;  %s682_s19 = sshll.u32 (!%p167_p2), %s902_s16, 4  ;;  %v862_v1 = vld [vmem:[%s1006_s2 + $0x8] sm:$0xff] (!%p167_p2)   ;;  %vm327_vm0 = vcmask (!%p167_p2), 261120   ;;  %p208_p4 = scmp.lt.s32.totalorder (!%p167_p2), %s902_s16, 3  ;;  %vm587_vm1 = vcmask (!%p167_p2), 1040384  }
   0x6   : > { %170 = sbr.rel (%p167_p2) target bundleno = 289 (0x121), region = 32  ;;  %p197_p3 = scmp.lt.s32.totalorder (!%p167_p2), %s682_s19, 63  ;;  %829 = vmatprep.subr.bf16.mxu0 (!%p167_p2), %v861_v0  ;;  %849 = vmatprep.subr.bf16.mxu1 (!%p167_p2), %v861_v0  ;;  %v926_v2 = vld [vmem:[%s1005_s1] ss:$0 sm:$0xff] (!%p167_p2)  ;;  %v935_v11 = vld [vmem:[%s1005_s1 + $0x1] ss:$0 sm:$0xff] (!%p167_p2) }
   0x7   : > { %830 = vmatpush3.bf16.msra.mxu0 (!%p167_p2), %v861_v0  ;;  %851 = vmatpush3.bf16.msra.mxu1 (!%p167_p2), %v861_v0 }
   0x8   : > { %831 = vmatprep.subr.bf16.mxu0 (!%p167_p2), %v862_v1  ;;  %850 = vmatprep.subr.bf16.mxu1 (!%p167_p2), %v862_v1 }
   0xb   : > { %832 = vmatpush3.bf16.msra.mxu0 (!%p167_p2), %v862_v1  ;;  %852 = vmatpush3.bf16.msra.mxu1 (!%p167_p2), %v862_v1 }
   0xd   : > { %s1010_s19 = smov (!%p197_p3, %s682_s19), 63  ;;  %s1012_s16 = smov (!%p208_p4, %s902_s16), 3 }
   0xe   : > { %s683_s22 = sshll.u32 %s1010_s19, 2  ;;  %s686_s7 = sshll.u32 %s1012_s16, 1 }
   0xf   : > { %s921_s25 = scalar_lea.vmem %s1004_s0, %s683_s22  ;;  %s986_s6 = scalar_lea.vmem %s1007_s3, %s683_s22 }
  0x10   : > { %v734_v3 = vld [vmem:[%s921_s25] sm:$0xff]   ;;  %v805_v4 = vld [vmem:[%s921_s25 + $0x8] sm:$0xff]   ;;  %v806_v5 = vld [vmem:[%s921_s25 + $0x10] sm:$0xff]   ;;  %s211_s10 = scalar_lea.vmem %s1008_s4, %s686_s7 }
  0x11   : > { %v735_v6 = vunpack.c.l.bf16 %v734_v3  ;;  %v736_v7 = vunpack.c.h.bf16 %v734_v3  ;;  %v739_v8 = vunpack.c.l.bf16 %v805_v4  ;;  %v740_v9 = vunpack.c.h.bf16 %v805_v4  ;;  %v807_v10 = vld [vmem:[%s921_s25 + $0x18] sm:$0xff]   ;;  %v808_v32 = vld [vmem:[%s921_s25 + $0x20] sm:$0xff]   ;;  %v809_v37 = vld [vmem:[%s921_s25 + $0x28] sm:$0xff]  }
  0x12   : > { %v743_v12 = vunpack.c.l.bf16 %v806_v5  ;;  %v744_v13 = vunpack.c.h.bf16 %v806_v5  ;;  %v747_v14 = vunpack.c.l.bf16 %v807_v10  ;;  %v748_v15 = vunpack.c.h.bf16 %v807_v10  ;;  %v810_v42 = vld [vmem:[%s921_s25 + $0x30] sm:$0xff]   ;;  %v811_v47 = vld [vmem:[%s921_s25 + $0x38] sm:$0xff]  }
  0x13   : > { %v250_v16 = vmul.f32 %v735_v6, %v926_v2  ;;  %v251_v17 = vmul.f32 %v736_v7, %v926_v2  ;;  %v252_v18 = vmul.f32 %v739_v8, %v926_v2  ;;  %v253_v19 = vmul.f32 %v740_v9, %v926_v2 }
  0x14   : > { %v254_v20 = vmul.f32 %v743_v12, %v926_v2  ;;  %v255_v21 = vmul.f32 %v744_v13, %v926_v2  ;;  %v256_v22 = vmul.f32 %v747_v14, %v926_v2  ;;  %v257_v23 = vmul.f32 %v748_v15, %v926_v2 }
  0x15   : > { %v271_v24 = vadd.f32 %v935_v11, %v250_v16  ;;  %v272_v25 = vadd.f32 %v935_v11, %v251_v17  ;;  %v273_v26 = vadd.f32 %v935_v11, %v252_v18  ;;  %v274_v27 = vadd.f32 %v935_v11, %v253_v19 }
  0x16   : > { %v275_v28 = vadd.f32 %v935_v11, %v254_v20  ;;  %v276_v29 = vadd.f32 %v935_v11, %v255_v21  ;;  %v277_v30 = vadd.f32 %v935_v11, %v256_v22  ;;  %v278_v31 = vadd.f32 %v935_v11, %v257_v23 }
  0x17   : > { %v287_v33 = vmax.f32 %v271_v24, 0.0  ;;  %v288_v34 = vmax.f32 %v272_v25, 0.0  ;;  %v289_v35 = vmax.f32 %v273_v26, 0.0  ;;  %v290_v36 = vmax.f32 %v274_v27, 0.0 }
  0x18   : > { %v291_v38 = vmax.f32 %v275_v28, 0.0  ;;  %v292_v39 = vmax.f32 %v276_v29, 0.0  ;;  %v293_v40 = vmax.f32 %v277_v30, 0.0  ;;  %v294_v41 = vmax.f32 %v278_v31, 0.0 }
  0x19   : > { %v303_v43 = vpack.c.bf16 %v288_v34, %v287_v33  ;;  %v304_v44 = vpack.c.bf16 %v290_v36, %v289_v35  ;;  %v751_v45 = vunpack.c.l.bf16 %v808_v32  ;;  %v752_v46 = vunpack.c.h.bf16 %v808_v32 }
  0x1a   : > { %v305_v48 = vpack.c.bf16 %v292_v39, %v291_v38  ;;  %v306_v49 = vpack.c.bf16 %v294_v41, %v293_v40  ;;  %v755_v50 = vunpack.c.l.bf16 %v809_v37  ;;  %v756_v51 = vunpack.c.h.bf16 %v809_v37 }
  0x1b   : > { %833 = vmatprep.mubr.msk.bf16.mxu0 %vm327_vm0, %v303_v43  ;;  %v258_v52 = vmul.f32 %v751_v45, %v926_v2  ;;  %v259_v53 = vmul.f32 %v752_v46, %v926_v2  ;;  %v759_v54 = vunpack.c.l.bf16 %v810_v42  ;;  %v760_v55 = vunpack.c.h.bf16 %v810_v42 }
  0x1c   : > { %834 = vmatmul.mubr.msk.bf16.vlgmr.msra.gmra.mrb[0].mxu0 %vm327_vm0, %v304_v44  ;;  %v260_v56 = vmul.f32 %v755_v50, %v926_v2  ;;  %v261_v57 = vmul.f32 %v756_v51, %v926_v2  ;;  %v763_v58 = vunpack.c.l.bf16 %v811_v47  ;;  %v764_v59 = vunpack.c.h.bf16 %v811_v47 }
  0x1d   : > { %837 = vmatprep.mubr.msk.bf16.mxu0 %vm327_vm0, %v305_v48  ;;  %v279_v60 = vadd.f32 %v935_v11, %v258_v52  ;;  %v280_v61 = vadd.f32 %v935_v11, %v259_v53  ;;  %v262_v62 = vmul.f32 %v759_v54, %v926_v2  ;;  %v263_v63 = vmul.f32 %v760_v55, %v926_v2 }
  0x1e   : > { %v281_v0 = vadd.f32 %v935_v11, %v260_v56  ;;  %v282_v1 = vadd.f32 %v935_v11, %v261_v57  ;;  %v264_v3 = vmul.f32 %v763_v58, %v926_v2  ;;  %v265_v4 = vmul.f32 %v764_v59, %v926_v2 }
  0x1f   : > { %v295_v5 = vmax.f32 %v279_v60, 0.0  ;;  %v296_v6 = vmax.f32 %v280_v61, 0.0  ;;  %v283_v7 = vadd.f32 %v935_v11, %v262_v62  ;;  %v284_v8 = vadd.f32 %v935_v11, %v263_v63 }
  0x20   : > { %v297_v9 = vmax.f32 %v281_v0, 0.0  ;;  %v298_v10 = vmax.f32 %v282_v1, 0.0  ;;  %v285_v12 = vadd.f32 %v935_v11, %v264_v3  ;;  %v286_v13 = vadd.f32 %v935_v11, %v265_v4 }
  0x21   : > { %v307_v14 = vpack.c.bf16 %v296_v6, %v295_v5  ;;  %v299_v15 = vmax.f32 %v283_v7, 0.0  ;;  %v300_v16 = vmax.f32 %v284_v8, 0.0 }
  0x22   : > { %v308_v17 = vpack.c.bf16 %v298_v10, %v297_v9  ;;  %v301_v18 = vmax.f32 %v285_v12, 0.0  ;;  %v302_v19 = vmax.f32 %v286_v13, 0.0 }
  0x23   : > { %841 = vmatprep.mubr.msk.bf16.mxu1 %vm327_vm0, %v307_v14  ;;  %v309_v2 = vpack.c.bf16 %v300_v16, %v299_v15 }
  0x24   : > { %838 = vmatmul.mubr.msk.bf16.gmra.mrb[4].mxu0 %vm327_vm0, %v306_v49  ;;  %842 = vmatmul.mubr.msk.bf16.vlgmr.msra.gmra.mrb[0].mxu1 %vm327_vm0, %v308_v17  ;;  %v310_v20 = vpack.c.bf16 %v302_v19, %v301_v18 }
  0x25   : > { %845 = vmatprep.mubr.msk.bf16.mxu1 %vm327_vm0, %v309_v2 }
  0x2c   : > { %846 = vmatmul.mubr.msk.bf16.gmra.mrb[4].mxu1 %vm327_vm0, %v310_v20 }
  0xef   : > { %v835_v11 = vpop.f32.mrb[0].mxu0 }
  0xf0   : > { %v386_v21 = vpop.f32.mrb[1].mxu0  ;;  %v552_v29 = vmul.f32 %v835_v11, %v835_v11 }
  0xf1   : > { %v836_v22 = vpop.f32.mrb[2].mxu0  ;;  %v550_v25 = vmul.f32 %v386_v21, %v386_v21 }
  0xf2   : > { %v773_v23 = vpack.c.bf16 %v836_v22, %v835_v11  ;;  %v389_v24 = vpop.f32.mrb[3].mxu0  ;;  %v553_v32 = vmul.f32 %v836_v22, %v836_v22 }
  0xf3   : > { %v768_v26 = vpack.c.bf16 %v389_v24, %v386_v21  ;;  %v529_v27 = vadd.f32 %v389_v24, %v386_v21  ;;  %v551_v28 = vmul.f32 %v389_v24, %v389_v24 }
  0xf4   : > { %812 = vst [vmem:[%s986_s6 + $0x8] sm:$0xff] %v773_v23  }
  0xf5   : > { %769 = vst [vmem:[%s986_s6] sm:$0xff] %v768_v26   ;;  %v530_v30 = vadd.f32 %v835_v11, %v529_v27  ;;  %v566_v31 = vadd.f32 %v551_v28, %v550_v25 }
  0xf7   : > { %v567_v33 = vadd.f32 %v566_v31, %v552_v29  ;;  %v839_v34 = vpop.f32.mrb[4].mxu0  ;;  %v531_v35 = vadd.f32 %v836_v22, %v530_v30  ;;  %v843_v36 = vpop.f32.mrb[0].mxu1 }
  0xf8   : > { %v402_v37 = vpop.f32.mrb[5].mxu0  ;;  %v418_v38 = vpop.f32.mrb[1].mxu1  ;;  %v556_v53 = vmul.f32 %v839_v34, %v839_v34  ;;  %v560_v8 = vmul.f32 %v843_v36, %v843_v36 }
  0xf9   : > { %v532_v39 = vadd.f32 %v531_v35, %v402_v37  ;;  %v554_v40 = vmul.f32 %v402_v37, %v402_v37  ;;  %v568_v41 = vadd.f32 %v567_v33, %v553_v32  ;;  %v840_v42 = vpop.f32.mrb[6].mxu0  ;;  %v844_v43 = vpop.f32.mrb[2].mxu1  ;;  %v558_v59 = vmul.f32 %v418_v38, %v418_v38 }
  0xfa   : > { %v783_v44 = vpack.c.bf16 %v840_v42, %v839_v34  ;;  %v405_v45 = vpop.f32.mrb[7].mxu0  ;;  %v793_v46 = vpack.c.bf16 %v844_v43, %v843_v36  ;;  %v421_v47 = vpop.f32.mrb[3].mxu1  ;;  %v557_v56 = vmul.f32 %v840_v42, %v840_v42  ;;  %v561_v12 = vmul.f32 %v844_v43, %v844_v43 }
  0xfb   : > { %v569_v48 = vadd.f32 %v568_v41, %v554_v40  ;;  %v778_v49 = vpack.c.bf16 %v405_v45, %v402_v37  ;;  %v533_v50 = vadd.f32 %v532_v39, %v405_v45  ;;  %v555_v51 = vmul.f32 %v405_v45, %v405_v45 }
  0xfc   : > { %814 = vst [vmem:[%s986_s6 + $0x18] sm:$0xff] %v783_v44   ;;  %816 = vst [vmem:[%s986_s6 + $0x28] sm:$0xff] %v793_v46   ;;  %v788_v52 = vpack.c.bf16 %v421_v47, %v418_v38  ;;  %v559_v6 = vmul.f32 %v421_v47, %v421_v47 }
  0xfd   : > { %813 = vst [vmem:[%s986_s6 + $0x10] sm:$0xff] %v778_v49   ;;  %v534_v54 = vadd.f32 %v839_v34, %v533_v50  ;;  %v570_v55 = vadd.f32 %v569_v48, %v555_v51 }
  0xfe   : > { %815 = vst [vmem:[%s986_s6 + $0x20] sm:$0xff] %v788_v52  }
  0xff   : > { %v571_v57 = vadd.f32 %v570_v55, %v556_v53  ;;  %v535_v58 = vadd.f32 %v840_v42, %v534_v54  ;;  %v847_v60 = vpop.f32.mrb[4].mxu1 }
 0x100   : > { %v434_v61 = vpop.f32.mrb[5].mxu1  ;;  %v564_v20 = vmul.f32 %v847_v60, %v847_v60 }
 0x101   : > { %v536_v62 = vadd.f32 %v535_v58, %v418_v38  ;;  %v572_v63 = vadd.f32 %v571_v57, %v557_v56  ;;  %v848_v0 = vpop.f32.mrb[6].mxu1  ;;  %v562_v15 = vmul.f32 %v434_v61, %v434_v61 }
 0x102   : > { %v803_v1 = vpack.c.bf16 %v848_v0, %v847_v60  ;;  %v437_v3 = vpop.f32.mrb[7].mxu1  ;;  %v565_v22 = vmul.f32 %v848_v0, %v848_v0 }
 0x103   : > { %v573_v4 = vadd.f32 %v572_v63, %v558_v59  ;;  %v537_v5 = vadd.f32 %v536_v62, %v421_v47  ;;  %v798_v7 = vpack.c.bf16 %v437_v3, %v434_v61  ;;  %v563_v19 = vmul.f32 %v437_v3, %v437_v3 }
 0x104   : > { %818 = vst [vmem:[%s986_s6 + $0x38] sm:$0xff] %v803_v1  }
 0x105   : > { %v538_v9 = vadd.f32 %v843_v36, %v537_v5  ;;  %v574_v10 = vadd.f32 %v573_v4, %v559_v6  ;;  %817 = vst [vmem:[%s986_s6 + $0x30] sm:$0xff] %v798_v7  }
 0x107   : > { %v575_v13 = vadd.f32 %v574_v10, %v560_v8  ;;  %v539_v14 = vadd.f32 %v844_v43, %v538_v9 }
 0x109   : > { %v540_v16 = vadd.f32 %v539_v14, %v434_v61  ;;  %v576_v17 = vadd.f32 %v575_v13, %v561_v12 }
 0x10b   : > { %v577_v2 = vadd.f32 %v576_v17, %v562_v15  ;;  %v541_v18 = vadd.f32 %v540_v16, %v437_v3 }
 0x10d   : > { %v542_v11 = vadd.f32 %v847_v60, %v541_v18  ;;  %v578_v21 = vadd.f32 %v577_v2, %v563_v19 }
 0x10f   : > { %v543_v23 = vadd.f32 %v848_v0, %v542_v11  ;;  %v579_v24 = vadd.f32 %v578_v21, %v564_v20 }
 0x111   : > { %v544_v25 = vrot.slane %v543_v23, 4  ;;  %v580_v26 = vadd.f32 %v579_v24, %v565_v22 }
 0x113   : > { %v545_v27 = vadd.f32 %v544_v25, %v543_v23  ;;  %v581_v28 = vrot.slane %v580_v26, 4 }
 0x115   : > { %v546_v29 = vrot.slane %v545_v27, 2  ;;  %v582_v30 = vadd.f32 %v581_v28, %v580_v26 }
 0x117   : > { %v547_v31 = vadd.f32 %v546_v29, %v545_v27  ;;  %v583_v32 = vrot.slane %v582_v30, 2 }
 0x119   : > { %v548_v33 = vrot.slane %v547_v31, 1  ;;  %v584_v34 = vadd.f32 %v583_v32, %v582_v30 }
 0x11b   : > { %v585_v35 = vrot.slane %v584_v34, 1  ;;  %v549_v36 = vadd.f32 %v548_v33, %v547_v31 }
 0x11d   : > { %v586_v37 = vadd.f32 %v585_v35, %v584_v34 }
 0x11f   : > { %v588_v38 = vsel %vm587_vm1, %v549_v36, %v586_v37 }
 0x120   : > { %589 = vst [vmem:[%s211_s10] sm:$0x3] %v588_v38 }
 0x121 PF: > { %s15_s15 = sadd.s32 1, %s869_s15  }
 0x122   : > { %p12_p5 = scmp.ge.s32.totalorder %s15_s15, 6  }
 0x124   :  { %14 = sbr.rel (!%p12_p5) target bundleno = 1 (0x1), region = 74 }

// kernel: bottleneck_pallas.4
= control target key start
LH: loop header
LB: loop body
LE: loop exit
PB: predicated region body
PF: predicated region fallthrough
CT: control target
= control target key end

     0   :  { %s794_s12 = smov 0   ;;  %s973_s0 = inlined_call_operand.vmem [shape: f32[512,128], index: 0, kind: input, shape index: {}]   ;;  %s974_s1 = inlined_call_operand.vmem [shape: bf16[128,32], index: 1, kind: input, shape index: {}]   ;;  %s975_s2 = inlined_call_operand.vmem [shape: bf16[512,32], index: 2, kind: output, shape index: {0}]   ;;  %s976_s3 = inlined_call_operand.vmem [shape: f32[4,2,32], index: 3, kind: output, shape index: {1}]  }
   0x1 LB: > { %s800_s13 = sadd.s32 4294967295, %s772_s12   ;;  %p638_p0 = scmp.ge.s32.totalorder %s772_s12, 1  ;;  %s772_s12 = sphi %s794_s12, %s14_s12  }
   0x2   : > { %p141_p1 = scmp.lt.s32.totalorder %s772_s12, 5 }
   0x4   : > { %p142_p2 = pnand %p638_p0, %p141_p1 }
   0x5   : > { %v758_v0 = vld [vmem:[%s974_s1] sm:$0xff] (!%p142_p2)   ;;  %s639_s16 = sshll.u32 (!%p142_p2), %s800_s13, 4  ;;  %v759_v1 = vld [vmem:[%s974_s1 + $0x8] sm:$0xff] (!%p142_p2)   ;;  %v760_v2 = vld [vmem:[%s974_s1 + $0x10] sm:$0xff] (!%p142_p2)   ;;  %vm435_vm0 = vcmask (!%p142_p2), 257024   ;;  %vm452_vm1 = vcmask (!%p142_p2), 261120  }
   0x6   : > { %145 = sbr.rel (%p142_p2) target bundleno = 300 (0x12c), region = 28  ;;  %p170_p3 = scmp.lt.s32.totalorder (!%p142_p2), %s639_s16, 63  ;;  %702 = vmatprep.subr.bf16.mxu0 (!%p142_p2), %v758_v0  ;;  %734 = vmatprep.subr.bf16.mxu1 (!%p142_p2), %v758_v0  ;;  %v761_v3 = vld [vmem:[%s974_s1 + $0x18] sm:$0xff] (!%p142_p2)   ;;  %v762_v9 = vld [vmem:[%s974_s1 + $0x20] sm:$0xff] (!%p142_p2)   ;;  %v763_v11 = vld [vmem:[%s974_s1 + $0x28] sm:$0xff] (!%p142_p2)   ;;  %vm543_vm2 = vcmask (!%p142_p2), 1040384  }
   0x7   : > { %703 = vmatpush3.bf16.msra.mxu0 (!%p142_p2), %v758_v0  ;;  %742 = vmatpush3.bf16.msra.mxu1 (!%p142_p2), %v758_v0  ;;  %v764_v12 = vld [vmem:[%s974_s1 + $0x30] sm:$0xff] (!%p142_p2)   ;;  %v765_v13 = vld [vmem:[%s974_s1 + $0x38] sm:$0xff] (!%p142_p2)   ;;  %p181_p4 = scmp.lt.s32.totalorder (!%p142_p2), %s800_s13, 3  ;;  %vm545_vm3 = vcmask (!%p142_p2), 254976  }
   0x8   : > { %704 = vmatprep.subr.bf16.mxu0 (!%p142_p2), %v759_v1  ;;  %735 = vmatprep.subr.bf16.mxu1 (!%p142_p2), %v759_v1 }
   0xb   : > { %705 = vmatpush3.bf16.msra.mxu0 (!%p142_p2), %v759_v1  ;;  %743 = vmatpush3.bf16.msra.mxu1 (!%p142_p2), %v759_v1 }
   0xc   : > { %706 = vmatprep.subr.bf16.mxu0 (!%p142_p2), %v760_v2  ;;  %736 = vmatprep.subr.bf16.mxu1 (!%p142_p2), %v760_v2 }
   0xd   : > { %s978_s16 = smov (!%p170_p3, %s639_s16), 63  ;;  %s980_s13 = smov (!%p181_p4, %s800_s13), 3 }
   0xe   : > { %s640_s21 = sshll.u32 %s978_s16, 3  ;;  %s642_s8 = sshll.u32 %s978_s16, 2 }
   0xf   : > { %s820_s24 = scalar_lea.vmem %s973_s0, %s640_s21  ;;  %707 = vmatpush3.bf16.msra.mxu0 %v760_v2  ;;  %744 = vmatpush3.bf16.msra.mxu1 %v760_v2  ;;  %s857_s11 = scalar_lea.vmem %s975_s2, %s642_s8 }
  0x10   : > { %v186_v4 = vld [vmem:[%s820_s24] sm:$0xff]  ;;  %v187_v5 = vld [vmem:[%s820_s24 + $0x8] sm:$0xff]  ;;  %708 = vmatprep.subr.bf16.mxu0 %v761_v3  ;;  %737 = vmatprep.subr.bf16.mxu1 %v761_v3  ;;  %v188_v14 = vld [vmem:[%s820_s24 + $0x10] sm:$0xff]  ;;  %s643_s14 = sshll.u32 %s980_s13, 1 }
  0x11   : > { %v202_v6 = vpack.c.bf16 %v187_v5, %v186_v4  ;;  %v194_v7 = vld [vmem:[%s820_s24 + $0x40] sm:$0xff]  ;;  %v195_v8 = vld [vmem:[%s820_s24 + $0x48] sm:$0xff]  ;;  %v189_v15 = vld [vmem:[%s820_s24 + $0x18] sm:$0xff]  ;;  %s184_s17 = scalar_lea.vmem %s976_s3, %s643_s14 }
  0x12   : > { %v206_v10 = vpack.c.bf16 %v195_v8, %v194_v7  ;;  %v190_v16 = vld [vmem:[%s820_s24 + $0x20] sm:$0xff]  ;;  %v196_v17 = vld [vmem:[%s820_s24 + $0x50] sm:$0xff]  ;;  %v197_v18 = vld [vmem:[%s820_s24 + $0x58] sm:$0xff]  ;;  %v203_v22 = vpack.c.bf16 %v189_v15, %v188_v14 }
  0x13   : > { %718 = vmatprep.mubr.bf16.mxu0 %v202_v6  ;;  %709 = vmatpush3.bf16.msra.mxu0 %v761_v3  ;;  %v191_v19 = vld [vmem:[%s820_s24 + $0x28] sm:$0xff]  ;;  %v198_v20 = vld [vmem:[%s820_s24 + $0x60] sm:$0xff]  ;;  %v207_v23 = vpack.c.bf16 %v197_v18, %v196_v17  ;;  %v192_v26 = vld [vmem:[%s820_s24 + $0x30] sm:$0xff] }
  0x14   : > { %726 = vmatprep.mubr.bf16.mxu1 %v206_v10  ;;  %745 = vmatpush3.bf16.msra.mxu1 %v761_v3  ;;  %v199_v21 = vld [vmem:[%s820_s24 + $0x68] sm:$0xff]  ;;  %v204_v24 = vpack.c.bf16 %v191_v19, %v190_v16  ;;  %v193_v27 = vld [vmem:[%s820_s24 + $0x38] sm:$0xff]  ;;  %v200_v28 = vld [vmem:[%s820_s24 + $0x70] sm:$0xff] }
  0x15   : > { %710 = vmatprep.subr.bf16.mxu0 %v762_v9  ;;  %738 = vmatprep.subr.bf16.mxu1 %v762_v9  ;;  %v208_v25 = vpack.c.bf16 %v199_v21, %v198_v20  ;;  %v201_v29 = vld [vmem:[%s820_s24 + $0x78] sm:$0xff]  ;;  %v205_v30 = vpack.c.bf16 %v193_v27, %v192_v26 }
  0x16   : > { %v209_v31 = vpack.c.bf16 %v201_v29, %v200_v28 }
  0x17   : > { %711 = vmatpush3.bf16.msra.mxu0 %v762_v9 }
  0x18   : > { %746 = vmatpush3.bf16.msra.mxu1 %v762_v9  ;;  %712 = vmatprep.subr.bf16.mxu0 %v763_v11 }
  0x19   : > { %739 = vmatprep.subr.bf16.mxu1 %v763_v11 }
  0x1b   : > { %713 = vmatpush3.bf16.msra.mxu0 %v763_v11 }
  0x1c   : > { %747 = vmatpush3.bf16.msra.mxu1 %v763_v11  ;;  %714 = vmatprep.subr.bf16.mxu0 %v764_v12 }
  0x1d   : > { %740 = vmatprep.subr.bf16.mxu1 %v764_v12 }
  0x1f   : > { %715 = vmatpush3.bf16.msra.mxu0 %v764_v12 }
  0x20   : > { %748 = vmatpush3.bf16.msra.mxu1 %v764_v12  ;;  %716 = vmatprep.subr.bf16.mxu0 %v765_v13 }
  0x21   : > { %741 = vmatprep.subr.bf16.mxu1 %v765_v13 }
  0x23   : > { %717 = vmatpush3.bf16.msra.mxu0 %v765_v13 }
  0x24   : > { %749 = vmatpush3.bf16.msra.mxu1 %v765_v13 }
  0x26   : > { %719 = vmatmul.mubr.bf16.vlgmr.msra.gmra.mrb[0].mxu0 %v203_v22 }
  0x27   : > { %727 = vmatmul.mubr.bf16.vlgmr.msra.gmra.mrb[0].mxu1 %v207_v23  ;;  %722 = vmatprep.mubr.bf16.mxu0 %v204_v24 }
  0x28   : > { %730 = vmatprep.mubr.bf16.mxu1 %v208_v25 }
  0x2e   : > { %723 = vmatmul.mubr.bf16.gmra.mrb[4].mxu0 %v205_v30 }
  0x2f   : > { %731 = vmatmul.mubr.bf16.gmra.mrb[4].mxu1 %v209_v31 }
  0xf9   : > { %v720_v32 = vpop.f32.mrb[0].mxu0 }
  0xfa   : > { %v859_v33 = vpop.f32.mrb[0].mxu1  ;;  %v672_v34 = vpack.c.bf16 %v720_v32, %v720_v32  ;;  %v308_v35 = vpop.f32.mrb[1].mxu0  ;;  %v492_v42 = vmul.f32 %v720_v32, %v720_v32  ;;  %v456_v53 = vsel %vm452_vm1, %v720_v32, 0.0 }
  0xfb   : > { %v680_v36 = vpack.c.bf16 %v859_v33, %v859_v33  ;;  %v863_v37 = vpop.f32.mrb[1].mxu1  ;;  %v670_v38 = vpack.c.bf16 %v308_v35, %v308_v35  ;;  %v490_v39 = vmul.f32 %v308_v35, %v308_v35  ;;  %v721_v40 = vpop.f32.mrb[2].mxu0  ;;  %v453_v46 = vsel %vm452_vm1, %v308_v35, 0.0 }
  0xfc   : > { %v865_v41 = vpop.f32.mrb[2].mxu1  ;;  %438 = vst.msk [vmem:[%s857_s11 + $0x8] sm:$0xf] %vm435_vm0, %v672_v34  ;;  %v673_v43 = vpack.c.bf16 %v721_v40, %v721_v40  ;;  %v311_v44 = vpop.f32.mrb[3].mxu0  ;;  %v493_v50 = vmul.f32 %v721_v40, %v721_v40  ;;  %v678_v52 = vpack.c.bf16 %v863_v37, %v863_v37  ;;  %v509_v59 = vsel %vm452_vm1, %v492_v42, 0.0 }
  0xfd   : > { %446 = vst.msk [vmem:[%s857_s11 + $0x28] sm:$0xf] %vm435_vm0, %v680_v36  ;;  %v871_v45 = vpop.f32.mrb[3].mxu1  ;;  %436 = vst.msk [vmem:[%s857_s11] sm:$0xf] %vm435_vm0, %v670_v38  ;;  %v671_v47 = vpack.c.bf16 %v311_v44, %v311_v44  ;;  %v454_v48 = vsel %vm452_vm1, %v311_v44, 0.0  ;;  %v491_v49 = vmul.f32 %v311_v44, %v311_v44  ;;  %v681_v56 = vpack.c.bf16 %v865_v41, %v865_v41 }
  0xfe   : > { %439 = vst.msk [vmem:[%s857_s11 + $0xc] sm:$0xf] %vm435_vm0, %v673_v43  ;;  %v455_v51 = vadd.f32 %v454_v48, %v453_v46  ;;  %v506_v54 = vsel %vm452_vm1, %v490_v39, 0.0  ;;  %444 = vst.msk [vmem:[%s857_s11 + $0x20] sm:$0xf] %vm435_vm0, %v678_v52  ;;  %v679_v61 = vpack.c.bf16 %v871_v45, %v871_v45  ;;  %v458_v63 = vsel %vm452_vm1, %v721_v40, 0.0 }
  0xff   : > { %437 = vst.msk [vmem:[%s857_s11 + $0x4] sm:$0xf] %vm435_vm0, %v671_v47  ;;  %v507_v55 = vsel %vm452_vm1, %v491_v49, 0.0  ;;  %447 = vst.msk [vmem:[%s857_s11 + $0x2c] sm:$0xf] %vm435_vm0, %v681_v56  ;;  %v511_v0 = vsel %vm452_vm1, %v493_v50, 0.0  ;;  %v498_v23 = vmul.f32 %v863_v37, %v863_v37  ;;  %v499_v43 = vmul.f32 %v871_v45, %v871_v45 }
 0x100   : > { %v457_v57 = vadd.f32 %v456_v53, %v455_v51  ;;  %v508_v58 = vadd.f32 %v507_v55, %v506_v54  ;;  %445 = vst.msk [vmem:[%s857_s11 + $0x24] sm:$0xf] %vm435_vm0, %v679_v61  ;;  %v468_v34 = vsel %vm452_vm1, %v863_v37, 0.0  ;;  %v500_v37 = vmul.f32 %v859_v33, %v859_v33 }
 0x101   : > { %v724_v60 = vpop.f32.mrb[4].mxu0  ;;  %v521_v42 = vsel %vm452_vm1, %v498_v23, 0.0  ;;  %v470_v47 = vsel %vm452_vm1, %v871_v45, 0.0  ;;  %v472_v50 = vsel %vm452_vm1, %v859_v33, 0.0  ;;  %v501_v51 = vmul.f32 %v865_v41, %v865_v41 }
 0x102   : > { %v895_v62 = vpop.f32.mrb[4].mxu1  ;;  %v510_v1 = vadd.f32 %v509_v59, %v508_v58  ;;  %v676_v2 = vpack.c.bf16 %v724_v60, %v724_v60  ;;  %v324_v3 = vpop.f32.mrb[5].mxu0  ;;  %v459_v6 = vadd.f32 %v458_v63, %v457_v57  ;;  %v496_v18 = vmul.f32 %v724_v60, %v724_v60 }
 0x103   : > { %v356_v4 = vpop.f32.mrb[5].mxu1  ;;  %v674_v5 = vpack.c.bf16 %v324_v3, %v324_v3  ;;  %v460_v7 = vsel %vm452_vm1, %v324_v3, 0.0  ;;  %v494_v8 = vmul.f32 %v324_v3, %v324_v3  ;;  %v725_v9 = vpop.f32.mrb[6].mxu0  ;;  %v684_v24 = vpack.c.bf16 %v895_v62, %v895_v62 }
 0x104   : > { %v902_v10 = vpop.f32.mrb[6].mxu1  ;;  %442 = vst.msk [vmem:[%s857_s11 + $0x18] sm:$0xf] %vm435_vm0, %v676_v2  ;;  %v512_v11 = vadd.f32 %v511_v0, %v510_v1  ;;  %v677_v12 = vpack.c.bf16 %v725_v9, %v725_v9  ;;  %v327_v13 = vpop.f32.mrb[7].mxu0  ;;  %v461_v15 = vadd.f32 %v460_v7, %v459_v6  ;;  %v464_v25 = vsel %vm452_vm1, %v724_v60, 0.0 }
 0x105   : > { %v359_v14 = vpop.f32.mrb[7].mxu1  ;;  %440 = vst.msk [vmem:[%s857_s11 + $0x10] sm:$0xf] %vm435_vm0, %v674_v5  ;;  %v513_v16 = vsel %vm452_vm1, %v494_v8, 0.0  ;;  %v675_v17 = vpack.c.bf16 %v327_v13, %v327_v13  ;;  %v462_v20 = vsel %vm452_vm1, %v327_v13, 0.0  ;;  %v495_v21 = vmul.f32 %v327_v13, %v327_v13 }
 0x106   : > { %v514_v19 = vadd.f32 %v513_v16, %v512_v11  ;;  %443 = vst.msk [vmem:[%s857_s11 + $0x1c] sm:$0xf] %vm435_vm0, %v677_v12  ;;  %v463_v22 = vadd.f32 %v462_v20, %v461_v15  ;;  %v497_v26 = vmul.f32 %v725_v9, %v725_v9  ;;  %v682_v28 = vpack.c.bf16 %v356_v4, %v356_v4 }
 0x107   : > { %441 = vst.msk [vmem:[%s857_s11 + $0x14] sm:$0xf] %vm435_vm0, %v675_v17  ;;  %v515_v27 = vsel %vm452_vm1, %v495_v21, 0.0  ;;  %450 = vst.msk [vmem:[%s857_s11 + $0x38] sm:$0xf] %vm435_vm0, %v684_v24  ;;  %v517_v31 = vsel %vm452_vm1, %v496_v18, 0.0  ;;  %v685_v35 = vpack.c.bf16 %v902_v10, %v902_v10  ;;  %v683_v39 = vpack.c.bf16 %v359_v14, %v359_v14 }
 0x108   : > { %v465_v29 = vadd.f32 %v464_v25, %v463_v22  ;;  %v516_v30 = vadd.f32 %v515_v27, %v514_v19  ;;  %v466_v32 = vsel %vm452_vm1, %v725_v9, 0.0  ;;  %448 = vst.msk [vmem:[%s857_s11 + $0x30] sm:$0xf] %vm435_vm0, %v682_v28  ;;  %v519_v40 = vsel %vm452_vm1, %v497_v26, 0.0 }
 0x109   : > { %451 = vst.msk [vmem:[%s857_s11 + $0x3c] sm:$0xf] %vm435_vm0, %v685_v35  ;;  %449 = vst.msk [vmem:[%s857_s11 + $0x34] sm:$0xf] %vm435_vm0, %v683_v39  ;;  %v523_v52 = vsel %vm452_vm1, %v499_v43, 0.0  ;;  %v502_v53 = vmul.f32 %v356_v4, %v356_v4  ;;  %v525_v56 = vsel %vm452_vm1, %v500_v37, 0.0  ;;  %v503_v61 = vmul.f32 %v359_v14, %v359_v14 }
 0x10a   : > { %v518_v36 = vadd.f32 %v517_v31, %v516_v30  ;;  %v467_v38 = vadd.f32 %v466_v32, %v465_v29  ;;  %v474_v57 = vsel %vm452_vm1, %v865_v41, 0.0  ;;  %v476_v45 = vsel %vm452_vm1, %v356_v4, 0.0 }
 0x10b   : > { %v527_v60 = vsel %vm452_vm1, %v501_v51, 0.0  ;;  %v529_v33 = vsel %vm452_vm1, %v502_v53, 0.0  ;;  %v504_v1 = vmul.f32 %v895_v62, %v895_v62  ;;  %v478_v2 = vsel %vm452_vm1, %v359_v14, 0.0 }
 0x10c   : > { %v469_v44 = vadd.f32 %v468_v34, %v467_v38  ;;  %v520_v46 = vadd.f32 %v519_v40, %v518_v36  ;;  %v480_v41 = vsel %vm452_vm1, %v895_v62, 0.0  ;;  %v505_v4 = vmul.f32 %v902_v10, %v902_v10 }
 0x10d   : > { %v531_v6 = vsel %vm452_vm1, %v503_v61, 0.0  ;;  %v533_v9 = vsel %vm452_vm1, %v504_v1, 0.0  ;;  %v482_v11 = vsel %vm452_vm1, %v902_v10, 0.0 }
 0x10e   : > { %v522_v48 = vadd.f32 %v521_v42, %v520_v46  ;;  %v471_v49 = vadd.f32 %v470_v47, %v469_v44  ;;  %v535_v14 = vsel %vm452_vm1, %v505_v4, 0.0 }
 0x110   : > { %v473_v54 = vadd.f32 %v472_v50, %v471_v49  ;;  %v524_v55 = vadd.f32 %v523_v52, %v522_v48 }
 0x112   : > { %v526_v58 = vadd.f32 %v525_v56, %v524_v55  ;;  %v475_v59 = vadd.f32 %v474_v57, %v473_v54 }
 0x114   : > { %v477_v63 = vadd.f32 %v476_v45, %v475_v59  ;;  %v528_v0 = vadd.f32 %v527_v60, %v526_v58 }
 0x116   : > { %v530_v3 = vadd.f32 %v529_v33, %v528_v0  ;;  %v479_v5 = vadd.f32 %v478_v2, %v477_v63 }
 0x118   : > { %v481_v7 = vadd.f32 %v480_v41, %v479_v5  ;;  %v532_v8 = vadd.f32 %v531_v6, %v530_v3 }
 0x11a   : > { %v483_v12 = vadd.f32 %v482_v11, %v481_v7  ;;  %v534_v13 = vadd.f32 %v533_v9, %v532_v8 }
 0x11c   : > { %v484_v15 = vrot.slane %v483_v12, 4  ;;  %v536_v16 = vadd.f32 %v535_v14, %v534_v13 }
 0x11e   : > { %v485_v62 = vadd.f32 %v484_v15, %v483_v12  ;;  %v537_v17 = vrot.slane %v536_v16, 4 }
 0x120   : > { %v486_v18 = vrot.slane %v485_v62, 2  ;;  %v538_v19 = vadd.f32 %v537_v17, %v536_v16 }
 0x122   : > { %v487_v20 = vadd.f32 %v486_v18, %v485_v62  ;;  %v539_v21 = vrot.slane %v538_v19, 2 }
 0x124   : > { %v488_v22 = vrot.slane %v487_v20, 1  ;;  %v540_v23 = vadd.f32 %v539_v21, %v538_v19 }
 0x126   : > { %v541_v24 = vrot.slane %v540_v23, 1  ;;  %v489_v10 = vadd.f32 %v488_v22, %v487_v20 }
 0x128   : > { %v542_v25 = vadd.f32 %v541_v24, %v540_v23 }
 0x12a   : > { %v544_v26 = vsel %vm543_vm2, %v489_v10, %v542_v25 }
 0x12b   : > { %546 = vst.msk [vmem:[%s184_s17] sm:$0x3] %vm545_vm3, %v544_v26 }
 0x12c PF: > { %s14_s12 = sadd.s32 1, %s772_s12  }
 0x12d   : > { %p11_p5 = scmp.ge.s32.totalorder %s14_s12, 6  }
 0x12f   :  { %13 = sbr.rel (!%p11_p5) target bundleno = 1 (0x1), region = 70 }

// kernel: bottleneck_pallas.5
= control target key start
LH: loop header
LB: loop body
LE: loop exit
PB: predicated region body
PF: predicated region fallthrough
CT: control target
= control target key end

     0   :  { %s5111_s15 = smov 0   ;;  %s6448_s0 = inlined_call_operand.vmem [shape: bf16[2,16,16,32], index: 0, kind: input, shape index: {}]   ;;  %s6449_s1 = inlined_call_operand.vmem [shape: f32[2,32], index: 1, kind: input, shape index: {}]   ;;  %s6450_s2 = inlined_call_operand.vmem [shape: bf16[9,32,32], index: 2, kind: input, shape index: {}]   ;;  %s6451_s3 = inlined_call_operand.vmem [shape: bf16[2,16,16,32], index: 3, kind: output, shape index: {0}]   ;;  %s6452_s4 = inlined_call_operand.vmem [shape: f32[2,2,32], index: 4, kind: output, shape index: {1}]  }
   0x1 LB: > { %s3923_s16 = sadd.s32 4294967295, %s5083_s15   ;;  %p3927_p0 = scmp.ge.s32.totalorder %s5083_s15, 1  ;;  %s5083_s15 = sphi %s5111_s15, %s15_s15  }
   0x2   : > { %p165_p1 = scmp.lt.s32.totalorder %s5083_s15, 3 }
   0x4   : > { %p166_p2 = pnand %p3927_p0, %p165_p1 }
   0x6   : > { %169 = sbr.rel (%p166_p2) target bundleno = 558 (0x22e), region = 32 }
   0xd   : > { %v5031_v0 = vld [vmem:[%s6450_s2 + $0x10] sm:$0xff]   ;;  %vm380_vm0 = vcmask 261120   ;;  %v5032_v1 = vld [vmem:[%s6450_s2 + $0x40] sm:$0xff]   ;;  %v5033_v2 = vld [vmem:[%s6450_s2 + $0x18] sm:$0xff]   ;;  %v5085_v3 = vmov 0.0   ;;  %p195_p3 = scmp.lt.s32.totalorder %s3923_s16, 1 }
   0xe   : > { %4438 = vmatprep.subr.bf16.mxu1 %v5031_v0  ;;  %381 = vst.msk [vmem:[#allocation2] sm:$0xff] %vm380_vm0, %v5085_v3  ;;  %382 = vst.msk [vmem:[#allocation2 + $0x8] sm:$0xff] %vm380_vm0, %v5085_v3  ;;  %4582 = vmatprep.subr.bf16.mxu0 %v5032_v1  ;;  %v5034_v4 = vld [vmem:[%s6450_s2 + $0x48] sm:$0xff]   ;;  %v5140_v5 = vld [vmem:[%s6450_s2] sm:$0xff]   ;;  %vm3630_vm5 = vcmask 257024   ;;  %vm3833_vm6 = vcmask 1040384  }
   0xf   : > { %384 = vst.msk [vmem:[#allocation2 + $0x110] sm:$0xff] %vm380_vm0, %v5085_v3  ;;  %385 = vst.msk [vmem:[#allocation2 + $0x118] sm:$0xff] %vm380_vm0, %v5085_v3  ;;  %4439 = vmatpush3.bf16.msra.mxu1 %v5031_v0  ;;  %4583 = vmatpush3.bf16.msra.mxu0 %v5032_v1  ;;  %s6517_s16 = smov (!%p195_p3, %s3923_s16), 1  ;;  %v5146_v6 = vld [vmem:[%s6450_s2 + $0x50] sm:$0xff]   ;;  %v5158_v7 = vld [vmem:[%s6449_s1] ss:$0 sm:$0xff] }
  0x10   : > { %4440 = vmatprep.subr.bf16.mxu1 %v5033_v2  ;;  %4584 = vmatprep.subr.bf16.mxu0 %v5034_v4  ;;  %s4163_s27 = sshll.u32 %s6517_s16, 7  ;;  %v5175_v19 = vld [vmem:[%s6449_s1 + $0x1] ss:$0 sm:$0xff]  ;;  %vm3835_vm7 = vcmask 254976  }
  0x11   : > { %s5153_s6 = scalar_lea.vmem %s6448_s0, %s4163_s27  ;;  %s6303_s20 = scalar_lea.vmem %s6451_s3, %s4163_s27 }
  0x12   : > { %v4198_v8 = vld [vmem:[%s5153_s6] sm:$0xff]   ;;  %v4261_v9 = vld [vmem:[%s5153_s6 + $0x8] sm:$0xff]   ;;  %v4262_v10 = vld [vmem:[%s5153_s6 + $0x10] sm:$0xff]   ;;  %s3932_s27 = sshll.u32 %s6517_s16, 1 }
  0x13   : > { %4441 = vmatpush3.bf16.msra.mxu1 %v5033_v2  ;;  %4585 = vmatpush3.bf16.msra.mxu0 %v5034_v4  ;;  %v4199_v13 = vunpack.c.l.bf16 %v4198_v8  ;;  %v4200_v14 = vunpack.c.h.bf16 %v4198_v8  ;;  %v4203_v15 = vunpack.c.l.bf16 %v4261_v9  ;;  %v4204_v16 = vunpack.c.h.bf16 %v4261_v9  ;;  %v4263_v17 = vld [vmem:[%s5153_s6 + $0x18] sm:$0xff]   ;;  %v4264_v35 = vld [vmem:[%s5153_s6 + $0x20] sm:$0xff]   ;;  %v4265_v36 = vld [vmem:[%s5153_s6 + $0x28] sm:$0xff]   ;;  %s208_s23 = scalar_lea.vmem %s6452_s4, %s3932_s27 }
  0x14   : > { %4474 = vmatprep.subr.bf16.mxu1 %v5140_v5  ;;  %4618 = vmatprep.subr.bf16.mxu0 %v5146_v6  ;;  %v4207_v24 = vunpack.c.l.bf16 %v4262_v10  ;;  %v4208_v25 = vunpack.c.h.bf16 %v4262_v10  ;;  %v4211_v26 = vunpack.c.l.bf16 %v4263_v17  ;;  %v4212_v30 = vunpack.c.h.bf16 %v4263_v17  ;;  %v4266_v53 = vld [vmem:[%s5153_s6 + $0x30] sm:$0xff]   ;;  %v4267_v58 = vld [vmem:[%s5153_s6 + $0x38] sm:$0xff]  }
  0x15   : > { %v5164_v11 = vld [vmem:[#allocation2] sm:$0xff]  ;;  %v5166_v12 = vld [vmem:[#allocation2 + $0x8] sm:$0xff]  ;;  %v279_v20 = vmul.f32 %v4199_v13, %v5158_v7  ;;  %v280_v21 = vmul.f32 %v4200_v14, %v5158_v7  ;;  %v281_v22 = vmul.f32 %v4203_v15, %v5158_v7  ;;  %v282_v23 = vmul.f32 %v4204_v16, %v5158_v7 }
  0x16   : > { %v573_v18 = vpack.c.bf16 %v5166_v12, %v5164_v11  ;;  %v283_v32 = vmul.f32 %v4207_v24, %v5158_v7  ;;  %v284_v33 = vmul.f32 %v4208_v25, %v5158_v7  ;;  %v285_v34 = vmul.f32 %v4211_v26, %v5158_v7 }
  0x17   : > { %v316_v27 = vadd.f32 %v5175_v19, %v279_v20  ;;  %v317_v28 = vadd.f32 %v5175_v19, %v280_v21  ;;  %v318_v29 = vadd.f32 %v5175_v19, %v281_v22  ;;  %v319_v31 = vadd.f32 %v5175_v19, %v282_v23  ;;  %v5038_v20 = vld [vmem:[%s6450_s2 + $0x8] sm:$0xff]  }
  0x18   : > { %4442 = vmatprep.mubr.msk.bf16.mxu1 %vm380_vm0, %v573_v18  ;;  %v286_v40 = vmul.f32 %v4212_v30, %v5158_v7  ;;  %v320_v42 = vadd.f32 %v5175_v19, %v283_v32  ;;  %v321_v43 = vadd.f32 %v5175_v19, %v284_v33  ;;  %v322_v44 = vadd.f32 %v5175_v19, %v285_v34  ;;  %v5037_v18 = vld [vmem:[%s6450_s2 + $0x58] sm:$0xff]   ;;  %v5261_v30 = vld [vmem:[%s6450_s2 + $0x20] sm:$0xff]  }
  0x19   : > { %v348_v37 = vmax.f32 %v316_v27, 0.0  ;;  %v349_v38 = vmax.f32 %v317_v28, 0.0  ;;  %v350_v39 = vmax.f32 %v318_v29, 0.0  ;;  %v351_v41 = vmax.f32 %v319_v31, 0.0 }
  0x1a   : > { %v323_v45 = vadd.f32 %v5175_v19, %v286_v40  ;;  %v4215_v46 = vunpack.c.l.bf16 %v4264_v35  ;;  %v4216_v47 = vunpack.c.h.bf16 %v4264_v35  ;;  %v4219_v48 = vunpack.c.l.bf16 %v4265_v36  ;;  %v4268_v40 = vld [vmem:[%s5153_s6 + $0x40] sm:$0xff]  }
  0x1b   : > { %387 = vst.msk [vmem:[#allocation2 + $0x10] sm:$0xff] %vm380_vm0, %v348_v37  ;;  %388 = vst.msk [vmem:[#allocation2 + $0x18] sm:$0xff] %vm380_vm0, %v349_v38  ;;  %v352_v49 = vmax.f32 %v320_v42, 0.0  ;;  %v353_v50 = vmax.f32 %v321_v43, 0.0  ;;  %v354_v51 = vmax.f32 %v322_v44, 0.0  ;;  %v4220_v52 = vunpack.c.h.bf16 %v4265_v36 }
  0x1c   : > { %389 = vst.msk [vmem:[#allocation2 + $0x20] sm:$0xff] %vm380_vm0, %v350_v39  ;;  %390 = vst.msk [vmem:[#allocation2 + $0x28] sm:$0xff] %vm380_vm0, %v351_v41  ;;  %v355_v54 = vmax.f32 %v323_v45, 0.0  ;;  %v287_v55 = vmul.f32 %v4215_v46, %v5158_v7  ;;  %v288_v56 = vmul.f32 %v4216_v47, %v5158_v7  ;;  %v289_v57 = vmul.f32 %v4219_v48, %v5158_v7  ;;  %v4269_v41 = vld [vmem:[%s5153_s6 + $0x48] sm:$0xff]   ;;  %v4270_v45 = vld [vmem:[%s5153_s6 + $0x50] sm:$0xff]  }
  0x1d   : > { %391 = vst.msk [vmem:[#allocation2 + $0x30] sm:$0xff] %vm380_vm0, %v352_v49  ;;  %392 = vst.msk [vmem:[#allocation2 + $0x38] sm:$0xff] %vm380_vm0, %v353_v50  ;;  %v290_v59 = vmul.f32 %v4220_v52, %v5158_v7  ;;  %v4223_v0 = vunpack.c.l.bf16 %v4266_v53  ;;  %v4224_v4 = vunpack.c.h.bf16 %v4266_v53  ;;  %v4227_v14 = vunpack.c.l.bf16 %v4267_v58 }
  0x1e   : > { %393 = vst.msk [vmem:[#allocation2 + $0x40] sm:$0xff] %vm380_vm0, %v354_v51  ;;  %394 = vst.msk [vmem:[#allocation2 + $0x48] sm:$0xff] %vm380_vm0, %v355_v54  ;;  %v324_v60 = vadd.f32 %v5175_v19, %v287_v55  ;;  %v325_v61 = vadd.f32 %v5175_v19, %v288_v56  ;;  %v326_v62 = vadd.f32 %v5175_v19, %v289_v57  ;;  %v419_v21 = vlaneseq }
  0x1f   : > { %v327_v63 = vadd.f32 %v5175_v19, %v290_v59  ;;  %v291_v22 = vmul.f32 %v4223_v0, %v5158_v7  ;;  %v292_v23 = vmul.f32 %v4224_v4, %v5158_v7  ;;  %v4228_v26 = vunpack.c.h.bf16 %v4267_v58 }
  0x20   : > { %v356_v1 = vmax.f32 %v324_v60, 0.0  ;;  %v357_v2 = vmax.f32 %v325_v61, 0.0  ;;  %v358_v3 = vmax.f32 %v326_v62, 0.0  ;;  %v293_v27 = vmul.f32 %v4227_v14, %v5158_v7  ;;  %v4271_v14 = vld [vmem:[%s5153_s6 + $0x58] sm:$0xff]  }
  0x21   : > { %v359_v13 = vmax.f32 %v327_v63, 0.0  ;;  %v328_v32 = vadd.f32 %v5175_v19, %v291_v22  ;;  %v329_v33 = vadd.f32 %v5175_v19, %v292_v23  ;;  %v294_v37 = vmul.f32 %v4228_v26, %v5158_v7 }
  0x22   : > { %v5214_v8 = vld [vmem:[#allocation2 + $0x10] sm:$0xff]  ;;  %v5216_v9 = vld [vmem:[#allocation2 + $0x18] sm:$0xff]  ;;  %395 = vst.msk [vmem:[#allocation2 + $0x50] sm:$0xff] %vm380_vm0, %v356_v1  ;;  %396 = vst.msk [vmem:[#allocation2 + $0x58] sm:$0xff] %vm380_vm0, %v357_v2  ;;  %v330_v38 = vadd.f32 %v5175_v19, %v293_v27  ;;  %v4231_v48 = vunpack.c.l.bf16 %v4268_v40  ;;  %v4232_v49 = vunpack.c.h.bf16 %v4268_v40  ;;  %v4235_v54 = vunpack.c.l.bf16 %v4269_v41 }
  0x23   : > { %v5218_v10 = vld [vmem:[#allocation2 + $0x20] sm:$0xff]  ;;  %v574_v15 = vpack.c.bf16 %v5216_v9, %v5214_v8  ;;  %v5222_v16 = vld [vmem:[#allocation2 + $0x28] sm:$0xff]  ;;  %397 = vst.msk [vmem:[#allocation2 + $0x60] sm:$0xff] %vm380_vm0, %v358_v3  ;;  %398 = vst.msk [vmem:[#allocation2 + $0x68] sm:$0xff] %vm380_vm0, %v359_v13  ;;  %v360_v43 = vmax.f32 %v328_v32, 0.0  ;;  %v361_v44 = vmax.f32 %v329_v33, 0.0  ;;  %v331_v46 = vadd.f32 %v5175_v19, %v294_v37 }
  0x24   : > { %v1812_v17 = vpack.c.bf16 %v5222_v16, %v5218_v10  ;;  %v5242_v24 = vld [vmem:[#allocation2 + $0x30] sm:$0xff]  ;;  %v5244_v25 = vld [vmem:[#allocation2 + $0x38] sm:$0xff]  ;;  %v362_v47 = vmax.f32 %v330_v38, 0.0  ;;  %v1037_v50 = vrot.slane %v5214_v8, 1  ;;  %v1053_v51 = vrot.slane %v5216_v9, 1 }
  0x25   : > { %4443 = vmatmul.mubr.msk.bf16.vlgmr.msra.gmra.mrb[0].mxu1 %vm380_vm0, %v574_v15  ;;  %4586 = vmatprep.mubr.msk.bf16.mxu0 %vm380_vm0, %v574_v15  ;;  %v5249_v28 = vld [vmem:[#allocation2 + $0x40] sm:$0xff]  ;;  %v5251_v29 = vld [vmem:[#allocation2 + $0x48] sm:$0xff]  ;;  %v576_v31 = vpack.c.bf16 %v5244_v25, %v5242_v24  ;;  %399 = vst.msk [vmem:[#allocation2 + $0x70] sm:$0xff] %vm380_vm0, %v360_v43  ;;  %400 = vst.msk [vmem:[#allocation2 + $0x78] sm:$0xff] %vm380_vm0, %v361_v44  ;;  %v4236_v55 = vunpack.c.h.bf16 %v4269_v41  ;;  %v363_v56 = vmax.f32 %v331_v46, 0.0  ;;  %v4239_v59 = vunpack.c.l.bf16 %v4270_v45 }
  0x26   : > { %4475 = vmatpush3.bf16.msra.mxu1 %v5140_v5  ;;  %4587 = vmatmul.mubr.msk.bf16.vlgmr.msra.gmra.mrb[0].mxu0 %vm380_vm0, %v1812_v17  ;;  %v5256_v5 = vld [vmem:[%s6450_s2 + $0x60] sm:$0xff]   ;;  %v1814_v34 = vpack.c.bf16 %v5251_v29, %v5249_v28  ;;  %401 = vst.msk [vmem:[#allocation2 + $0x80] sm:$0xff] %vm380_vm0, %v362_v47  ;;  %v295_v57 = vmul.f32 %v4231_v48, %v5158_v7  ;;  %v4240_v62 = vunpack.c.h.bf16 %v4270_v45  ;;  %v4243_v32 = vunpack.c.l.bf16 %v4271_v14 }
  0x27   : > { %4619 = vmatpush3.bf16.msra.mxu0 %v5146_v6  ;;  %4446 = vmatprep.mubr.msk.bf16.mxu1 %vm380_vm0, %v1812_v17  ;;  %v5263_v6 = vshrl.u32 %v419_v21, 7  ;;  %v296_v58 = vmul.f32 %v4232_v49, %v5158_v7  ;;  %v297_v60 = vmul.f32 %v4235_v54, %v5158_v7  ;;  %v298_v61 = vmul.f32 %v4236_v55, %v5158_v7 }
  0x28   : > { %4620 = vmatprep.subr.bf16.mxu0 %v5037_v18  ;;  %4476 = vmatprep.subr.bf16.mxu1 %v5038_v20  ;;  %402 = vst.msk [vmem:[#allocation2 + $0x88] sm:$0xff] %vm380_vm0, %v363_v56  ;;  %v332_v0 = vadd.f32 %v5175_v19, %v295_v57  ;;  %v299_v2 = vmul.f32 %v4239_v59, %v5158_v7  ;;  %v4244_v33 = vunpack.c.h.bf16 %v4271_v14  ;;  %v2102_v43 = vrot.slane %v5222_v16, 1 }
  0x29   : > { %v5271_v35 = vld [vmem:[#allocation2 + $0x50] sm:$0xff]  ;;  %v5273_v36 = vld [vmem:[#allocation2 + $0x58] sm:$0xff]  ;;  %4590 = vmatprep.mubr.msk.bf16.mxu0 %vm380_vm0, %v576_v31  ;;  %v5285_v42 = vadd.s32 8, %v5263_v6  ;;  %vm1068_vm1 = vcmp.lt.s32.totalorder %v5263_v6, 7  ;;  %v333_v1 = vadd.f32 %v5175_v19, %v296_v58  ;;  %v334_v3 = vadd.f32 %v5175_v19, %v297_v60 }
  0x2a   : > { %4477 = vmatpush3.bf16.msra.mxu1 %v5038_v20  ;;  %v578_v39 = vpack.c.bf16 %v5273_v36, %v5271_v35  ;;  %v5295_v52 = vld [vmem:[#allocation2 + $0x60] sm:$0xff]  ;;  %v5297_v53 = vld [vmem:[#allocation2 + $0x68] sm:$0xff]  ;;  %v335_v4 = vadd.f32 %v5175_v19, %v298_v61  ;;  %v300_v13 = vmul.f32 %v4240_v62, %v5158_v7  ;;  %v1086_v15 = vsel %vm1068_vm1, %v1053_v51, %v1037_v50 }
  0x2b   : > { %4621 = vmatpush3.bf16.msra.mxu0 %v5037_v18  ;;  %4510 = vmatprep.subr.bf16.mxu1 %v5261_v30  ;;  %v1816_v63 = vpack.c.bf16 %v5297_v53, %v5295_v52  ;;  %vm1102_vm2 = vcmp.eq.s32.totalorder %v5285_v42, 15  ;;  %v364_v17 = vmax.f32 %v332_v0, 0.0  ;;  %v365_v18 = vmax.f32 %v333_v1, 0.0 }
  0x2c   : > { %4654 = vmatprep.subr.bf16.mxu0 %v5256_v5  ;;  %v336_v20 = vadd.f32 %v5175_v19, %v299_v2  ;;  %v366_v21 = vmax.f32 %v334_v3, 0.0  ;;  %v367_v22 = vmax.f32 %v335_v4, 0.0  ;;  %v337_v23 = vadd.f32 %v5175_v19, %v300_v13  ;;  %v5325_v26 = vld [vmem:[#allocation2 + $0x70] sm:$0xff]  ;;  %v5327_v27 = vld [vmem:[#allocation2 + $0x78] sm:$0xff] }
  0x2d   : > { %4447 = vmatmul.mubr.msk.bf16.gmra.mrb[4].mxu1 %vm380_vm0, %v576_v31  ;;  %403 = vst.msk [vmem:[#allocation2 + $0x90] sm:$0xff] %vm380_vm0, %v364_v17  ;;  %404 = vst.msk [vmem:[#allocation2 + $0x98] sm:$0xff] %vm380_vm0, %v365_v18  ;;  %v1070_v37 = vsel %vm1068_vm1, %v1037_v50, %v1053_v51  ;;  %v1106_v38 = vsel %vm1102_vm2, 0.0, %v1086_v15  ;;  %v5339_v40 = vpack.c.bf16 %v5327_v27, %v5325_v26  ;;  %v5341_v41 = vld [vmem:[#allocation2 + $0x80] sm:$0xff]  ;;  %v1039_v44 = vrot.slane %v5242_v24, 1 }
  0x2e   : > { %4591 = vmatmul.mubr.msk.bf16.gmra.mrb[4].mxu0 %vm380_vm0, %v1814_v34  ;;  %4450 = vmatprep.mubr.msk.bf16.mxu1 %vm380_vm0, %v1814_v34  ;;  %v368_v31 = vmax.f32 %v336_v20, 0.0  ;;  %v4272_v34 = vld [vmem:[%s5153_s6 + $0x60] sm:$0xff]   ;;  %405 = vst.msk [vmem:[#allocation2 + $0xa0] sm:$0xff] %vm380_vm0, %v366_v21  ;;  %406 = vst.msk [vmem:[#allocation2 + $0xa8] sm:$0xff] %vm380_vm0, %v367_v22  ;;  %v1055_v45 = vrot.slane %v5244_v25, 1  ;;  %v369_v46 = vmax.f32 %v337_v23, 0.0  ;;  %v301_v48 = vmul.f32 %v4243_v32, %v5158_v7 }
  0x2f   : > { %4594 = vmatprep.mubr.msk.bf16.mxu0 %vm380_vm0, %v578_v39  ;;  %6470 = vst [vmem:[#allocation3_spill] sm:$0xff] %v5339_v40  ;;  %v5351_v47 = vld [vmem:[#allocation2 + $0x88] sm:$0xff]  ;;  %v302_v49 = vmul.f32 %v4244_v33, %v5158_v7  ;;  %v4247_v50 = vunpack.c.l.bf16 %v4272_v34  ;;  %v5359_v54 = vpack.c.bf16 %v1106_v38, %v1070_v37  ;;  %v4248_v57 = vunpack.c.h.bf16 %v4272_v34  ;;  %v4274_v37 = vld [vmem:[%s5153_s6 + $0x70] sm:$0xff]  }
  0x30   : > { %407 = vst.msk [vmem:[#allocation2 + $0xb0] sm:$0xff] %vm380_vm0, %v368_v31  ;;  %v5357_v51 = vpack.c.bf16 %v5351_v47, %v5341_v41  ;;  %408 = vst.msk [vmem:[#allocation2 + $0xb8] sm:$0xff] %vm380_vm0, %v369_v46  ;;  %v338_v55 = vadd.f32 %v5175_v19, %v301_v48  ;;  %v2088_v60 = vrot.slane %v5249_v28, 1  ;;  %v2104_v61 = vrot.slane %v5251_v29, 1  ;;  %v4273_v23 = vld [vmem:[%s5153_s6 + $0x68] sm:$0xff]  }
  0x31   : > { %v339_v56 = vadd.f32 %v5175_v19, %v302_v49  ;;  %v303_v58 = vmul.f32 %v4247_v50, %v5158_v7  ;;  %v2135_v62 = vsel %vm1068_vm1, %v1055_v45, %v1039_v44  ;;  %v304_v1 = vmul.f32 %v4248_v57, %v5158_v7  ;;  %v5041_v57 = vld [vmem:[%s6450_s2 + $0x68] sm:$0xff]  }
  0x32   : > { %6471 = vst [vmem:[#allocation4_spill] sm:$0xff] %v5357_v51  ;;  %vm486_vm3 = vcmp.lt.s32.totalorder %v5263_v6, 1  ;;  %v1041_v18 = vrot.slane %v5271_v35, 1  ;;  %v1057_v20 = vrot.slane %v5273_v36, 1  ;;  %v2119_v21 = vsel %vm1068_vm1, %v1039_v44, %v1055_v45 }
  0x33   : > { %v371_v0 = vmax.f32 %v339_v56, 0.0  ;;  %v340_v2 = vadd.f32 %v5175_v19, %v303_v58  ;;  %v2154_v22 = vsel %vm1102_vm2, 0.0, %v2135_v62  ;;  %v2136_v32 = vsel %vm1068_vm1, %v2104_v61, %v2088_v60 }
  0x34   : > { %v5379_v3 = vld [vmem:[#allocation2 + $0x90] sm:$0xff]  ;;  %v5381_v4 = vld [vmem:[#allocation2 + $0x98] sm:$0xff]  ;;  %v341_v33 = vadd.f32 %v5175_v19, %v304_v1  ;;  %v454_v38 = vrot.slane %v5164_v11, 7  ;;  %vm519_vm4 = vcmp.eq.s32.totalorder %v5263_v6, 0  ;;  %v5419_v44 = vpack.c.bf16 %v2154_v22, %v2119_v21 }
  0x35   : > { %4451 = vmatmul.mubr.msk.bf16.gmra.mrb[8].mxu1 %vm380_vm0, %v578_v39  ;;  %v2086_v39 = vrot.slane %v5218_v10, 1  ;;  %v5390_v15 = vld [vmem:[#allocation2 + $0xa0] sm:$0xff]  ;;  %v5392_v17 = vld [vmem:[#allocation2 + $0xa8] sm:$0xff]  ;;  %410 = vst.msk [vmem:[#allocation2 + $0xc8] sm:$0xff] %vm380_vm0, %v371_v0  ;;  %v5405_v31 = vpack.c.bf16 %v5381_v4, %v5379_v3  ;;  %v372_v34 = vmax.f32 %v340_v2, 0.0  ;;  %v4251_v46 = vunpack.c.l.bf16 %v4273_v23 }
  0x36   : > { %4595 = vmatmul.mubr.msk.bf16.gmra.mrb[8].mxu0 %vm380_vm0, %v1816_v63  ;;  %4454 = vmatprep.mubr.msk.bf16.mxu1 %vm380_vm0, %v1816_v63  ;;  %v370_v63 = vmax.f32 %v338_v55, 0.0  ;;  %v373_v45 = vmax.f32 %v341_v33, 0.0  ;;  %v4252_v48 = vunpack.c.h.bf16 %v4273_v23  ;;  %v2120_v49 = vsel %vm1068_vm1, %v2088_v60, %v2104_v61 }
  0x37   : > { %4598 = vmatprep.mubr.msk.bf16.mxu0 %vm380_vm0, %v5339_v40  ;;  %v2134_v59 = vsel %vm1068_vm1, %v2102_v43, %v2086_v39  ;;  %v2118_v13 = vsel %vm1068_vm1, %v2086_v39, %v2102_v43  ;;  %6472 = vst [vmem:[#allocation5_spill] sm:$0xff] %v5405_v31  ;;  %v5417_v43 = vpack.c.bf16 %v5392_v17, %v5390_v15  ;;  %411 = vst.msk [vmem:[#allocation2 + $0xd0] sm:$0xff] %vm380_vm0, %v372_v34  ;;  %v5443_v0 = vld [vmem:[#allocation2 + $0xb0] sm:$0xff]  ;;  %v5445_v1 = vld [vmem:[#allocation2 + $0xb8] sm:$0xff] }
  0x38   : > { %v2152_v14 = vsel %vm1102_vm2, 0.0, %v2134_v59  ;;  %409 = vst.msk [vmem:[#allocation2 + $0xc0] sm:$0xff] %vm380_vm0, %v370_v63  ;;  %v2156_v50 = vsel %vm1102_vm2, 0.0, %v2136_v32  ;;  %v4255_v55 = vunpack.c.l.bf16 %v4274_v37  ;;  %v4256_v56 = vunpack.c.h.bf16 %v4274_v37  ;;  %412 = vst.msk [vmem:[#allocation2 + $0xd8] sm:$0xff] %vm380_vm0, %v373_v45 }
  0x39   : > { %v5413_v39 = vpack.c.bf16 %v2152_v14, %v2118_v13  ;;  %6473 = vst [vmem:[#allocation6_spill] sm:$0xff] %v5417_v43  ;;  %v470_v58 = vrot.slane %v5166_v12, 7  ;;  %v2137_v59 = vsel %vm1068_vm1, %v1057_v20, %v1041_v18  ;;  %v305_v60 = vmul.f32 %v4251_v46, %v5158_v7  ;;  %v5470_v46 = vld [vmem:[%s6450_s2 + $0x70] sm:$0xff]  }
  0x3a   : > { %v306_v61 = vmul.f32 %v4252_v48, %v5158_v7  ;;  %v2090_v62 = vrot.slane %v5295_v52, 1  ;;  %v2106_v63 = vrot.slane %v5297_v53, 1  ;;  %v307_v2 = vmul.f32 %v4255_v55, %v5158_v7 }
  0x3b   : > { %v308_v13 = vmul.f32 %v4256_v56, %v5158_v7  ;;  %v1043_v14 = vrot.slane %v5325_v26, 1  ;;  %v1059_v21 = vrot.slane %v5327_v27, 1  ;;  %v5454_v22 = vpack.c.bf16 %v2156_v50, %v2120_v49 }
  0x3c   : > { %v5458_v32 = vld [vmem:[#allocation2 + $0xc8] sm:$0xff]  ;;  %v2121_v33 = vsel %vm1068_vm1, %v1041_v18, %v1057_v20  ;;  %v2158_v34 = vsel %vm1102_vm2, 0.0, %v2137_v59  ;;  %v342_v37 = vadd.f32 %v5175_v19, %v305_v60  ;;  %v343_v45 = vadd.f32 %v5175_v19, %v306_v61 }
  0x3d   : > { %4455 = vmatmul.mubr.msk.bf16.gmra.mrb[12].mxu1 %vm380_vm0, %v5339_v40  ;;  %6474 = vst [vmem:[#allocation7_spill] sm:$0xff] %v5454_v22  ;;  %v5474_v48 = vpack.c.bf16 %v5445_v1, %v5443_v0  ;;  %v345_v18 = vadd.f32 %v5175_v19, %v308_v13  ;;  %v5479_v20 = vsel %vm486_vm3, %v454_v38, %v470_v58  ;;  %v455_v13 = vrot.slane %v5214_v8, 7 }
  0x3e   : > { %4599 = vmatmul.mubr.msk.bf16.gmra.mrb[12].mxu0 %vm380_vm0, %v5357_v51  ;;  %4458 = vmatprep.mubr.msk.bf16.mxu1 %vm380_vm0, %v5357_v51  ;;  %v503_v49 = vsel %vm486_vm3, %v470_v58, %v454_v38  ;;  %v374_v55 = vmax.f32 %v342_v37, 0.0  ;;  %v375_v56 = vmax.f32 %v343_v45, 0.0  ;;  %v5487_v60 = vpack.c.bf16 %v2158_v34, %v2121_v33  ;;  %v5512_v34 = vld [vmem:[#allocation2 + $0xd0] sm:$0xff] }
  0x3f   : > { %4622 = vmatprep.mubr.msk.bf16.mxu0 %vm380_vm0, %v5359_v54  ;;  %v5456_v23 = vld [vmem:[#allocation2 + $0xc0] sm:$0xff]  ;;  %6475 = vst [vmem:[#allocation8_spill] sm:$0xff] %v5474_v48  ;;  %v377_v61 = vmax.f32 %v345_v18, 0.0  ;;  %v5496_v38 = vsel %vm519_vm4, 0.0, %v503_v49  ;;  %v471_v33 = vrot.slane %v5216_v9, 7  ;;  %v5514_v37 = vld [vmem:[#allocation2 + $0xd8] sm:$0xff]  ;;  %v2122_v8 = vsel %vm1068_vm1, %v2090_v62, %v2106_v63 }
  0x40   : > { %v5485_v50 = vpack.c.bf16 %v5458_v32, %v5456_v23  ;;  %6477 = vst [vmem:[#allocation10_spill] sm:$0xff] %v5487_v60  ;;  %413 = vst.msk [vmem:[#allocation2 + $0xe0] sm:$0xff] %vm380_vm0, %v374_v55  ;;  %v1442_v45 = vrot.slane %v5218_v10, 7  ;;  %v2092_v18 = vrot.slane %v5341_v41, 1  ;;  %v2108_v49 = vrot.slane %v5351_v47, 1 }
  0x41   : > { %414 = vst.msk [vmem:[#allocation2 + $0xe8] sm:$0xff] %vm380_vm0, %v375_v56  ;;  %416 = vst.msk [vmem:[#allocation2 + $0xf8] sm:$0xff] %vm380_vm0, %v377_v61  ;;  %v2123_v55 = vsel %vm1068_vm1, %v1043_v14, %v1059_v21  ;;  %v1061_v56 = vrot.slane %v5381_v4, 1  ;;  %v459_v40 = vrot.slane %v5271_v35, 7 }
  0x42   : > { %6476 = vst [vmem:[#allocation9_spill] sm:$0xff] %v5485_v50 }
  0x45   : > { %4459 = vmatmul.mubr.msk.bf16.gmra.mrb[16].mxu1 %vm380_vm0, %v5405_v31 }
  0x46   : > { %4623 = vmatmul.mubr.msk.bf16.vlgmr.msra.gmra.mrb[0].mxu0 %vm380_vm0, %v5413_v39  ;;  %4462 = vmatprep.mubr.msk.bf16.mxu1 %vm380_vm0, %v5417_v43 }
  0x47   : > { %4655 = vmatpush3.bf16.msra.mxu0 %v5256_v5  ;;  %4626 = vmatprep.mubr.msk.bf16.mxu0 %vm380_vm0, %v5419_v44  ;;  %v344_v5 = vadd.f32 %v5175_v19, %v307_v2  ;;  %v2138_v2 = vsel %vm1068_vm1, %v2106_v63, %v2090_v62  ;;  %v5534_v62 = vpack.c.bf16 %v5514_v37, %v5512_v34 }
  0x48   : > { %4656 = vmatprep.subr.bf16.mxu0 %v5041_v57  ;;  %v2160_v9 = vsel %vm1102_vm2, 0.0, %v2138_v2  ;;  %v504_v63 = vsel %vm486_vm3, %v471_v33, %v455_v13 }
  0x49   : > { %v376_v59 = vmax.f32 %v344_v5, 0.0  ;;  %v1458_v5 = vrot.slane %v5222_v16, 7  ;;  %v1045_v16 = vrot.slane %v5379_v3, 1  ;;  %6478 = vst [vmem:[#allocation11_spill] sm:$0xff] %v5534_v62  ;;  %v523_v43 = vsel %vm519_vm4, 0.0, %v504_v63 }
  0x4a   : > { %v1062_v63 = vrot.slane %v5392_v17, 1 }
  0x4b   : > { %4657 = vmatpush3.bf16.msra.mxu0 %v5041_v57  ;;  %415 = vst.msk [vmem:[#allocation2 + $0xf0] sm:$0xff] %vm380_vm0, %v376_v59  ;;  %v2139_v57 = vsel %vm1068_vm1, %v1059_v21, %v1043_v14  ;;  %v5538_v59 = vpack.c.bf16 %v2160_v9, %v2122_v8  ;;  %v1490_v61 = vsel %vm486_vm3, %v1458_v5, %v1442_v45  ;;  %v5542_v14 = vld [vmem:[#allocation2 + $0xe0] sm:$0xff]  ;;  %v5544_v21 = vld [vmem:[#allocation2 + $0xe8] sm:$0xff]  ;;  %v4275_v9 = vld [vmem:[%s5153_s6 + $0x78] sm:$0xff]  }
  0x4c   : > { %4690 = vmatprep.subr.bf16.mxu0 %v5470_v46  ;;  %v2162_v10 = vsel %vm1102_vm2, 0.0, %v2139_v57  ;;  %v2140_v8 = vsel %vm1068_vm1, %v2108_v49, %v2092_v18  ;;  %v5571_v57 = vsel %vm519_vm4, 0.0, %v1490_v61  ;;  %v4259_v58 = vunpack.c.l.bf16 %v4275_v9 }
  0x4d   : > { %4463 = vmatmul.mubr.msk.bf16.gmra.mrb[20].mxu1 %vm380_vm0, %v5474_v48  ;;  %6479 = vst [vmem:[#allocation12_spill] sm:$0xff] %v5538_v59  ;;  %v5546_v2 = vpack.c.bf16 %v2162_v10, %v2123_v55  ;;  %v488_v48 = vsel %vm486_vm3, %v455_v13, %v471_v33  ;;  %v5563_v55 = vsel %vm486_vm3, %v1442_v45, %v1458_v5  ;;  %v473_v13 = vrot.slane %v5244_v25, 7  ;;  %v5582_v5 = vld [vmem:[#allocation2 + $0xf8] sm:$0xff] }
  0x4e   : > { %4627 = vmatmul.mubr.msk.bf16.gmra.mrb[4].mxu0 %vm380_vm0, %v5454_v22  ;;  %4466 = vmatprep.mubr.msk.bf16.mxu1 %vm380_vm0, %v5485_v50  ;;  %v5552_v50 = vpack.c.bf16 %v5544_v21, %v5542_v14  ;;  %v2141_v10 = vsel %vm1068_vm1, %v1061_v56, %v1045_v16  ;;  %v1046_v33 = vrot.slane %v5390_v15, 1  ;;  %v2124_v25 = vsel %vm1068_vm1, %v2092_v18, %v2108_v49 }
  0x4f   : > { %4630 = vmatprep.mubr.msk.bf16.mxu0 %vm380_vm0, %v5487_v60  ;;  %6480 = vst [vmem:[#allocation13_spill] sm:$0xff] %v5546_v2  ;;  %v2164_v61 = vsel %vm1102_vm2, 0.0, %v2140_v8  ;;  %v2125_v31 = vsel %vm1068_vm1, %v1045_v16, %v1061_v56  ;;  %v2166_v51 = vsel %vm1102_vm2, 0.0, %v2141_v10  ;;  %v1063_v18 = vrot.slane %v5445_v1, 1 }
  0x50   : > { %6481 = vst [vmem:[#allocation14_spill] sm:$0xff] %v5552_v50  ;;  %v5607_v16 = vpack.c.bf16 %v2164_v61, %v2124_v25  ;;  %v5609_v56 = vpack.c.bf16 %v2166_v51, %v2125_v31  ;;  %v2142_v35 = vsel %vm1068_vm1, %v1062_v63, %v1046_v33  ;;  %v4260_v10 = vunpack.c.h.bf16 %v4275_v9 }
  0x51   : > { %v461_v60 = vrot.slane %v5325_v26, 7  ;;  %v1064_v8 = vrot.slane %v5458_v32, 1  ;;  %v6482_v61 = vpack.c.bf16 %v5479_v20, %v5496_v38  ;;  %v479_v20 = vrot.slane %v5381_v4, 7 }
  0x52   : > { %v5580_v45 = vld [vmem:[#allocation2 + $0xf0] sm:$0xff]  ;;  %v310_v31 = vmul.f32 %v4260_v10, %v5158_v7  ;;  %v1065_v10 = vrot.slane %v5514_v37, 1  ;;  %v5643_v38 = vpack.c.bf16 %v488_v48, %v523_v43  ;;  %v1050_v43 = vrot.slane %v5542_v14, 1 }
  0x53   : > { %v5602_v49 = vpack.c.bf16 %v5582_v5, %v5580_v45  ;;  %v1066_v48 = vrot.slane %v5544_v21, 1 }
  0x54   : > { %v347_v25 = vadd.f32 %v5175_v19, %v310_v31 }
  0x55   : > { %4467 = vmatmul.mubr.msk.bf16.gmra.mrb[24].mxu1 %vm380_vm0, %v5534_v62  ;;  %v1444_v62 = vrot.slane %v5249_v28, 7  ;;  %v475_v28 = vrot.slane %v5273_v36, 7  ;;  %v2126_v36 = vsel %vm1068_vm1, %v1046_v33, %v1062_v63 }
  0x56   : > { %4631 = vmatmul.mubr.msk.bf16.gmra.mrb[8].mxu0 %vm380_vm0, %v5538_v59  ;;  %4470 = vmatprep.mubr.msk.bf16.mxu1 %vm380_vm0, %v5552_v50  ;;  %v1460_v50 = vrot.slane %v5251_v29, 7  ;;  %v309_v59 = vmul.f32 %v4259_v58, %v5158_v7  ;;  %v1048_v29 = vrot.slane %v5456_v23, 1  ;;  %v2168_v7 = vsel %vm1102_vm2, 0.0, %v2142_v35 }
  0x57   : > { %4634 = vmatprep.mubr.msk.bf16.mxu0 %vm380_vm0, %v5546_v2  ;;  %v1047_v2 = vrot.slane %v5443_v0, 1  ;;  %v5649_v35 = vpack.c.bf16 %v2168_v7, %v2126_v36  ;;  %v379_v31 = vmax.f32 %v347_v25, 0.0  ;;  %v5666_v36 = vpack.c.bf16 %v5563_v55, %v5571_v57  ;;  %v5042_v55 = vld [vmem:[%s6450_s2 + $0x28] sm:$0xff]  }
  0x58   : > { %v346_v58 = vadd.f32 %v5175_v19, %v309_v59  ;;  %v1049_v59 = vrot.slane %v5512_v34, 1  ;;  %v2144_v19 = vsel %vm1068_vm1, %v1064_v8, %v1048_v29 }
  0x59   : > { %v2143_v51 = vsel %vm1068_vm1, %v1063_v18, %v1047_v2  ;;  %v2127_v33 = vsel %vm1068_vm1, %v1047_v2, %v1063_v18  ;;  %v507_v2 = vsel %vm486_vm3, %v1460_v50, %v1444_v62  ;;  %v508_v18 = vsel %vm486_vm3, %v475_v28, %v459_v40  ;;  %418 = vst.msk [vmem:[#allocation2 + $0x108] sm:$0xff] %vm380_vm0, %v379_v31 }
  0x5a   : > { %v378_v9 = vmax.f32 %v346_v58, 0.0  ;;  %v2170_v63 = vsel %vm1102_vm2, 0.0, %v2143_v51  ;;  %v2145_v25 = vsel %vm1068_vm1, %v1065_v10, %v1049_v59  ;;  %v2172_v57 = vsel %vm1102_vm2, 0.0, %v2144_v19 }
  0x5c   : > { %417 = vst.msk [vmem:[#allocation2 + $0x100] sm:$0xff] %vm380_vm0, %v378_v9  ;;  %v5672_v9 = vpack.c.bf16 %v2170_v63, %v2127_v33  ;;  %v2174_v33 = vsel %vm1102_vm2, 0.0, %v2145_v25  ;;  %v2146_v63 = vsel %vm1068_vm1, %v1066_v48, %v1050_v43 }
  0x5d   : > { %4471 = vmatmul.mubr.msk.bf16.gmra.mrb[28].mxu1 %vm380_vm0, %v5602_v49 }
  0x5e   : > { %4635 = vmatmul.mubr.msk.bf16.gmra.mrb[12].mxu0 %vm380_vm0, %v5607_v16  ;;  %4478 = vmatprep.mubr.msk.bf16.mxu1 %vm380_vm0, %v6482_v61  ;;  %v6483_v61 = vrot.slane %v5242_v24, 7  ;;  %v491_v24 = vsel %vm486_vm3, %v1444_v62, %v1460_v50  ;;  %v1067_v50 = vrot.slane %v5582_v5, 1  ;;  %v2129_v62 = vsel %vm1068_vm1, %v1049_v59, %v1065_v10  ;;  %v5719_v59 = vld [vmem:[%s6450_s2 + $0x30] sm:$0xff]  }
  0x5f   : > { %4638 = vmatprep.mubr.msk.bf16.mxu0 %vm380_vm0, %v5609_v56  ;;  %v5733_v25 = vpack.c.bf16 %v2174_v33, %v2129_v62 }
  0x60   : > { %v506_v22 = vsel %vm486_vm3, %v473_v13, %v6483_v61  ;;  %v6484_v51 = vmov %v6483_v61  ;;  %v2128_v61 = vsel %vm1068_vm1, %v1048_v29, %v1064_v8  ;;  %v492_v29 = vsel %vm486_vm3, %v459_v40, %v475_v28 }
  0x61   : > { %v490_v58 = vsel %vm486_vm3, %v6484_v51, %v473_v13  ;;  %v527_v7 = vsel %vm519_vm4, 0.0, %v506_v22  ;;  %v1051_v13 = vrot.slane %v5580_v45, 1  ;;  %v529_v22 = vsel %vm519_vm4, 0.0, %v507_v2 }
  0x62   : > { %v531_v8 = vsel %vm519_vm4, 0.0, %v508_v18  ;;  %v464_v40 = vrot.slane %v5390_v15, 7  ;;  %v480_v28 = vrot.slane %v5392_v17, 7  ;;  %v5721_v10 = vpack.c.bf16 %v2172_v57, %v2128_v61  ;;  %v5045_v15 = vld [vmem:[%s6450_s2 + $0x78] sm:$0xff]  }
  0x63   : > { %v5723_v31 = vpack.c.bf16 %v491_v24, %v529_v22  ;;  %v5725_v2 = vpack.c.bf16 %v492_v29, %v531_v8  ;;  %v6485_v18 = vrot.slane %v5295_v52, 7  ;;  %v6486_v51 = vrot.slane %v5297_v53, 7 }
  0x64   : > { %v2176_v61 = vsel %vm1102_vm2, 0.0, %v2146_v63  ;;  %v6489_v29 = vrot.slane %v5327_v27, 7  ;;  %v6491_v53 = vrot.slane %v5164_v11, 1  ;;  %v5800_v27 = vld [vmem:[#allocation2 + $0x100] sm:$0xff] }
  0x65   : > { %4479 = vmatmul.mubr.msk.bf16.vlgmr.msra.gmra.mrb[0].mxu1 %vm380_vm0, %v5643_v38  ;;  %v6487_v57 = vmov %v6486_v51  ;;  %v6488_v24 = vmov %v6485_v18 }
  0x66   : > { %4511 = vmatpush3.bf16.msra.mxu1 %v5261_v30  ;;  %4639 = vmatmul.mubr.msk.bf16.gmra.mrb[16].mxu0 %vm380_vm0, %v5649_v35  ;;  %v5712_v30 = vpack.c.bf16 %v490_v58, %v527_v7  ;;  %v509_v58 = vsel %vm486_vm3, %v6486_v51, %v6485_v18  ;;  %v2130_v7 = vsel %vm1068_vm1, %v1050_v43, %v1066_v48  ;;  %v6490_v48 = vrot.slane %v5166_v12, 1 }
  0x67   : > { %4482 = vmatprep.mubr.msk.bf16.mxu1 %vm380_vm0, %v5666_v36  ;;  %4642 = vmatprep.mubr.msk.bf16.mxu0 %vm380_vm0, %v5672_v9  ;;  %v493_v22 = vsel %vm486_vm3, %v6488_v24, %v6487_v57  ;;  %v510_v8 = vsel %vm486_vm3, %v6489_v29, %v461_v60  ;;  %v2147_v43 = vsel %vm1068_vm1, %v1067_v50, %v1051_v13  ;;  %v533_v18 = vsel %vm519_vm4, 0.0, %v509_v58  ;;  %v5775_v24 = vld [vmem:[#allocation2 + $0x20] sm:$0xff] }
  0x68   : > { %4512 = vmatprep.subr.bf16.mxu1 %v5042_v55  ;;  %v5759_v52 = vsel %vm1068_vm1, %v6491_v53, %v6490_v48  ;;  %v6492_v62 = vmov %v6491_v53  ;;  %v6493_v33 = vmov %v6490_v48  ;;  %v6495_v51 = vrot.slane %v5351_v47, 7  ;;  %v5790_v48 = vld [vmem:[#allocation2 + $0x28] sm:$0xff] }
  0x69   : > { %v1085_v63 = vsel %vm1068_vm1, %v6493_v33, %v6492_v62  ;;  %v6496_v12 = vmov %v6489_v29  ;;  %v2131_v29 = vsel %vm1068_vm1, %v1051_v13, %v1067_v50  ;;  %v535_v62 = vsel %vm519_vm4, 0.0, %v510_v8 }
  0x6a   : > { %4513 = vmatpush3.bf16.msra.mxu1 %v5042_v55  ;;  %v6494_v55 = vrot.slane %v5341_v41, 7  ;;  %v5779_v11 = vsel %vm1102_vm2, 0.0, %v1085_v63  ;;  %v494_v58 = vsel %vm486_vm3, %v461_v60, %v6496_v12  ;;  %v2178_v26 = vsel %vm1102_vm2, 0.0, %v2147_v43  ;;  %v5802_v60 = vld [vmem:[#allocation2 + $0x108] sm:$0xff] }
  0x6b   : > { %4546 = vmatprep.subr.bf16.mxu1 %v5719_v59  ;;  %v6497_v13 = vmov %v6495_v51  ;;  %v2488_v43 = vrot.slane %v5775_v24, 7  ;;  %v2504_v47 = vrot.slane %v5790_v48, 7  ;;  %v2100_v41 = vrot.slane %v5800_v27, 1 }
  0x6c   : > { %v511_v57 = vsel %vm486_vm3, %v6495_v51, %v6494_v55  ;;  %v6498_v50 = vmov %v6494_v55  ;;  %v2116_v63 = vrot.slane %v5802_v60, 1  ;;  %v5822_v55 = vpack.c.bf16 %v2176_v61, %v2130_v7 }
  0x6d   : > { %4483 = vmatmul.mubr.msk.bf16.gmra.mrb[4].mxu1 %vm380_vm0, %v5712_v30  ;;  %v495_v33 = vsel %vm486_vm3, %v6498_v50, %v6497_v13  ;;  %v537_v8 = vsel %vm519_vm4, 0.0, %v511_v57  ;;  %v5824_v51 = vpack.c.bf16 %v493_v22, %v533_v18  ;;  %v5826_v12 = vpack.c.bf16 %v494_v58, %v535_v62 }
  0x6e   : > { %4643 = vmatmul.mubr.msk.bf16.gmra.mrb[20].mxu0 %vm380_vm0, %v5721_v10  ;;  %4486 = vmatprep.mubr.msk.bf16.mxu1 %vm380_vm0, %v5723_v31  ;;  %v6499_v13 = vrot.slane %v5379_v3, 7  ;;  %v5834_v50 = vpack.c.bf16 %v2178_v26, %v2131_v29  ;;  %v5836_v53 = vpack.c.bf16 %v495_v33, %v537_v8  ;;  %v2536_v19 = vsel %vm486_vm3, %v2504_v47, %v2488_v43 }
  0x6f   : > { %4646 = vmatprep.mubr.msk.bf16.mxu0 %vm380_vm0, %v5733_v25  ;;  %v2148_v7 = vsel %vm1068_vm1, %v2116_v63, %v2100_v41  ;;  %v2858_v18 = vpack.c.bf16 %v5790_v48, %v5775_v24  ;;  %v2520_v29 = vsel %vm486_vm3, %v2488_v43, %v2504_v47  ;;  %v2552_v3 = vsel %vm519_vm4, 0.0, %v2536_v19 }
  0x70   : > { %v512_v57 = vsel %vm486_vm3, %v479_v20, %v6499_v13  ;;  %v6500_v61 = vmov %v6499_v13  ;;  %v2132_v4 = vsel %vm1068_vm1, %v2100_v41, %v2116_v63  ;;  %v2584_v62 = vpack.c.bf16 %v2520_v29, %v2552_v3 }
  0x71   : > { %v496_v22 = vsel %vm486_vm3, %v6500_v61, %v479_v20  ;;  %v539_v58 = vsel %vm519_vm4, 0.0, %v512_v57  ;;  %v2180_v20 = vsel %vm1102_vm2, 0.0, %v2148_v7  ;;  %v481_v33 = vrot.slane %v5445_v1, 7 }
  0x72   : > { %v5868_v26 = vpack.c.bf16 %v2180_v20, %v2132_v4  ;;  %v513_v19 = vsel %vm486_vm3, %v480_v28, %v464_v40  ;;  %v466_v8 = vrot.slane %v5456_v23, 7  ;;  %v482_v43 = vrot.slane %v5458_v32, 7 }
  0x73   : > { %v5885_v1 = vpack.c.bf16 %v496_v22, %v539_v58  ;;  %v497_v23 = vsel %vm486_vm3, %v464_v40, %v480_v28  ;;  %v541_v32 = vsel %vm519_vm4, 0.0, %v513_v19  ;;  %v6501_v41 = vrot.slane %v5443_v0, 7 }
  0x74   : > { %v5896_v47 = vpack.c.bf16 %v497_v23, %v541_v32  ;;  %v515_v17 = vsel %vm486_vm3, %v482_v43, %v466_v8  ;;  %v3132_v40 = vrot.slane %v5775_v24, 1  ;;  %v3148_v28 = vrot.slane %v5790_v48, 1  ;;  %v6083_v24 = vld [vmem:[#allocation2 + $0x58] sm:$0xff] }
  0x75   : > { %4487 = vmatmul.mubr.msk.bf16.gmra.mrb[8].mxu1 %vm380_vm0, %v5725_v2  ;;  %v514_v63 = vsel %vm486_vm3, %v481_v33, %v6501_v41  ;;  %v467_v13 = vrot.slane %v5512_v34, 7  ;;  %v483_v57 = vrot.slane %v5514_v37, 7  ;;  %v6502_v7 = vmov %v6501_v41 }
  0x76   : > { %4647 = vmatmul.mubr.msk.bf16.gmra.mrb[24].mxu0 %vm380_vm0, %v5822_v55  ;;  %4490 = vmatprep.mubr.msk.bf16.mxu1 %vm380_vm0, %v5824_v51  ;;  %v498_v61 = vsel %vm486_vm3, %v6502_v7, %v481_v33  ;;  %v543_v22 = vsel %vm519_vm4, 0.0, %v514_v63  ;;  %v5925_v34 = vsel %vm1068_vm1, %v3132_v40, %v3148_v28  ;;  %v468_v37 = vrot.slane %v5542_v14, 7  ;;  %v5941_v14 = vld [vmem:[%s6450_s2 + $0x80] sm:$0xff]  }
  0x77   : > { %4650 = vmatprep.mubr.msk.bf16.mxu0 %vm380_vm0, %v5834_v50  ;;  %v499_v0 = vsel %vm486_vm3, %v466_v8, %v482_v43  ;;  %v545_v58 = vsel %vm519_vm4, 0.0, %v515_v17  ;;  %v3180_v29 = vsel %vm1068_vm1, %v3148_v28, %v3132_v40  ;;  %v484_v3 = vrot.slane %v5544_v21, 7  ;;  %v6504_v7 = vld [vmem:[#allocation7_spill] sm:$0xff] }
  0x78   : > { %v5947_v4 = vpack.c.bf16 %v498_v61, %v543_v22  ;;  %v516_v21 = vsel %vm486_vm3, %v483_v57, %v467_v13  ;;  %v500_v19 = vsel %vm486_vm3, %v467_v13, %v483_v57  ;;  %v469_v43 = vrot.slane %v5580_v45, 7  ;;  %v5046_v13 = vld [vmem:[%s6450_s2 + $0x38] sm:$0xff]  }
  0x79   : > { %v517_v33 = vsel %vm486_vm3, %v484_v3, %v468_v37  ;;  %v547_v8 = vsel %vm519_vm4, 0.0, %v516_v21  ;;  %v485_v23 = vrot.slane %v5582_v5, 7  ;;  %v501_v32 = vsel %vm486_vm3, %v468_v37, %v484_v3  ;;  %v6029_v57 = vld [vmem:[#allocation2 + $0x118] sm:$0xff]  ;;  %v6506_v3 = vld [vmem:[#allocation12_spill] sm:$0xff] }
  0x7a   : > { %v549_v41 = vsel %vm519_vm4, 0.0, %v517_v33  ;;  %v5976_v63 = vpack.c.bf16 %v500_v19, %v547_v8  ;;  %v6503_v28 = vpack.c.bf16 %v5779_v11, %v5759_v52  ;;  %v2502_v52 = vrot.slane %v5800_v27, 7  ;;  %v6507_v8 = vld [vmem:[#allocation13_spill] sm:$0xff] }
  0x7b   : > { %v5978_v17 = vpack.c.bf16 %v501_v32, %v549_v41  ;;  %v502_v45 = vsel %vm486_vm3, %v469_v43, %v485_v23  ;;  %v2518_v11 = vrot.slane %v5802_v60, 7  ;;  %v2519_v37 = vrot.slane %v6029_v57, 7  ;;  %v6068_v41 = vld [vmem:[#allocation2 + $0x40] sm:$0xff] }
  0x7d   : > { %4491 = vmatmul.mubr.msk.bf16.gmra.mrb[12].mxu1 %vm380_vm0, %v5826_v12  ;;  %v2534_v61 = vsel %vm486_vm3, %v2502_v52, %v2518_v11 }
  0x7e   : > { %4651 = vmatmul.mubr.msk.bf16.gmra.mrb[28].mxu0 %vm380_vm0, %v5868_v26  ;;  %4494 = vmatprep.mubr.msk.bf16.mxu1 %vm380_vm0, %v5836_v53 }
  0x7f   : > { %4658 = vmatprep.mubr.msk.bf16.mxu0 %vm380_vm0, %v2584_v62  ;;  %v5951_v62 = vpack.c.bf16 %v499_v0, %v545_v58 }
  0x85   : > { %4495 = vmatmul.mubr.msk.bf16.gmra.mrb[16].mxu1 %vm380_vm0, %v5885_v1 }
  0x86   : > { %4659 = vmatmul.mubr.msk.bf16.vlgmr.msra.gmra.mrb[0].mxu0 %vm380_vm0, %v5712_v30  ;;  %4498 = vmatprep.mubr.msk.bf16.mxu1 %vm380_vm0, %v5896_v47 }
  0x87   : > { %4691 = vmatpush3.bf16.msra.mxu0 %v5470_v46  ;;  %4662 = vmatprep.mubr.msk.bf16.mxu0 %vm380_vm0, %v5723_v31  ;;  %v5945_v46 = vsel %vm1102_vm2, 0.0, %v3180_v29  ;;  %v6505_v29 = vld [vmem:[#allocation10_spill] sm:$0xff] }
  0x88   : > { %4692 = vmatprep.subr.bf16.mxu0 %v5045_v15  ;;  %v3228_v20 = vpack.c.bf16 %v5945_v46, %v5925_v34 }
  0x8b   : > { %4693 = vmatpush3.bf16.msra.mxu0 %v5045_v15  ;;  %v518_v15 = vsel %vm486_vm3, %v485_v23, %v469_v43  ;;  %v5050_v43 = vld [vmem:[#allocation2 + $0x30] sm:$0xff]  ;;  %v5051_v23 = vld [vmem:[#allocation2 + $0x38] sm:$0xff] }
  0x8c   : > { %4726 = vmatprep.subr.bf16.mxu0 %v5941_v14  ;;  %v551_v5 = vsel %vm519_vm4, 0.0, %v518_v15  ;;  %v2859_v32 = vpack.c.bf16 %v5051_v23, %v5050_v43  ;;  %v5053_v15 = vld [vmem:[#allocation2 + $0x48] sm:$0xff] }
  0x8d   : > { %4499 = vmatmul.mubr.msk.bf16.gmra.mrb[20].mxu1 %vm380_vm0, %v5947_v4  ;;  %v5994_v40 = vpack.c.bf16 %v502_v45, %v551_v5  ;;  %v2860_v45 = vpack.c.bf16 %v5053_v15, %v6068_v41  ;;  %v5048_v5 = vld [vmem:[%s6450_s2 + $0x88] sm:$0xff]  }
  0x8e   : > { %4663 = vmatmul.mubr.msk.bf16.gmra.mrb[4].mxu0 %vm380_vm0, %v5725_v2  ;;  %4502 = vmatprep.mubr.msk.bf16.mxu1 %vm380_vm0, %v5951_v62 }
  0x8f   : > { %4666 = vmatprep.mubr.msk.bf16.mxu0 %vm380_vm0, %v5824_v51 }
  0x95   : > { %4503 = vmatmul.mubr.msk.bf16.gmra.mrb[24].mxu1 %vm380_vm0, %v5976_v63 }
  0x96   : > { %4667 = vmatmul.mubr.msk.bf16.gmra.mrb[8].mxu0 %vm380_vm0, %v5826_v12  ;;  %4506 = vmatprep.mubr.msk.bf16.mxu1 %vm380_vm0, %v5978_v17 }
  0x97   : > { %4670 = vmatprep.mubr.msk.bf16.mxu0 %vm380_vm0, %v5836_v53 }
  0x9d   : > { %4507 = vmatmul.mubr.msk.bf16.gmra.mrb[28].mxu1 %vm380_vm0, %v5994_v40 }
  0x9e   : > { %4671 = vmatmul.mubr.msk.bf16.gmra.mrb[12].mxu0 %vm380_vm0, %v5885_v1  ;;  %4514 = vmatprep.mubr.msk.bf16.mxu1 %vm380_vm0, %v6503_v28 }
  0x9f   : > { %4674 = vmatprep.mubr.msk.bf16.mxu0 %vm380_vm0, %v5896_v47 }
  0xa5   : > { %4515 = vmatmul.mubr.msk.bf16.vlgmr.msra.gmra.mrb[0].mxu1 %vm380_vm0, %v5359_v54  ;;  %v5049_v54 = vld [vmem:[%s6450_s2 + $0x40] sm:$0xff]  }
  0xa6   : > { %4547 = vmatpush3.bf16.msra.mxu1 %v5719_v59  ;;  %4675 = vmatmul.mubr.msk.bf16.gmra.mrb[16].mxu0 %vm380_vm0, %v5947_v4  ;;  %v6027_v59 = vld [vmem:[#allocation2 + $0x110] sm:$0xff] }
  0xa7   : > { %4518 = vmatprep.mubr.msk.bf16.mxu1 %vm380_vm0, %v5413_v39  ;;  %4678 = vmatprep.mubr.msk.bf16.mxu0 %vm380_vm0, %v5951_v62  ;;  %v2550_v39 = vsel %vm486_vm3, %v2518_v11, %v2502_v52  ;;  %v2503_v22 = vrot.slane %v6027_v59, 7  ;;  %v6515_v52 = vld [vmem:[#allocation14_spill] sm:$0xff]  ;;  %v3134_v11 = vrot.slane %v6068_v41, 1 }
  0xa8   : > { %4548 = vmatprep.subr.bf16.mxu1 %v5046_v13 }
  0xa9   : > { %v2551_v58 = vsel %vm486_vm3, %v2519_v37, %v2503_v22  ;;  %v2535_v21 = vsel %vm486_vm3, %v2503_v22, %v2519_v37 }
  0xaa   : > { %4549 = vmatpush3.bf16.msra.mxu1 %v5046_v13  ;;  %v2582_v33 = vsel %vm519_vm4, 0.0, %v2551_v58  ;;  %v6513_v13 = vld [vmem:[#allocation9_spill] sm:$0xff] }
  0xab   : > { %4762 = vmatprep.subr.bf16.mxu1 %v5049_v54  ;;  %v2599_v19 = vpack.c.bf16 %v2535_v21, %v2582_v33  ;;  %v5060_v21 = vld [vmem:[#allocation2 + $0x78] sm:$0xff] }
  0xad   : > { %4519 = vmatmul.mubr.msk.bf16.gmra.mrb[4].mxu1 %vm380_vm0, %v5419_v44  ;;  %v2580_v44 = vsel %vm519_vm4, 0.0, %v2550_v39  ;;  %v3151_v39 = vrot.slane %v6083_v24, 1 }
  0xae   : > { %4679 = vmatmul.mubr.msk.bf16.gmra.mrb[20].mxu0 %vm380_vm0, %v5976_v63  ;;  %4522 = vmatprep.mubr.msk.bf16.mxu1 %vm380_vm0, %v6504_v7  ;;  %v6043_v0 = vpack.c.bf16 %v2534_v61, %v2580_v44 }
  0xaf   : > { %4682 = vmatprep.mubr.msk.bf16.mxu0 %vm380_vm0, %v5978_v17 }
  0xb5   : > { %4523 = vmatmul.mubr.msk.bf16.gmra.mrb[8].mxu1 %vm380_vm0, %v6505_v29  ;;  %v5059_v29 = vld [vmem:[#allocation2 + $0x70] sm:$0xff] }
  0xb6   : > { %4683 = vmatmul.mubr.msk.bf16.gmra.mrb[24].mxu0 %vm380_vm0, %v5994_v40  ;;  %4526 = vmatprep.mubr.msk.bf16.mxu1 %vm380_vm0, %v6506_v3  ;;  %v3137_v3 = vrot.slane %v5059_v29, 1 }
  0xb7   : > { %4686 = vmatprep.mubr.msk.bf16.mxu0 %vm380_vm0, %v6043_v0 }
  0xbd   : > { %4527 = vmatmul.mubr.msk.bf16.gmra.mrb[12].mxu1 %vm380_vm0, %v6507_v8  ;;  %v5061_v8 = vld [vmem:[#allocation2 + $0x80] sm:$0xff] }
  0xbe   : > { %4687 = vmatmul.mubr.msk.bf16.gmra.mrb[28].mxu0 %vm380_vm0, %v2599_v19  ;;  %4530 = vmatprep.mubr.msk.bf16.mxu1 %vm380_vm0, %v5607_v16  ;;  %v6081_v16 = vld [vmem:[#allocation2 + $0x50] sm:$0xff] }
  0xbf   : > { %4694 = vmatprep.mubr.msk.bf16.mxu0 %vm380_vm0, %v2858_v18  ;;  %v2861_v48 = vpack.c.bf16 %v6083_v24, %v6081_v16  ;;  %v6087_v18 = vld [vmem:[#allocation2 + $0x60] sm:$0xff] }
  0xc0   : > { %v3136_v61 = vrot.slane %v6087_v18, 1 }
  0xc5   : > { %4531 = vmatmul.mubr.msk.bf16.gmra.mrb[16].mxu1 %vm380_vm0, %v5609_v56  ;;  %v6089_v56 = vld [vmem:[#allocation2 + $0x68] sm:$0xff] }
  0xc6   : > { %4695 = vmatmul.mubr.msk.bf16.vlgmr.msra.gmra.mrb[0].mxu0 %vm380_vm0, %v2859_v32  ;;  %4534 = vmatprep.mubr.msk.bf16.mxu1 %vm380_vm0, %v5649_v35  ;;  %v2862_v28 = vpack.c.bf16 %v6089_v56, %v6087_v18  ;;  %v6508_v35 = vld [vmem:[#allocation3_spill] sm:$0xff]  ;;  %v3152_v44 = vrot.slane %v6089_v56, 1  ;;  %v5064_v56 = vld [vmem:[#allocation2 + $0x98] sm:$0xff] }
  0xc7   : > { %4727 = vmatpush3.bf16.msra.mxu0 %v5941_v14  ;;  %4698 = vmatprep.mubr.msk.bf16.mxu0 %vm380_vm0, %v2860_v45  ;;  %v6509_v14 = vld [vmem:[#allocation4_spill] sm:$0xff] }
  0xc8   : > { %4728 = vmatprep.subr.bf16.mxu0 %v5048_v5  ;;  %v3184_v46 = vsel %vm1068_vm1, %v3152_v44, %v3136_v61  ;;  %v3168_v33 = vsel %vm1068_vm1, %v3136_v61, %v3152_v44 }
  0xc9   : > { %v3205_v19 = vsel %vm1102_vm2, 0.0, %v3184_v46 }
  0xca   : > { %v3232_v41 = vpack.c.bf16 %v3205_v19, %v3168_v33 }
  0xcb   : > { %4729 = vmatpush3.bf16.msra.mxu0 %v5048_v5 }
  0xcd   : > { %4535 = vmatmul.mubr.msk.bf16.gmra.mrb[20].mxu1 %vm380_vm0, %v5672_v9  ;;  %v6510_v9 = vld [vmem:[#allocation5_spill] sm:$0xff] }
  0xce   : > { %4699 = vmatmul.mubr.msk.bf16.gmra.mrb[4].mxu0 %vm380_vm0, %v2861_v48  ;;  %4538 = vmatprep.mubr.msk.bf16.mxu1 %vm380_vm0, %v5721_v10  ;;  %v6511_v10 = vld [vmem:[#allocation6_spill] sm:$0xff]  ;;  %v5063_v48 = vld [vmem:[#allocation2 + $0x90] sm:$0xff] }
  0xcf   : > { %4702 = vmatprep.mubr.msk.bf16.mxu0 %vm380_vm0, %v2862_v28  ;;  %v3139_v18 = vrot.slane %v5063_v48, 1  ;;  %v3155_v28 = vrot.slane %v5064_v56, 1 }
  0xd5   : > { %4539 = vmatmul.mubr.msk.bf16.gmra.mrb[24].mxu1 %vm380_vm0, %v5733_v25  ;;  %v6512_v25 = vld [vmem:[#allocation8_spill] sm:$0xff] }
  0xd6   : > { %4703 = vmatmul.mubr.msk.bf16.gmra.mrb[8].mxu0 %vm380_vm0, %v6508_v35  ;;  %4542 = vmatprep.mubr.msk.bf16.mxu1 %vm380_vm0, %v5822_v55  ;;  %v5065_v35 = vld [vmem:[#allocation2 + $0xa0] sm:$0xff] }
  0xd7   : > { %4706 = vmatprep.mubr.msk.bf16.mxu0 %vm380_vm0, %v6509_v14  ;;  %v5066_v14 = vld [vmem:[#allocation2 + $0xa8] sm:$0xff] }
  0xdd   : > { %4543 = vmatmul.mubr.msk.bf16.gmra.mrb[28].mxu1 %vm380_vm0, %v5834_v50 }
  0xde   : > { %4707 = vmatmul.mubr.msk.bf16.gmra.mrb[12].mxu0 %vm380_vm0, %v6510_v9  ;;  %4550 = vmatprep.mubr.msk.bf16.mxu1 %vm380_vm0, %v5643_v38  ;;  %v5058_v38 = vld [vmem:[%s6450_s2 + $0x48] sm:$0xff]  }
  0xdf   : > { %4710 = vmatprep.mubr.msk.bf16.mxu0 %vm380_vm0, %v6511_v10 }
  0xe5   : > { %4551 = vmatmul.mubr.msk.bf16.vlgmr.msra.gmra.mrb[0].mxu1 %vm380_vm0, %v5666_v36  ;;  %v6514_v36 = vld [vmem:[#allocation11_spill] sm:$0xff] }
  0xe6   : > { %4764 = vmatpush3.bf16.msra.mxu1 %v5049_v54  ;;  %4711 = vmatmul.mubr.msk.bf16.gmra.mrb[16].mxu0 %vm380_vm0, %v6512_v25  ;;  %v3150_v54 = vrot.slane %v5053_v15, 1 }
  0xe7   : > { %4554 = vmatprep.mubr.msk.bf16.mxu1 %vm380_vm0, %v5712_v30  ;;  %4714 = vmatprep.mubr.msk.bf16.mxu0 %vm380_vm0, %v6513_v13  ;;  %v6136_v30 = vpack.c.bf16 %v5802_v60, %v5800_v27  ;;  %v2873_v27 = vpack.c.bf16 %v6029_v57, %v6027_v59 }
  0xe8   : > { %4763 = vmatprep.subr.bf16.mxu1 %v5058_v38  ;;  %v3166_v7 = vsel %vm1068_vm1, %v3134_v11, %v3150_v54 }
  0xea   : > { %4765 = vmatpush3.bf16.msra.mxu1 %v5058_v38  ;;  %v3156_v38 = vrot.slane %v5066_v14, 1 }
  0xed   : > { %4555 = vmatmul.mubr.msk.bf16.gmra.mrb[4].mxu1 %vm380_vm0, %v5723_v31  ;;  %v3133_v31 = vrot.slane %v5050_v43, 1  ;;  %v5062_v43 = vld [vmem:[#allocation2 + $0x88] sm:$0xff] }
  0xee   : > { %4715 = vmatmul.mubr.msk.bf16.gmra.mrb[20].mxu0 %vm380_vm0, %v6514_v36  ;;  %4558 = vmatprep.mubr.msk.bf16.mxu1 %vm380_vm0, %v5725_v2  ;;  %v3149_v2 = vrot.slane %v5051_v23, 1  ;;  %v3154_v23 = vrot.slane %v5062_v43, 1  ;;  %v5073_v43 = vld [vmem:[#allocation2 + $0xe0] sm:$0xff] }
  0xef   : > { %4718 = vmatprep.mubr.msk.bf16.mxu0 %vm380_vm0, %v6515_v52 }
  0xf0   : > { %v3181_v60 = vsel %vm1068_vm1, %v3149_v2, %v3133_v31 }
  0xf5   : > { %4559 = vmatmul.mubr.msk.bf16.gmra.mrb[8].mxu1 %vm380_vm0, %v5824_v51  ;;  %v3165_v51 = vsel %vm1068_vm1, %v3133_v31, %v3149_v2  ;;  %v3187_v2 = vsel %vm1068_vm1, %v3155_v28, %v3139_v18 }
  0xf6   : > { %4719 = vmatmul.mubr.msk.bf16.gmra.mrb[24].mxu0 %vm380_vm0, %v5602_v49  ;;  %4562 = vmatprep.mubr.msk.bf16.mxu1 %vm380_vm0, %v5826_v12  ;;  %v3182_v49 = vsel %vm1068_vm1, %v3150_v54, %v3134_v11  ;;  %v3199_v12 = vsel %vm1102_vm2, 0.0, %v3181_v60  ;;  %v3171_v54 = vsel %vm1068_vm1, %v3139_v18, %v3155_v28 }
  0xf7   : > { %4722 = vmatprep.mubr.msk.bf16.mxu0 %vm380_vm0, %v6136_v30  ;;  %v3229_v22 = vpack.c.bf16 %v3199_v12, %v3165_v51  ;;  %v5068_v12 = vld [vmem:[#allocation2 + $0xb8] sm:$0xff] }
  0xfd   : > { %4563 = vmatmul.mubr.msk.bf16.gmra.mrb[12].mxu1 %vm380_vm0, %v5836_v53  ;;  %v3135_v53 = vrot.slane %v6081_v16, 1 }
  0xfe   : > { %4723 = vmatmul.mubr.msk.bf16.gmra.mrb[28].mxu0 %vm380_vm0, %v2873_v27  ;;  %4566 = vmatprep.mubr.msk.bf16.mxu1 %vm380_vm0, %v5885_v1  ;;  %v3201_v1 = vsel %vm1102_vm2, 0.0, %v3182_v49  ;;  %v3211_v27 = vsel %vm1102_vm2, 0.0, %v3187_v2  ;;  %v5067_v49 = vld [vmem:[#allocation2 + $0xb0] sm:$0xff] }
  0xff   : > { %4730 = vmatprep.mubr.msk.bf16.mxu0 %vm380_vm0, %v3228_v20  ;;  %v3230_v37 = vpack.c.bf16 %v3201_v1, %v3166_v7  ;;  %v3183_v34 = vsel %vm1068_vm1, %v3151_v39, %v3135_v53  ;;  %v3167_v20 = vsel %vm1068_vm1, %v3135_v53, %v3151_v39  ;;  %v3141_v51 = vrot.slane %v5067_v49, 1  ;;  %v5069_v39 = vld [vmem:[#allocation2 + $0xc0] sm:$0xff]  ;;  %v5070_v7 = vld [vmem:[#allocation2 + $0xc8] sm:$0xff] }
 0x100   : > { %v3203_v58 = vsel %vm1102_vm2, 0.0, %v3183_v34  ;;  %v3157_v53 = vrot.slane %v5068_v12, 1  ;;  %v3158_v1 = vrot.slane %v5070_v7, 1  ;;  %v3235_v61 = vpack.c.bf16 %v3211_v27, %v3171_v54 }
 0x101   : > { %v3231_v32 = vpack.c.bf16 %v3203_v58, %v3167_v20  ;;  %v5071_v58 = vld [vmem:[#allocation2 + $0xd0] sm:$0xff] }
 0x102   : > { %v3173_v34 = vsel %vm1068_vm1, %v3141_v51, %v3157_v53  ;;  %v3143_v29 = vrot.slane %v5071_v58, 1 }
 0x105   : > { %4567 = vmatmul.mubr.msk.bf16.gmra.mrb[16].mxu1 %vm380_vm0, %v5896_v47  ;;  %v3153_v47 = vrot.slane %v5060_v21, 1 }
 0x106   : > { %4731 = vmatmul.mubr.msk.bf16.vlgmr.msra.gmra.mrb[0].mxu0 %vm380_vm0, %v3229_v22  ;;  %4570 = vmatprep.mubr.msk.bf16.mxu1 %vm380_vm0, %v5947_v4  ;;  %v3138_v4 = vrot.slane %v5061_v8, 1  ;;  %v3189_v22 = vsel %vm1068_vm1, %v3157_v53, %v3141_v51 }
 0x107   : > { %4734 = vmatprep.mubr.msk.bf16.mxu0 %vm380_vm0, %v3230_v37  ;;  %v3185_v15 = vsel %vm1068_vm1, %v3153_v47, %v3137_v3  ;;  %v3169_v5 = vsel %vm1068_vm1, %v3137_v3, %v3153_v47  ;;  %v3215_v46 = vsel %vm1102_vm2, 0.0, %v3189_v22  ;;  %v5072_v3 = vld [vmem:[#allocation2 + $0xd8] sm:$0xff] }
 0x108   : > { %v3186_v45 = vsel %vm1068_vm1, %v3154_v23, %v3138_v4  ;;  %v3207_v16 = vsel %vm1102_vm2, 0.0, %v3185_v15  ;;  %v3170_v24 = vsel %vm1068_vm1, %v3138_v4, %v3154_v23  ;;  %v3159_v21 = vrot.slane %v5072_v3, 1  ;;  %v5074_v23 = vld [vmem:[#allocation2 + $0xe8] sm:$0xff]  ;;  %v5076_v15 = vld [vmem:[#allocation2 + $0xf8] sm:$0xff] }
 0x109   : > { %v3233_v52 = vpack.c.bf16 %v3207_v16, %v3169_v5  ;;  %v3237_v47 = vpack.c.bf16 %v3215_v46, %v3173_v34 }
 0x10a   : > { %v3191_v33 = vsel %vm1068_vm1, %v3159_v21, %v3143_v29  ;;  %v3175_v19 = vsel %vm1068_vm1, %v3143_v29, %v3159_v21 }
 0x10b   : > { %v3219_v8 = vsel %vm1102_vm2, 0.0, %v3191_v33 }
 0x10c   : > { %v3239_v4 = vpack.c.bf16 %v3219_v8, %v3175_v19 }
 0x10d   : > { %4571 = vmatmul.mubr.msk.bf16.gmra.mrb[20].mxu1 %vm380_vm0, %v5951_v62  ;;  %v3209_v62 = vsel %vm1102_vm2, 0.0, %v3186_v45 }
 0x10e   : > { %4735 = vmatmul.mubr.msk.bf16.gmra.mrb[4].mxu0 %vm380_vm0, %v3231_v32  ;;  %4574 = vmatprep.mubr.msk.bf16.mxu1 %vm380_vm0, %v5976_v63  ;;  %v3140_v63 = vrot.slane %v5065_v35, 1  ;;  %v3234_v31 = vpack.c.bf16 %v3209_v62, %v3170_v24  ;;  %v1824_v32 = vpack.c.bf16 %v5074_v23, %v5073_v43 }
 0x10f   : > { %4738 = vmatprep.mubr.msk.bf16.mxu0 %vm380_vm0, %v3232_v41  ;;  %v5075_v41 = vld [vmem:[#allocation2 + $0xf0] sm:$0xff] }
 0x110   : > { %v3188_v11 = vsel %vm1068_vm1, %v3156_v38, %v3140_v63  ;;  %v3172_v60 = vsel %vm1068_vm1, %v3140_v63, %v3156_v38  ;;  %v1825_v45 = vpack.c.bf16 %v5076_v15, %v5075_v41 }
 0x115   : > { %4575 = vmatmul.mubr.msk.bf16.gmra.mrb[24].mxu1 %vm380_vm0, %v5978_v17  ;;  %v3213_v17 = vsel %vm1102_vm2, 0.0, %v3188_v11 }
 0x116   : > { %4739 = vmatmul.mubr.msk.bf16.gmra.mrb[8].mxu0 %vm380_vm0, %v3233_v52  ;;  %4578 = vmatprep.mubr.msk.bf16.mxu1 %vm380_vm0, %v5994_v40  ;;  %v3142_v40 = vrot.slane %v5069_v39, 1  ;;  %v3236_v44 = vpack.c.bf16 %v3213_v17, %v3172_v60 }
 0x117   : > { %4742 = vmatprep.mubr.msk.bf16.mxu0 %vm380_vm0, %v3234_v31 }
 0x118   : > { %v3190_v37 = vsel %vm1068_vm1, %v3158_v1, %v3142_v40  ;;  %v3174_v20 = vsel %vm1068_vm1, %v3142_v40, %v3158_v1 }
 0x11d   : > { %4579 = vmatmul.mubr.msk.bf16.gmra.mrb[28].mxu1 %vm380_vm0, %v6043_v0  ;;  %v3217_v0 = vsel %vm1102_vm2, 0.0, %v3190_v37 }
 0x11e   : > { %4743 = vmatmul.mubr.msk.bf16.gmra.mrb[12].mxu0 %vm380_vm0, %v3235_v61  ;;  %4602 = vmatprep.mubr.msk.bf16.mxu1 %vm380_vm0, %v6510_v9  ;;  %v3238_v9 = vpack.c.bf16 %v3217_v0, %v3174_v20 }
 0x11f   : > { %4746 = vmatprep.mubr.msk.bf16.mxu0 %vm380_vm0, %v3236_v44 }
 0x125   : > { %4603 = vmatmul.mubr.msk.bf16.vlgmr.msra.gmra.mrb[16].mxu1 %vm380_vm0, %v6511_v10  ;;  %v3147_v10 = vrot.slane %v6027_v59, 1 }
 0x126   : > { %4747 = vmatmul.mubr.msk.bf16.gmra.mrb[16].mxu0 %vm380_vm0, %v3237_v47  ;;  %4606 = vmatprep.mubr.msk.bf16.mxu1 %vm380_vm0, %v6512_v25  ;;  %v3163_v25 = vrot.slane %v6029_v57, 1 }
 0x127   : > { %4750 = vmatprep.mubr.msk.bf16.mxu0 %vm380_vm0, %v3238_v9 }
 0x12d   : > { %4607 = vmatmul.mubr.msk.bf16.gmra.mrb[20].mxu1 %vm380_vm0, %v6513_v13  ;;  %v3195_v13 = vsel %vm1068_vm1, %v3163_v25, %v3147_v10 }
 0x12e   : > { %4751 = vmatmul.mubr.msk.bf16.gmra.mrb[20].mxu0 %vm380_vm0, %v3239_v4  ;;  %4610 = vmatprep.mubr.msk.bf16.mxu1 %vm380_vm0, %v6514_v36  ;;  %v3227_v59 = vsel %vm1102_vm2, 0.0, %v3195_v13 }
 0x12f   : > { %4754 = vmatprep.mubr.msk.bf16.mxu0 %vm380_vm0, %v5822_v55  ;;  %v3179_v55 = vsel %vm1068_vm1, %v3147_v10, %v3163_v25 }
 0x130   : > { %v3243_v57 = vpack.c.bf16 %v3227_v59, %v3179_v55 }
 0x135   : > { %4611 = vmatmul.mubr.msk.bf16.gmra.mrb[24].mxu1 %vm380_vm0, %v1824_v32 }
 0x136   : > { %4755 = vmatmul.mubr.msk.bf16.gmra.mrb[24].mxu0 %vm380_vm0, %v5834_v50  ;;  %4614 = vmatprep.mubr.msk.bf16.mxu1 %vm380_vm0, %v1825_v45 }
 0x137   : > { %4758 = vmatprep.mubr.msk.bf16.mxu0 %vm380_vm0, %v5868_v26 }
 0x13d   : > { %4615 = vmatmul.mubr.msk.bf16.gmra.mrb[28].mxu1 %vm380_vm0, %v6136_v30 }
 0x13e   : > { %4759 = vmatmul.mubr.msk.bf16.gmra.mrb[28].mxu0 %vm380_vm0, %v3243_v57 }
 0x1b8   : > { %v4552_v36 = vpop.f32.mrb[0].mxu1 }
 0x1b9   : > { %v1652_v5 = vpop.f32.mrb[1].mxu1 }
 0x1ba   : > { %v4553_v50 = vpop.f32.mrb[2].mxu1 }
 0x1bb   : > { %v1655_v16 = vpop.f32.mrb[3].mxu1 }
 0x1c0   : > { %v4556_v24 = vpop.f32.mrb[4].mxu1 }
 0x1c1   : > { %v1668_v62 = vpop.f32.mrb[5].mxu1 }
 0x1c2   : > { %v4557_v26 = vpop.f32.mrb[6].mxu1 }
 0x1c3   : > { %v1671_v48 = vpop.f32.mrb[7].mxu1 }
 0x1c8   : > { %v6282_v6 = vpop.f32.mrb[8].mxu1 }
 0x1c9   : > { %v6284_v18 = vpop.f32.mrb[9].mxu1 }
 0x1ca   : > { %v6286_v42 = vpop.f32.mrb[10].mxu1 }
 0x1cb   : > { %v6288_v56 = vpop.f32.mrb[11].mxu1 }
 0x1d0   : > { %v6290_v30 = vpop.f32.mrb[12].mxu1 }
 0x1d1   : > { %v6292_v28 = vpop.f32.mrb[13].mxu1 }
 0x1d2   : > { %v6294_v35 = vpop.f32.mrb[14].mxu1 }
 0x1d3   : > { %v6296_v63 = vpop.f32.mrb[15].mxu1 }
 0x1d9   : > { %v4732_v14 = vpop.f32.mrb[0].mxu0 }
 0x1da   : > { %v4766_v38 = vadd.f32 %v4732_v14, %v4552_v36  ;;  %v3343_v52 = vpop.f32.mrb[1].mxu0 }
 0x1db   : > { %v4767_v31 = vadd.f32 %v3343_v52, %v1652_v5  ;;  %v4733_v2 = vpop.f32.mrb[2].mxu0 }
 0x1dc   : > { %v4167_v11 = vpack.c.bf16 %v4766_v38, %v4766_v38  ;;  %v4768_v54 = vadd.f32 %v4733_v2, %v4553_v50  ;;  %v3346_v27 = vpop.f32.mrb[3].mxu0  ;;  %v3734_v51 = vmul.f32 %v4766_v38, %v4766_v38  ;;  %v3666_v44 = vsel %vm380_vm0, %v4766_v38, 0.0 }
 0x1dd   : > { %v4165_v60 = vpack.c.bf16 %v4767_v31, %v4767_v31  ;;  %v3732_v17 = vmul.f32 %v4767_v31, %v4767_v31  ;;  %v4769_v49 = vadd.f32 %v3346_v27, %v1655_v16  ;;  %v3663_v53 = vsel %vm380_vm0, %v4767_v31, 0.0 }
 0x1de   : > { %3633 = vst.msk [vmem:[%s6303_s20 + $0x8] sm:$0xf] %vm3630_vm5, %v4167_v11  ;;  %v4168_v12 = vpack.c.bf16 %v4768_v54, %v4768_v54  ;;  %v3735_v1 = vmul.f32 %v4768_v54, %v4768_v54  ;;  %v3767_v29 = vsel %vm380_vm0, %v3734_v51, 0.0  ;;  %v3668_v47 = vsel %vm380_vm0, %v4768_v54, 0.0 }
 0x1df   : > { %3631 = vst.msk [vmem:[%s6303_s20] sm:$0xf] %vm3630_vm5, %v4165_v60  ;;  %v4166_v39 = vpack.c.bf16 %v4769_v49, %v4769_v49  ;;  %v3664_v40 = vsel %vm380_vm0, %v4769_v49, 0.0  ;;  %v3733_v7 = vmul.f32 %v4769_v49, %v4769_v49  ;;  %v3764_v22 = vsel %vm380_vm0, %v3732_v17, 0.0 }
 0x1e0   : > { %3634 = vst.msk [vmem:[%s6303_s20 + $0xc] sm:$0xf] %vm3630_vm5, %v4168_v12  ;;  %v3665_v61 = vadd.f32 %v3664_v40, %v3663_v53  ;;  %v3769_v9 = vsel %vm380_vm0, %v3735_v1, 0.0 }
 0x1e1   : > { %3632 = vst.msk [vmem:[%s6303_s20 + $0x4] sm:$0xf] %vm3630_vm5, %v4166_v39  ;;  %v3765_v37 = vsel %vm380_vm0, %v3733_v7, 0.0  ;;  %v4736_v34 = vpop.f32.mrb[4].mxu0 }
 0x1e2   : > { %v3667_v46 = vadd.f32 %v3666_v44, %v3665_v61  ;;  %v3766_v20 = vadd.f32 %v3765_v37, %v3764_v22  ;;  %v4770_v0 = vadd.f32 %v4736_v34, %v4556_v24  ;;  %v3359_v58 = vpop.f32.mrb[5].mxu0 }
 0x1e3   : > { %v4771_v3 = vadd.f32 %v3359_v58, %v1668_v62  ;;  %v4737_v21 = vpop.f32.mrb[6].mxu0 }
 0x1e4   : > { %v3768_v33 = vadd.f32 %v3767_v29, %v3766_v20  ;;  %v4171_v19 = vpack.c.bf16 %v4770_v0, %v4770_v0  ;;  %v3362_v8 = vpop.f32.mrb[7].mxu0  ;;  %v3669_v10 = vadd.f32 %v3668_v47, %v3667_v46  ;;  %v4772_v32 = vadd.f32 %v4737_v21, %v4557_v26 }
 0x1e5   : > { %v4169_v4 = vpack.c.bf16 %v4771_v3, %v4771_v3  ;;  %v3670_v25 = vsel %vm380_vm0, %v4771_v3, 0.0  ;;  %v3736_v43 = vmul.f32 %v4771_v3, %v4771_v3  ;;  %v4773_v41 = vadd.f32 %v3362_v8, %v1671_v48 }
 0x1e6   : > { %3637 = vst.msk [vmem:[%s6303_s20 + $0x18] sm:$0xf] %vm3630_vm5, %v4171_v19  ;;  %v3770_v23 = vadd.f32 %v3769_v9, %v3768_v33  ;;  %v3671_v15 = vadd.f32 %v3670_v25, %v3669_v10  ;;  %v3738_v13 = vmul.f32 %v4770_v0, %v4770_v0  ;;  %v4172_v59 = vpack.c.bf16 %v4772_v32, %v4772_v32 }
 0x1e7   : > { %3635 = vst.msk [vmem:[%s6303_s20 + $0x10] sm:$0xf] %vm3630_vm5, %v4169_v4  ;;  %v3771_v45 = vsel %vm380_vm0, %v3736_v43, 0.0  ;;  %v4170_v57 = vpack.c.bf16 %v4773_v41, %v4773_v41  ;;  %v3672_v36 = vsel %vm380_vm0, %v4773_v41, 0.0  ;;  %v3737_v5 = vmul.f32 %v4773_v41, %v4773_v41 }
 0x1e8   : > { %v3772_v55 = vadd.f32 %v3771_v45, %v3770_v23  ;;  %3638 = vst.msk [vmem:[%s6303_s20 + $0x1c] sm:$0xf] %vm3630_vm5, %v4172_v59  ;;  %v3673_v16 = vadd.f32 %v3672_v36, %v3671_v15  ;;  %v3674_v26 = vsel %vm380_vm0, %v4770_v0, 0.0  ;;  %v3739_v48 = vmul.f32 %v4772_v32, %v4772_v32 }
 0x1e9   : > { %v4740_v50 = vpop.f32.mrb[8].mxu0  ;;  %3636 = vst.msk [vmem:[%s6303_s20 + $0x14] sm:$0xf] %vm3630_vm5, %v4170_v57  ;;  %v3773_v14 = vsel %vm380_vm0, %v3737_v5, 0.0  ;;  %v3775_v31 = vsel %vm380_vm0, %v3738_v13, 0.0 }
 0x1ea   : > { %v4774_v24 = vadd.f32 %v4740_v50, %v6282_v6  ;;  %v3375_v62 = vpop.f32.mrb[9].mxu0  ;;  %v3675_v2 = vadd.f32 %v3674_v26, %v3673_v16  ;;  %v3774_v11 = vadd.f32 %v3773_v14, %v3772_v55  ;;  %v3676_v6 = vsel %vm380_vm0, %v4772_v32, 0.0 }
 0x1eb   : > { %v4775_v38 = vadd.f32 %v3375_v62, %v6284_v18  ;;  %v4741_v52 = vpop.f32.mrb[10].mxu0  ;;  %v3777_v39 = vsel %vm380_vm0, %v3739_v48, 0.0 }
 0x1ec   : > { %v4175_v54 = vpack.c.bf16 %v4774_v24, %v4774_v24  ;;  %v3378_v27 = vpop.f32.mrb[11].mxu0  ;;  %v3776_v51 = vadd.f32 %v3775_v31, %v3774_v11  ;;  %v3677_v12 = vadd.f32 %v3676_v6, %v3675_v2  ;;  %v4776_v18 = vadd.f32 %v4741_v52, %v6286_v42 }
 0x1ed   : > { %v4173_v60 = vpack.c.bf16 %v4775_v38, %v4775_v38  ;;  %v3678_v17 = vsel %vm380_vm0, %v4775_v38, 0.0  ;;  %v3740_v49 = vmul.f32 %v4775_v38, %v4775_v38  ;;  %v4777_v53 = vadd.f32 %v3378_v27, %v6288_v56 }
 0x1ee   : > { %3641 = vst.msk [vmem:[%s6303_s20 + $0x28] sm:$0xf] %vm3630_vm5, %v4175_v54  ;;  %v3742_v7 = vmul.f32 %v4774_v24, %v4774_v24  ;;  %v3679_v1 = vadd.f32 %v3678_v17, %v3677_v12  ;;  %v3778_v61 = vadd.f32 %v3777_v39, %v3776_v51  ;;  %v4176_v44 = vpack.c.bf16 %v4776_v18, %v4776_v18 }
 0x1ef   : > { %3639 = vst.msk [vmem:[%s6303_s20 + $0x20] sm:$0xf] %vm3630_vm5, %v4173_v60  ;;  %v3779_v40 = vsel %vm380_vm0, %v3740_v49, 0.0  ;;  %v4174_v22 = vpack.c.bf16 %v4777_v53, %v4777_v53  ;;  %v3680_v37 = vsel %vm380_vm0, %v4777_v53, 0.0  ;;  %v3741_v34 = vmul.f32 %v4777_v53, %v4777_v53 }
 0x1f0   : > { %v3780_v20 = vadd.f32 %v3779_v40, %v3778_v61  ;;  %3642 = vst.msk [vmem:[%s6303_s20 + $0x2c] sm:$0xf] %vm3630_vm5, %v4176_v44  ;;  %v3681_v42 = vadd.f32 %v3680_v37, %v3679_v1  ;;  %v3682_v58 = vsel %vm380_vm0, %v4774_v24, 0.0  ;;  %v3743_v29 = vmul.f32 %v4776_v18, %v4776_v18 }
 0x1f1   : > { %v4744_v46 = vpop.f32.mrb[12].mxu0  ;;  %3640 = vst.msk [vmem:[%s6303_s20 + $0x24] sm:$0xf] %vm3630_vm5, %v4174_v22  ;;  %v3781_v3 = vsel %vm380_vm0, %v3741_v34, 0.0  ;;  %v3783_v9 = vsel %vm380_vm0, %v3742_v7, 0.0 }
 0x1f2   : > { %v4778_v56 = vadd.f32 %v4744_v46, %v6290_v30  ;;  %v3391_v0 = vpop.f32.mrb[13].mxu0  ;;  %v3683_v33 = vadd.f32 %v3682_v58, %v3681_v42  ;;  %v3782_v19 = vadd.f32 %v3781_v3, %v3780_v20  ;;  %v3684_v30 = vsel %vm380_vm0, %v4776_v18, 0.0 }
 0x1f3   : > { %v4779_v21 = vadd.f32 %v3391_v0, %v6292_v28  ;;  %v4745_v47 = vpop.f32.mrb[14].mxu0  ;;  %v3785_v15 = vsel %vm380_vm0, %v3743_v29, 0.0 }
 0x1f4   : > { %v4179_v8 = vpack.c.bf16 %v4778_v56, %v4778_v56  ;;  %v3394_v4 = vpop.f32.mrb[15].mxu0  ;;  %v3784_v23 = vadd.f32 %v3783_v9, %v3782_v19  ;;  %v3685_v32 = vadd.f32 %v3684_v30, %v3683_v33  ;;  %v4780_v28 = vadd.f32 %v4745_v47, %v6294_v35 }
 0x1f5   : > { %v4177_v10 = vpack.c.bf16 %v4779_v21, %v4779_v21  ;;  %v3686_v25 = vsel %vm380_vm0, %v4779_v21, 0.0  ;;  %v3744_v43 = vmul.f32 %v4779_v21, %v4779_v21  ;;  %v4781_v41 = vadd.f32 %v3394_v4, %v6296_v63 }
 0x1f6   : > { %3645 = vst.msk [vmem:[%s6303_s20 + $0x38] sm:$0xf] %vm3630_vm5, %v4179_v8  ;;  %v3746_v13 = vmul.f32 %v4778_v56, %v4778_v56  ;;  %v3687_v55 = vadd.f32 %v3686_v25, %v3685_v32  ;;  %v3786_v59 = vadd.f32 %v3785_v15, %v3784_v23  ;;  %v4180_v57 = vpack.c.bf16 %v4780_v28, %v4780_v28 }
 0x1f7   : > { %3643 = vst.msk [vmem:[%s6303_s20 + $0x30] sm:$0xf] %vm3630_vm5, %v4177_v10  ;;  %v3787_v45 = vsel %vm380_vm0, %v3744_v43, 0.0  ;;  %v4178_v5 = vpack.c.bf16 %v4781_v41, %v4781_v41  ;;  %v3688_v50 = vsel %vm380_vm0, %v4781_v41, 0.0  ;;  %v3745_v16 = vmul.f32 %v4781_v41, %v4781_v41 }
 0x1f8   : > { %v4604_v36 = vpop.f32.mrb[16].mxu1  ;;  %v3788_v62 = vadd.f32 %v3787_v45, %v3786_v59  ;;  %3646 = vst.msk [vmem:[%s6303_s20 + $0x3c] sm:$0xf] %vm3630_vm5, %v4180_v57  ;;  %v3689_v63 = vadd.f32 %v3688_v50, %v3687_v55  ;;  %v3690_v38 = vsel %vm380_vm0, %v4778_v56, 0.0  ;;  %v3747_v52 = vmul.f32 %v4780_v28, %v4780_v28 }
 0x1f9   : > { %v1990_v35 = vpop.f32.mrb[17].mxu1  ;;  %v4748_v24 = vpop.f32.mrb[16].mxu0  ;;  %3644 = vst.msk [vmem:[%s6303_s20 + $0x34] sm:$0xf] %vm3630_vm5, %v4178_v5  ;;  %v3789_v31 = vsel %vm380_vm0, %v3745_v16, 0.0  ;;  %v3791_v27 = vsel %vm380_vm0, %v3746_v13, 0.0 }
 0x1fa   : > { %v4782_v26 = vadd.f32 %v4748_v24, %v4604_v36  ;;  %v4605_v48 = vpop.f32.mrb[18].mxu1  ;;  %v3407_v14 = vpop.f32.mrb[17].mxu0  ;;  %v3691_v6 = vadd.f32 %v3690_v38, %v3689_v63  ;;  %v3790_v60 = vadd.f32 %v3789_v31, %v3788_v62  ;;  %v3692_v51 = vsel %vm380_vm0, %v4780_v28, 0.0 }
 0x1fb   : > { %v4783_v2 = vadd.f32 %v3407_v14, %v1990_v35  ;;  %v1993_v11 = vpop.f32.mrb[19].mxu1  ;;  %v4749_v54 = vpop.f32.mrb[18].mxu0  ;;  %v3793_v61 = vsel %vm380_vm0, %v3747_v52, 0.0 }
 0x1fc   : > { %v4183_v17 = vpack.c.bf16 %v4782_v26, %v4782_v26  ;;  %v3410_v49 = vpop.f32.mrb[19].mxu0  ;;  %v3792_v39 = vadd.f32 %v3791_v27, %v3790_v60  ;;  %v3693_v40 = vadd.f32 %v3692_v51, %v3691_v6  ;;  %v4784_v7 = vadd.f32 %v4749_v54, %v4605_v48 }
 0x1fd   : > { %v4181_v12 = vpack.c.bf16 %v4783_v2, %v4783_v2  ;;  %v3694_v18 = vsel %vm380_vm0, %v4783_v2, 0.0  ;;  %v3748_v53 = vmul.f32 %v4783_v2, %v4783_v2  ;;  %v4785_v1 = vadd.f32 %v3410_v49, %v1993_v11 }
 0x1fe   : > { %3649 = vst.msk [vmem:[%s6303_s20 + $0x48] sm:$0xf] %vm3630_vm5, %v4183_v17  ;;  %v3750_v22 = vmul.f32 %v4782_v26, %v4782_v26  ;;  %v3695_v37 = vadd.f32 %v3694_v18, %v3693_v40  ;;  %v3794_v34 = vadd.f32 %v3793_v61, %v3792_v39  ;;  %v4184_v46 = vpack.c.bf16 %v4784_v7, %v4784_v7 }
 0x1ff   : > { %3647 = vst.msk [vmem:[%s6303_s20 + $0x40] sm:$0xf] %vm3630_vm5, %v4181_v12  ;;  %v3795_v44 = vsel %vm380_vm0, %v3748_v53, 0.0  ;;  %v4182_v42 = vpack.c.bf16 %v4785_v1, %v4785_v1  ;;  %v3696_v56 = vsel %vm380_vm0, %v4785_v1, 0.0  ;;  %v3749_v0 = vmul.f32 %v4785_v1, %v4785_v1 }
 0x200   : > { %v4608_v20 = vpop.f32.mrb[20].mxu1  ;;  %v3796_v3 = vadd.f32 %v3795_v44, %v3794_v34  ;;  %3650 = vst.msk [vmem:[%s6303_s20 + $0x4c] sm:$0xf] %vm3630_vm5, %v4184_v46  ;;  %v3697_v21 = vadd.f32 %v3696_v56, %v3695_v37  ;;  %v3698_v19 = vsel %vm380_vm0, %v4782_v26, 0.0  ;;  %v3751_v8 = vmul.f32 %v4784_v7, %v4784_v7 }
 0x201   : > { %v2006_v58 = vpop.f32.mrb[21].mxu1  ;;  %v4752_v29 = vpop.f32.mrb[20].mxu0  ;;  %3648 = vst.msk [vmem:[%s6303_s20 + $0x44] sm:$0xf] %vm3630_vm5, %v4182_v42  ;;  %v3797_v4 = vsel %vm380_vm0, %v3749_v0, 0.0  ;;  %v3799_v43 = vsel %vm380_vm0, %v3750_v22, 0.0 }
 0x202   : > { %v4786_v47 = vadd.f32 %v4752_v29, %v4608_v20  ;;  %v4609_v9 = vpop.f32.mrb[22].mxu1  ;;  %v3423_v33 = vpop.f32.mrb[21].mxu0  ;;  %v3699_v23 = vadd.f32 %v3698_v19, %v3697_v21  ;;  %v3798_v32 = vadd.f32 %v3797_v4, %v3796_v3  ;;  %v3700_v15 = vsel %vm380_vm0, %v4784_v7, 0.0 }
 0x203   : > { %v4787_v30 = vadd.f32 %v3423_v33, %v2006_v58  ;;  %v2009_v10 = vpop.f32.mrb[23].mxu1  ;;  %v4753_v25 = vpop.f32.mrb[22].mxu0  ;;  %v3801_v50 = vsel %vm380_vm0, %v3751_v8, 0.0 }
 0x204   : > { %v4187_v28 = vpack.c.bf16 %v4786_v47, %v4786_v47  ;;  %v3426_v41 = vpop.f32.mrb[23].mxu0  ;;  %v3800_v59 = vadd.f32 %v3799_v43, %v3798_v32  ;;  %v3701_v57 = vadd.f32 %v3700_v15, %v3699_v23  ;;  %v4788_v36 = vadd.f32 %v4753_v25, %v4609_v9 }
 0x205   : > { %v4185_v45 = vpack.c.bf16 %v4787_v30, %v4787_v30  ;;  %v3702_v13 = vsel %vm380_vm0, %v4787_v30, 0.0  ;;  %v3752_v55 = vmul.f32 %v4787_v30, %v4787_v30  ;;  %v4789_v5 = vadd.f32 %v3426_v41, %v2009_v10 }
 0x206   : > { %3653 = vst.msk [vmem:[%s6303_s20 + $0x58] sm:$0xf] %vm3630_vm5, %v4187_v28  ;;  %v3754_v35 = vmul.f32 %v4786_v47, %v4786_v47  ;;  %v3703_v24 = vadd.f32 %v3702_v13, %v3701_v57  ;;  %v3802_v62 = vadd.f32 %v3801_v50, %v3800_v59  ;;  %v4188_v63 = vpack.c.bf16 %v4788_v36, %v4788_v36 }
 0x207   : > { %3651 = vst.msk [vmem:[%s6303_s20 + $0x50] sm:$0xf] %vm3630_vm5, %v4185_v45  ;;  %v3803_v16 = vsel %vm380_vm0, %v3752_v55, 0.0  ;;  %v4186_v48 = vpack.c.bf16 %v4789_v5, %v4789_v5  ;;  %v3704_v14 = vsel %vm380_vm0, %v4789_v5, 0.0  ;;  %v3753_v38 = vmul.f32 %v4789_v5, %v4789_v5 }
 0x208   : > { %v4612_v26 = vpop.f32.mrb[24].mxu1  ;;  %v3804_v2 = vadd.f32 %v3803_v16, %v3802_v62  ;;  %3654 = vst.msk [vmem:[%s6303_s20 + $0x5c] sm:$0xf] %vm3630_vm5, %v4188_v63  ;;  %v3705_v11 = vadd.f32 %v3704_v14, %v3703_v24  ;;  %v3706_v60 = vsel %vm380_vm0, %v4786_v47, 0.0  ;;  %v3755_v17 = vmul.f32 %v4788_v36, %v4788_v36 }
 0x209   : > { %v2022_v52 = vpop.f32.mrb[25].mxu1  ;;  %v4756_v31 = vpop.f32.mrb[24].mxu0  ;;  %3652 = vst.msk [vmem:[%s6303_s20 + $0x54] sm:$0xf] %vm3630_vm5, %v4186_v48  ;;  %v3805_v49 = vsel %vm380_vm0, %v3753_v38, 0.0  ;;  %v3807_v53 = vsel %vm380_vm0, %v3754_v35, 0.0 }
 0x20a   : > { %v4790_v54 = vadd.f32 %v4756_v31, %v4612_v26  ;;  %v4613_v27 = vpop.f32.mrb[26].mxu1  ;;  %v3439_v6 = vpop.f32.mrb[25].mxu0  ;;  %v3707_v39 = vadd.f32 %v3706_v60, %v3705_v11  ;;  %v3806_v40 = vadd.f32 %v3805_v49, %v3804_v2  ;;  %v3708_v61 = vsel %vm380_vm0, %v4788_v36, 0.0 }
 0x20b   : > { %v4791_v51 = vadd.f32 %v3439_v6, %v2022_v52  ;;  %v2025_v12 = vpop.f32.mrb[27].mxu1  ;;  %v4757_v18 = vpop.f32.mrb[26].mxu0  ;;  %v3809_v56 = vsel %vm380_vm0, %v3755_v17, 0.0 }
 0x20c   : > { %v4191_v7 = vpack.c.bf16 %v4790_v54, %v4790_v54  ;;  %v3442_v1 = vpop.f32.mrb[27].mxu0  ;;  %v3808_v34 = vadd.f32 %v3807_v53, %v3806_v40  ;;  %v3709_v46 = vadd.f32 %v3708_v61, %v3707_v39  ;;  %v4792_v20 = vadd.f32 %v4757_v18, %v4613_v27 }
 0x20d   : > { %v4189_v44 = vpack.c.bf16 %v4791_v51, %v4791_v51  ;;  %v3710_v22 = vsel %vm380_vm0, %v4791_v51, 0.0  ;;  %v3756_v37 = vmul.f32 %v4791_v51, %v4791_v51  ;;  %v4793_v42 = vadd.f32 %v3442_v1, %v2025_v12 }
 0x20e   : > { %3657 = vst.msk [vmem:[%s6303_s20 + $0x68] sm:$0xf] %vm3630_vm5, %v4191_v7  ;;  %v3758_v58 = vmul.f32 %v4790_v54, %v4790_v54  ;;  %v3711_v29 = vadd.f32 %v3710_v22, %v3709_v46  ;;  %v3810_v3 = vadd.f32 %v3809_v56, %v3808_v34  ;;  %v4192_v21 = vpack.c.bf16 %v4792_v20, %v4792_v20 }
 0x20f   : > { %3655 = vst.msk [vmem:[%s6303_s20 + $0x60] sm:$0xf] %vm3630_vm5, %v4189_v44  ;;  %v3811_v0 = vsel %vm380_vm0, %v3756_v37, 0.0  ;;  %v4190_v9 = vpack.c.bf16 %v4793_v42, %v4793_v42  ;;  %v3712_v33 = vsel %vm380_vm0, %v4793_v42, 0.0  ;;  %v3757_v19 = vmul.f32 %v4793_v42, %v4793_v42 }
 0x210   : > { %v4616_v47 = vpop.f32.mrb[28].mxu1  ;;  %v3812_v30 = vadd.f32 %v3811_v0, %v3810_v3  ;;  %3658 = vst.msk [vmem:[%s6303_s20 + $0x6c] sm:$0xf] %vm3630_vm5, %v4192_v21  ;;  %v3713_v10 = vadd.f32 %v3712_v33, %v3711_v29  ;;  %v3714_v32 = vsel %vm380_vm0, %v4790_v54, 0.0  ;;  %v3759_v28 = vmul.f32 %v4792_v20, %v4792_v20 }
 0x211   : > { %v2038_v8 = vpop.f32.mrb[29].mxu1  ;;  %v4760_v4 = vpop.f32.mrb[28].mxu0  ;;  %3656 = vst.msk [vmem:[%s6303_s20 + $0x64] sm:$0xf] %vm3630_vm5, %v4190_v9  ;;  %v3813_v41 = vsel %vm380_vm0, %v3757_v19, 0.0  ;;  %v3815_v55 = vsel %vm380_vm0, %v3758_v58, 0.0 }
 0x212   : > { %v4794_v25 = vadd.f32 %v4760_v4, %v4616_v47  ;;  %v4617_v43 = vpop.f32.mrb[30].mxu1  ;;  %v3455_v23 = vpop.f32.mrb[29].mxu0  ;;  %v3715_v59 = vadd.f32 %v3714_v32, %v3713_v10  ;;  %v3814_v57 = vadd.f32 %v3813_v41, %v3812_v30  ;;  %v3716_v50 = vsel %vm380_vm0, %v4792_v20, 0.0 }
 0x213   : > { %v4795_v15 = vadd.f32 %v3455_v23, %v2038_v8  ;;  %v2041_v45 = vpop.f32.mrb[31].mxu1  ;;  %v4761_v13 = vpop.f32.mrb[30].mxu0  ;;  %v3817_v14 = vsel %vm380_vm0, %v3759_v28, 0.0 }
 0x214   : > { %v4195_v36 = vpack.c.bf16 %v4794_v25, %v4794_v25  ;;  %v3458_v5 = vpop.f32.mrb[31].mxu0  ;;  %v3816_v62 = vadd.f32 %v3815_v55, %v3814_v57  ;;  %v3717_v63 = vadd.f32 %v3716_v50, %v3715_v59  ;;  %v4796_v26 = vadd.f32 %v4761_v13, %v4617_v43 }
 0x215   : > { %v4193_v16 = vpack.c.bf16 %v4795_v15, %v4795_v15  ;;  %v3718_v35 = vsel %vm380_vm0, %v4795_v15, 0.0  ;;  %v3760_v24 = vmul.f32 %v4795_v15, %v4795_v15  ;;  %v4797_v48 = vadd.f32 %v3458_v5, %v2041_v45 }
 0x216   : > { %3661 = vst.msk [vmem:[%s6303_s20 + $0x78] sm:$0xf] %vm3630_vm5, %v4195_v36  ;;  %v3719_v52 = vadd.f32 %v3718_v35, %v3717_v63  ;;  %v3818_v31 = vadd.f32 %v3817_v14, %v3816_v62  ;;  %v4196_v2 = vpack.c.bf16 %v4796_v26, %v4796_v26  ;;  %v3762_v11 = vmul.f32 %v4794_v25, %v4794_v25 }
 0x217   : > { %3659 = vst.msk [vmem:[%s6303_s20 + $0x70] sm:$0xf] %vm3630_vm5, %v4193_v16  ;;  %v3819_v38 = vsel %vm380_vm0, %v3760_v24, 0.0  ;;  %v4194_v54 = vpack.c.bf16 %v4797_v48, %v4797_v48  ;;  %v3720_v27 = vsel %vm380_vm0, %v4797_v48, 0.0  ;;  %v3761_v6 = vmul.f32 %v4797_v48, %v4797_v48 }
 0x218   : > { %v3820_v60 = vadd.f32 %v3819_v38, %v3818_v31  ;;  %3662 = vst.msk [vmem:[%s6303_s20 + $0x7c] sm:$0xf] %vm3630_vm5, %v4196_v2  ;;  %v3721_v17 = vadd.f32 %v3720_v27, %v3719_v52  ;;  %v3722_v49 = vsel %vm380_vm0, %v4794_v25, 0.0  ;;  %v3763_v51 = vmul.f32 %v4796_v26, %v4796_v26 }
 0x219   : > { %3660 = vst.msk [vmem:[%s6303_s20 + $0x74] sm:$0xf] %vm3630_vm5, %v4194_v54  ;;  %v3821_v12 = vsel %vm380_vm0, %v3761_v6, 0.0  ;;  %v3823_v39 = vsel %vm380_vm0, %v3762_v11, 0.0  ;;  %v3724_v40 = vsel %vm380_vm0, %v4796_v26, 0.0 }
 0x21a   : > { %v3723_v18 = vadd.f32 %v3722_v49, %v3721_v17  ;;  %v3822_v53 = vadd.f32 %v3821_v12, %v3820_v60  ;;  %v3825_v61 = vsel %vm380_vm0, %v3763_v51, 0.0 }
 0x21c   : > { %v3725_v7 = vadd.f32 %v3724_v40, %v3723_v18  ;;  %v3824_v1 = vadd.f32 %v3823_v39, %v3822_v53 }
 0x21e   : > { %v3726_v44 = vrot.slane %v3725_v7, 4  ;;  %v3826_v22 = vadd.f32 %v3825_v61, %v3824_v1 }
 0x220   : > { %v3727_v37 = vadd.f32 %v3726_v44, %v3725_v7  ;;  %v3827_v34 = vrot.slane %v3826_v22, 4 }
 0x222   : > { %v3728_v46 = vrot.slane %v3727_v37, 2  ;;  %v3828_v20 = vadd.f32 %v3827_v34, %v3826_v22 }
 0x224   : > { %v3729_v42 = vadd.f32 %v3728_v46, %v3727_v37  ;;  %v3829_v56 = vrot.slane %v3828_v20, 2 }
 0x226   : > { %v3730_v0 = vrot.slane %v3729_v42, 1  ;;  %v3830_v58 = vadd.f32 %v3829_v56, %v3828_v20 }
 0x228   : > { %v3831_v29 = vrot.slane %v3830_v58, 1  ;;  %v3731_v3 = vadd.f32 %v3730_v0, %v3729_v42 }
 0x22a   : > { %v3832_v21 = vadd.f32 %v3831_v29, %v3830_v58 }
 0x22c   : > { %v3834_v47 = vsel %vm3833_vm6, %v3731_v3, %v3832_v21 }
 0x22d   : > { %3836 = vst.msk [vmem:[%s208_s23] sm:$0x3] %vm3835_vm7, %v3834_v47 }
 0x22e PF: > { %s15_s15 = sadd.s32 1, %s5083_s15  }
 0x22f   : > { %p12_p4 = scmp.ge.s32.totalorder %s15_s15, 4  }
 0x231   :  { %14 = sbr.rel (!%p12_p4) target bundleno = 1 (0x1), region = 85 }

</bundles_post_ra>
